<compile_context>
chip_gen: v5e
topology: v5e:2x2
jax: 0.10.0
libtpu: 0.0.40
codegen_flags: <defaults>
</compile_context>

<pallas_src>
import functools

import jax
import jax.numpy as jnp
from jax.experimental import pallas as pl
from jax.experimental.pallas import tpu as pltpu


# ----------------------------- Pallas kernels ---------------------------------------

def _conv_matmul_kernel(*refs, piece_taps, has_pre, has_post, post_relu):
    """out(co, tn) = [post]( sum_i  W_i(co,c_i) @ mean_t[relu(X_{i,t}*s_i+b_i)](c_i, tn) ).

    piece_taps: tuple, number of (averaged) tap inputs per piece (1 for ordinary convs,
                4 for the transition conv with the fused 2x2 average pool).
    """
    o_ref = refs[-1]
    n_pieces = len(piece_taps)
    nx = sum(piece_taps)
    xs = refs[0:nx]
    ws = refs[nx:nx + n_pieces]
    idx = nx + n_pieces
    pres = None
    if has_pre:
        pres = refs[idx:idx + 2 * n_pieces]
        idx += 2 * n_pieces
    posts = refs[idx:idx + 2] if has_post else None

    acc = None
    xoff = 0
    for i, nt in enumerate(piece_taps):
        xg = None
        for t in range(nt):
            xi = xs[xoff + t][...]
            if has_pre:  # fused BN(eval)+ReLU prologue, per input-channel
                xi = jnp.maximum(xi * pres[2 * i][...] + pres[2 * i + 1][...], 0.0)
            xg = xi if xg is None else xg + xi
        xoff += nt
        if nt > 1:       # fused average pooling over the taps (before the matmul)
            xg = xg * (1.0 / nt)
        d = jnp.dot(ws[i][...], xg, preferred_element_type=jnp.float32)
        acc = d if acc is None else acc + d
    if has_post:  # fused BN(eval) epilogue, per output-channel
        acc = acc * posts[0][...] + posts[1][...]
    if post_relu:
        acc = jnp.maximum(acc, 0.0)
    o_ref[...] = acc.astype(o_ref.dtype)


def _pool_kernel(x_ref, o_ref, *, mode):
    x = x_ref[...]
    if mode == "max":
        o_ref[...] = jnp.max(x, axis=0, keepdims=True)
    else:
        o_ref[...] = jnp.mean(x, axis=0, keepdims=True)


def _cls_head_kernel(*refs, n_pieces):
    """logits^T(ncls, N) = bias + sum_i Wt_i(ncls,c_i) @ mean_S( relu(X_i*s_i+b_i) )."""
    o_ref = refs[-1]
    xs = refs[0:n_pieces]
    sb = refs[n_pieces:3 * n_pieces]
    wt = refs[3 * n_pieces:4 * n_pieces]
    bias = refs[4 * n_pieces]
    acc = None
    for i in range(n_pieces):
        act = jnp.maximum(xs[i][...] * sb[2 * i][...] + sb[2 * i + 1][...], 0.0)  # bn5+relu5
        feat = jnp.mean(act, axis=-1)                                             # avgPool(7)
        d = jnp.dot(wt[i][...], feat, preferred_element_type=jnp.float32)         # classifier
        acc = d if acc is None else acc + d
    o_ref[...] = acc + bias[...]


# ----------------------------- Pallas wrappers ---------------------------------------

def _choose_col_tile(m, cap=1024):
    """Lane-dim (M) tile: full block when small, else ~M/2 rounded up to 128 (grid >= 2)."""
    if m <= 512:
        return m
    half = -(-m // 2)
    return min(cap, -(-half // 128) * 128)


def conv_matmul(pieces, weights, pre=None, post=None, post_relu=False):
    """Channel-major fused conv matmul (optionally with fused tap averaging per piece).

    pieces:  list; each entry is either an array (c_i, M) or a tuple of tap arrays (c_i, M)
             that are BN/ReLU'd (if `pre`) and AVERAGED before the matmul (fused avg-pool).
    weights: list of (cout, c_i) weight slices (same piece order).
    pre:     None or list of (scale_i, bias_i) each (c_i,)  -> relu(x*s+b) prologue per piece.
    post:    None or (scale, bias) each (cout,)              -> epilogue; post_relu applies ReLU.
    Returns (cout, M) float32.
    """
    groups = [p if isinstance(p, (tuple, list)) else (p,) for p in pieces]
    piece_taps = tuple(len(g) for g in groups)
    cout = weights[0].shape[0]
    M = groups[0][0].shape[1]
    tn = _choose_col_tile(M)
    grid = (pl.cdiv(M, tn),)

    inputs, in_specs = [], []
    for g in groups:
        for x in g:
            inputs.append(x)
            in_specs.append(pl.BlockSpec((x.shape[0], tn), lambda j: (0, j)))
    for w in weights:
        inputs.append(w)
        in_specs.append(pl.BlockSpec(w.shape, lambda j: (0, 0)))
    has_pre = pre is not None
    if has_pre:
        for s, b in pre:
            c = s.shape[0]
            inputs.append(s.reshape(c, 1))
            in_specs.append(pl.BlockSpec((c, 1), lambda j: (0, 0)))
            inputs.append(b.reshape(c, 1))
            in_specs.append(pl.BlockSpec((c, 1), lambda j: (0, 0)))
    has_post = post is not None
    if has_post:
        s, b = post
        inputs.append(s.reshape(cout, 1))
        in_specs.append(pl.BlockSpec((cout, 1), lambda j: (0, 0)))
        inputs.append(b.reshape(cout, 1))
        in_specs.append(pl.BlockSpec((cout, 1), lambda j: (0, 0)))

    kernel = functools.partial(_conv_matmul_kernel, piece_taps=piece_taps,
                               has_pre=has_pre, has_post=has_post, post_relu=post_relu)
    return pl.pallas_call(
        kernel,
        out_shape=jax.ShapeDtypeStruct((cout, M), jnp.float32),
        grid=grid,
        in_specs=in_specs,
        out_specs=pl.BlockSpec((cout, tn), lambda j: (0, j)),
        compiler_params=pltpu.CompilerParams(dimension_semantics=("parallel",)),
    )(*inputs)


def im2col_cm(a, C, N, H, W, kh, kw, stride, padding):
    """a:(C, N*H*W) channel-major -> patches (C*kh*kw, N*OH*OW), K-order (cin, kh, kw)."""
    x = a.reshape(C, N, H, W)
    if padding:
        x = jnp.pad(x, ((0, 0), (0, 0), (padding, padding), (padding, padding)))
    OH = (H + 2 * padding - kh) // stride + 1
    OW = (W + 2 * padding - kw) // stride + 1
    taps = [x[:, :, i:i + stride * (OH - 1) + 1:stride, j:j + stride * (OW - 1) + 1:stride]
            for i in range(kh) for j in range(kw)]
    patches = jnp.stack(taps, axis=1).reshape(C * kh * kw, N * OH * OW)
    return patches, OH, OW


def pool2d_cm(a, C, N, H, W, k, stride, padding, mode):
    """Window-leading flat layout (k*k, C*N*OH*OW); reduce in a single-block Pallas kernel."""
    x = a.reshape(C, N, H, W)
    pad_val = -jnp.inf if mode == "max" else 0.0
    if padding:
        x = jnp.pad(x, ((0, 0), (0, 0), (padding, padding), (padding, padding)),
                    constant_values=pad_val)
    OH = (H + 2 * padding - k) // stride + 1
    OW = (W + 2 * padding - k) // stride + 1
    taps = [x[:, :, i:i + stride * (OH - 1) + 1:stride, j:j + stride * (OW - 1) + 1:stride]
            for i in range(k) for j in range(k)]
    flat = jnp.stack(taps, axis=0).reshape(k * k, C * N * OH * OW)
    out = pl.pallas_call(
        functools.partial(_pool_kernel, mode=mode),
        out_shape=jax.ShapeDtypeStruct((1, C * N * OH * OW), jnp.float32),
    )(flat)
    return out.reshape(C, N * OH * OW), OH, OW


def classifier_head(pieces, channels, N, H, W, bn_scale, bn_bias, cls_w, cls_b):
    """Fused norm5+relu5 + global avgPool(HxW) + Linear classifier over feature pieces."""
    S = H * W
    ncls = cls_w.shape[1]
    offs = _offsets(channels)
    inputs = [x.reshape(c, N, S) for x, c in zip(pieces, channels)]
    for o, c in zip(offs, channels):
        inputs.append(bn_scale[o:o + c].reshape(c, 1, 1))
        inputs.append(bn_bias[o:o + c].reshape(c, 1, 1))
    for o, c in zip(offs, channels):
        inputs.append(jnp.transpose(cls_w[o:o + c, :]))   # (ncls, c_i)
    inputs.append(cls_b.reshape(ncls, 1))
    out_t = pl.pallas_call(
        functools.partial(_cls_head_kernel, n_pieces=len(pieces)),
        out_shape=jax.ShapeDtypeStruct((ncls, N), jnp.float32),
    )(*inputs)
    return jnp.transpose(out_t)   # (N, ncls)


def _offsets(channels):
    offs, o = [], 0
    for c in channels:
        offs.append(o)
        o += c
    return offs


# ----------------------------- Parameters -------------------------------------------

def bn_affine(c, eps=1e-5):
    # __init__: gamma=1, beta=0; default running stats mean=0, var=1 (eval-mode BN).
    gamma = jnp.ones((c,), jnp.float32)
    beta = jnp.zeros((c,), jnp.float32)
    mean = jnp.zeros((c,), jnp.float32)
    var = jnp.ones((c,), jnp.float32)
    scale = gamma / jnp.sqrt(var + eps)
    shift = beta - mean * scale
    return scale, shift


def conv_weight(key, cout, cin, kh, kw):
    # weight ~ N(0, sqrt(2 / (prod(kernel_size) * out_channels))), PyTorch (cout,cin,kh,kw)
    std = (2.0 / (kh * kw * cout)) ** 0.5
    w = std * jax.random.normal(key, (cout, cin, kh, kw), jnp.float32)
    return w.reshape(cout, cin * kh * kw)   # K-order (cin, kh, kw) matches im2col_cm


def init_densenet_params(key, input_channel=3, growth_rate=8, block_config=(2, 2),
                         num_init_features=16, bn_size=2, num_classes=10):
    params = {}
    keys = iter(jax.random.split(key, 256))
    params["head_conv"] = conv_weight(next(keys), num_init_features, input_channel, 7, 7)
    params["head_bn"] = bn_affine(num_init_features)
    nf = num_init_features
    for bi, nlayers in enumerate(block_config):
        for li in range(nlayers):
            params[f"block{bi}_layer{li}"] = {
                "bn1": bn_affine(nf),
                "conv1": conv_weight(next(keys), bn_size * growth_rate, nf, 1, 1),
                "bn2": bn_affine(bn_size * growth_rate),
                "conv2": conv_weight(next(keys), growth_rate, bn_size * growth_rate, 3, 3),
            }
            nf += growth_rate
        if bi != len(block_config) - 1:
            params[f"trans{bi}"] = {
                "bn": bn_affine(nf),
                "conv": conv_weight(next(keys), nf // 2, nf, 1, 1),
            }
            nf //= 2
    params["bn5"] = bn_affine(nf)
    bound = 1.0 / (nf ** 0.5)   # default Linear init (uniform); bias zeroed in __init__
    params["cls_w"] = jax.random.uniform(next(keys), (nf, num_classes), jnp.float32,
                                         minval=-bound, maxval=bound)
    params["cls_b"] = jnp.zeros((num_classes,), jnp.float32)
    return params


# ----------------------------- Forward pass ------------------------------------------

def densenet_forward(x_nchw, params, block_config=(2, 2)):
    N, Cin, H, W = x_nchw.shape
    # NCHW -> channel-major (C, N*H*W): large spatial dim lands on lanes everywhere below.
    a = jnp.transpose(x_nchw.astype(jnp.float32), (1, 0, 2, 3)).reshape(Cin, N * H * W)

    # Head A: conv0 7x7 /2 pad 3 (+ fused norm0/relu0 epilogue), then maxpool 3x3 /2 pad 1.
    patches, H, W = im2col_cm(a, Cin, N, H, W, 7, 7, 2, 3)
    s0, b0 = params["head_bn"]
    a = conv_matmul([patches], [params["head_conv"]], post=(s0, b0), post_relu=True)
    a, H, W = pool2d_cm(a, a.shape[0], N, H, W, 3, 2, 1, "max")

    # Dense features kept as a list of pieces; no channel concatenation is ever materialised.
    pieces, channels = [a], [a.shape[0]]
    for bi, nlayers in enumerate(block_config):
        for li in range(nlayers):
            p = params[f"block{bi}_layer{li}"]
            offs = _offsets(channels)
            s1, b1 = p["bn1"]
            s2, b2 = p["bn2"]
            pre = [(s1[o:o + c], b1[o:o + c]) for o, c in zip(offs, channels)]
            w1 = [p["conv1"][:, o:o + c] for o, c in zip(offs, channels)]
            # norm1/relu1 (prologue) + conv1 1x1 + norm2/relu2 (epilogue), one kernel.
            h = conv_matmul(pieces, w1, pre=pre, post=(s2, b2), post_relu=True)
            # conv2 3x3 pad 1 (drop_rate == 0 -> dropout identity).
            hp, _, _ = im2col_cm(h, h.shape[0], N, H, W, 3, 3, 1, 1)
            new = conv_matmul([hp], [p["conv2"]])
            pieces.append(new)
            channels.append(new.shape[0])
        if bi != len(block_config) - 1:
            t = params[f"trans{bi}"]
            st, bt = t["bn"]
            offs = _offsets(channels)
            pre = [(st[o:o + c], bt[o:o + c]) for o, c in zip(offs, channels)]
            wt = [t["conv"][:, o:o + c] for o, c in zip(offs, channels)]
            # Transition: norm/relu (prologue) + conv 1x1 + avgpool 2x2 /2, ALL in one kernel.
            # avgpool and the 1x1 conv commute, so each piece is passed as its 4 pooling taps;
            # the kernel applies BN+ReLU per tap, averages them, then matmuls at the pooled
            # resolution (4x fewer matmul FLOPs, no full-res intermediate in HBM).
            OH, OW = H // 2, W // 2
            tap_groups = []
            for x, c in zip(pieces, channels):
                x4 = x.reshape(c, N, H, W)
                taps = tuple(x4[:, :, i::2, j::2].reshape(c, N * OH * OW)
                             for i in range(2) for j in range(2))
                tap_groups.append(taps)
            y = conv_matmul(tap_groups, wt, pre=pre)
            H, W = OH, OW
            pieces, channels = [y], [y.shape[0]]

    # norm5 + relu5 + avgPool(7, stride=1) + flatten + Linear, fused into one Pallas kernel.
    assert H == 7 and W == 7, "avgPool(7) in the reference expects a 7x7 final feature map"
    s5, b5 = params["bn5"]
    return classifier_head(pieces, channels, N, H, W, s5, b5,
                           params["cls_w"], params["cls_b"])


# ----------------------------- Main ---------------------------------------------------

if __name__ == "__main__":
    key = jax.random.PRNGKey(0)
    k_param, k_x = jax.random.split(key)

    # Small config consistent with the module: head='A', growth_rate=8, block_config=(2,2),
    # num_init_features=16, bn_size=2, drop_rate=0, num_classes=10.
    # 56x56 input -> 28x28 after conv0 -> 14x14 after pool0 -> 7x7 after the transition,
    # so avgPool(7) is a global average.
    block_config = (2, 2)
    params = init_densenet_params(k_param, input_channel=3, growth_rate=8,
                                  block_config=block_config, num_init_features=16,
                                  bn_size=2, num_classes=10)

    x = jax.random.normal(k_x, (2, 3, 56, 56), jnp.float32)  # NCHW, like PyTorch

    fwd = jax.jit(functools.partial(densenet_forward, block_config=block_config))
    out = fwd(x, params)
    out = jax.block_until_ready(out)

    assert out.shape == (2, 10) and out.dtype == jnp.float32
    assert bool(jnp.all(jnp.isfinite(out)))
    print("KERNEL_OK")
</pallas_src>

<mosaic_0001>
module attributes {stable_mosaic.version = 11 : i64} {
  func.func @_conv_matmul_kernel(%arg0: i32, %arg1: memref<147x896xf32, #tpu.memory_space<vmem>>, %arg2: memref<16x147xf32, #tpu.memory_space<vmem>>, %arg3: memref<16x1xf32, #tpu.memory_space<vmem>>, %arg4: memref<16x1xf32, #tpu.memory_space<vmem>>, %arg5: memref<16x896xf32, #tpu.memory_space<vmem>>) attributes {dimension_semantics = [#tpu.dimension_semantics<parallel>], iteration_bounds = array<i64: 2>, scalar_prefetch = 0 : i64, scratch_operands = 0 : i64, tpu.core_type = #tpu.core_type<tc>, window_params = [{transform_indices = @transform_0, window_bounds = array<i64: 147, 896>}, {pipeline_mode = #tpu.pipeline_mode<synchronous>, transform_indices = @transform_1, window_bounds = array<i64: 16, 147>}, {pipeline_mode = #tpu.pipeline_mode<synchronous>, transform_indices = @transform_2, window_bounds = array<i64: 16, 1>}, {pipeline_mode = #tpu.pipeline_mode<synchronous>, transform_indices = @transform_3, window_bounds = array<i64: 16, 1>}, {transform_indices = @transform_4, window_bounds = array<i64: 16, 896>}]} {
    %c0 = arith.constant 0 : index
    %c0_0 = arith.constant 0 : index
    %0 = vector.load %arg1[%c0, %c0_0] : memref<147x896xf32, #tpu.memory_space<vmem>>, vector<147x896xf32>
    %c0_1 = arith.constant 0 : index
    %c0_2 = arith.constant 0 : index
    %1 = vector.load %arg2[%c0_1, %c0_2] : memref<16x147xf32, #tpu.memory_space<vmem>>, vector<16x147xf32>
    %cst = arith.constant dense<0.000000e+00> : vector<16x896xf32>
    %2 = tpu.matmul %1, %0, %cst {dimension_numbers = #tpu.dot_dimension_numbers<[1], [0], [0], [1], [0, 0, 1, 1], [], []>} : vector<16x147xf32>, vector<147x896xf32>, vector<16x896xf32> -> vector<16x896xf32>
    %c0_3 = arith.constant 0 : index
    %c0_4 = arith.constant 0 : index
    %3 = vector.load %arg3[%c0_3, %c0_4] : memref<16x1xf32, #tpu.memory_space<vmem>>, vector<16x1xf32>
    %4 = vector.broadcast %3 : vector<16x1xf32> to vector<16x896xf32>
    %5 = arith.mulf %2, %4 : vector<16x896xf32>
    %c0_5 = arith.constant 0 : index
    %c0_6 = arith.constant 0 : index
    %6 = vector.load %arg4[%c0_5, %c0_6] : memref<16x1xf32, #tpu.memory_space<vmem>>, vector<16x1xf32>
    %7 = vector.broadcast %6 : vector<16x1xf32> to vector<16x896xf32>
    %8 = arith.addf %5, %7 : vector<16x896xf32>
    %cst_7 = arith.constant 0.000000e+00 : f32
    %9 = vector.broadcast %cst_7 : f32 to vector<16x896xf32>
    %10 = arith.maximumf %8, %9 : vector<16x896xf32>
    %c0_8 = arith.constant 0 : index
    %c0_9 = arith.constant 0 : index
    %11 = vector.load %arg5[%c0_8, %c0_9] : memref<16x896xf32, #tpu.memory_space<vmem>>, vector<16x896xf32>
    tpu.vector_store %arg5[%c0_8, %c0_9], %10 {strides = array<i32>} : memref<16x896xf32, #tpu.memory_space<vmem>>, vector<16x896xf32>,
    return
  }
  func.func @transform_0(%arg0: i32) -> (i32, i32) {
    %c0_i32 = arith.constant 0 : i32
    %c0_i32_0 = arith.constant 0 : i32
    return %c0_i32, %arg0 : i32, i32
  }
  func.func @transform_1(%arg0: i32) -> (i32, i32) {
    %c0_i32 = arith.constant 0 : i32
    %c0_i32_0 = arith.constant 0 : i32
    %c0_i32_1 = arith.constant 0 : i32
    return %c0_i32, %c0_i32_0 : i32, i32
  }
  func.func @transform_2(%arg0: i32) -> (i32, i32) {
    %c0_i32 = arith.constant 0 : i32
    %c0_i32_0 = arith.constant 0 : i32
    %c0_i32_1 = arith.constant 0 : i32
    return %c0_i32, %c0_i32_0 : i32, i32
  }
  func.func @transform_3(%arg0: i32) -> (i32, i32) {
    %c0_i32 = arith.constant 0 : i32
    %c0_i32_0 = arith.constant 0 : i32
    %c0_i32_1 = arith.constant 0 : i32
    return %c0_i32, %c0_i32_0 : i32, i32
  }
  func.func @transform_4(%arg0: i32) -> (i32, i32) {
    %c0_i32 = arith.constant 0 : i32
    %c0_i32_0 = arith.constant 0 : i32
    return %c0_i32, %arg0 : i32, i32
  }
}

module attributes {stable_mosaic.version = 11 : i64} {
  func.func @_pool_kernel(%arg0: memref<9x6272xf32, #tpu.memory_space<vmem>>, %arg1: memref<1x6272xf32, #tpu.memory_space<vmem>>) attributes {dimension_semantics = [], scalar_prefetch = 0 : i64, scratch_operands = 0 : i64, tpu.core_type = #tpu.core_type<tc>} {
    %c0 = arith.constant 0 : index
    %c0_0 = arith.constant 0 : index
    %0 = vector.load %arg0[%c0, %c0_0] : memref<9x6272xf32, #tpu.memory_space<vmem>>, vector<9x6272xf32>
    %cst = arith.constant dense<0xFF800000> : vector<6272xf32>
    %1 = vector.multi_reduction <maximumf>, %0, %cst [0] : vector<9x6272xf32> to vector<6272xf32>
    %2 = vector.shape_cast %1 : vector<6272xf32> to vector<1x6272xf32>
    %c0_1 = arith.constant 0 : index
    %c0_2 = arith.constant 0 : index
    %3 = vector.load %arg1[%c0_1, %c0_2] : memref<1x6272xf32, #tpu.memory_space<vmem>>, vector<1x6272xf32>
    tpu.vector_store %arg1[%c0_1, %c0_2], %2 {strides = array<i32>} : memref<1x6272xf32, #tpu.memory_space<vmem>>, vector<1x6272xf32>,
    return
  }
}

module attributes {stable_mosaic.version = 11 : i64} {
  func.func @_conv_matmul_kernel(%arg0: i32, %arg1: memref<16x392xf32, #tpu.memory_space<vmem>>, %arg2: memref<16x16xf32, #tpu.memory_space<vmem>>, %arg3: memref<16x1xf32, #tpu.memory_space<vmem>>, %arg4: memref<16x1xf32, #tpu.memory_space<vmem>>, %arg5: memref<16x1xf32, #tpu.memory_space<vmem>>, %arg6: memref<16x1xf32, #tpu.memory_space<vmem>>, %arg7: memref<16x392xf32, #tpu.memory_space<vmem>>) attributes {dimension_semantics = [#tpu.dimension_semantics<parallel>], iteration_bounds = array<i64: 1>, scalar_prefetch = 0 : i64, scratch_operands = 0 : i64, tpu.core_type = #tpu.core_type<tc>, window_params = [{transform_indices = @transform_0, window_bounds = array<i64: 16, 392>}, {pipeline_mode = #tpu.pipeline_mode<synchronous>, transform_indices = @transform_1, window_bounds = array<i64: 16, 16>}, {pipeline_mode = #tpu.pipeline_mode<synchronous>, transform_indices = @transform_2, window_bounds = array<i64: 16, 1>}, {pipeline_mode = #tpu.pipeline_mode<synchronous>, transform_indices = @transform_3, window_bounds = array<i64: 16, 1>}, {pipeline_mode = #tpu.pipeline_mode<synchronous>, transform_indices = @transform_4, window_bounds = array<i64: 16, 1>}, {pipeline_mode = #tpu.pipeline_mode<synchronous>, transform_indices = @transform_5, window_bounds = array<i64: 16, 1>}, {transform_indices = @transform_6, window_bounds = array<i64: 16, 392>}]} {
    %c0 = arith.constant 0 : index
    %c0_0 = arith.constant 0 : index
    %0 = vector.load %arg1[%c0, %c0_0] : memref<16x392xf32, #tpu.memory_space<vmem>>, vector<16x392xf32>
    %c0_1 = arith.constant 0 : index
    %c0_2 = arith.constant 0 : index
    %1 = vector.load %arg3[%c0_1, %c0_2] : memref<16x1xf32, #tpu.memory_space<vmem>>, vector<16x1xf32>
    %2 = vector.broadcast %1 : vector<16x1xf32> to vector<16x392xf32>
    %3 = arith.mulf %0, %2 : vector<16x392xf32>
    %c0_3 = arith.constant 0 : index
    %c0_4 = arith.constant 0 : index
    %4 = vector.load %arg4[%c0_3, %c0_4] : memref<16x1xf32, #tpu.memory_space<vmem>>, vector<16x1xf32>
    %5 = vector.broadcast %4 : vector<16x1xf32> to vector<16x392xf32>
    %6 = arith.addf %3, %5 : vector<16x392xf32>
    %cst = arith.constant 0.000000e+00 : f32
    %7 = vector.broadcast %cst : f32 to vector<16x392xf32>
    %8 = arith.maximumf %6, %7 : vector<16x392xf32>
    %c0_5 = arith.constant 0 : index
    %c0_6 = arith.constant 0 : index
    %9 = vector.load %arg2[%c0_5, %c0_6] : memref<16x16xf32, #tpu.memory_space<vmem>>, vector<16x16xf32>
    %cst_7 = arith.constant dense<0.000000e+00> : vector<16x392xf32>
    %10 = tpu.matmul %9, %8, %cst_7 {dimension_numbers = #tpu.dot_dimension_numbers<[1], [0], [0], [1], [0, 0, 1, 1], [], []>} : vector<16x16xf32>, vector<16x392xf32>, vector<16x392xf32> -> vector<16x392xf32>
    %c0_8 = arith.constant 0 : index
    %c0_9 = arith.constant 0 : index
    %11 = vector.load %arg5[%c0_8, %c0_9] : memref<16x1xf32, #tpu.memory_space<vmem>>, vector<16x1xf32>
    %12 = vector.broadcast %11 : vector<16x1xf32> to vector<16x392xf32>
    %13 = arith.mulf %10, %12 : vector<16x392xf32>
    %c0_10 = arith.constant 0 : index
    %c0_11 = arith.constant 0 : index
    %14 = vector.load %arg6[%c0_10, %c0_11] : memref<16x1xf32, #tpu.memory_space<vmem>>, vector<16x1xf32>
    %15 = vector.broadcast %14 : vector<16x1xf32> to vector<16x392xf32>
    %16 = arith.addf %13, %15 : vector<16x392xf32>
    %cst_12 = arith.constant 0.000000e+00 : f32
    %17 = vector.broadcast %cst_12 : f32 to vector<16x392xf32>
    %18 = arith.maximumf %16, %17 : vector<16x392xf32>
    %c0_13 = arith.constant 0 : index
    %c0_14 = arith.constant 0 : index
    %19 = vector.load %arg7[%c0_13, %c0_14] : memref<16x392xf32, #tpu.memory_space<vmem>>, vector<16x392xf32>
    tpu.vector_store %arg7[%c0_13, %c0_14], %18 {strides = array<i32>} : memref<16x392xf32, #tpu.memory_space<vmem>>, vector<16x392xf32>,
    return
  }
  func.func @transform_0(%arg0: i32) -> (i32, i32) {
    %c0_i32 = arith.constant 0 : i32
    %c0_i32_0 = arith.constant 0 : i32
    return %c0_i32, %arg0 : i32, i32
  }
  func.func @transform_1(%arg0: i32) -> (i32, i32) {
    %c0_i32 = arith.constant 0 : i32
    %c0_i32_0 = arith.constant 0 : i32
    %c0_i32_1 = arith.constant 0 : i32
    return %c0_i32, %c0_i32_0 : i32, i32
  }
  func.func @transform_2(%arg0: i32) -> (i32, i32) {
    %c0_i32 = arith.constant 0 : i32
    %c0_i32_0 = arith.constant 0 : i32
    %c0_i32_1 = arith.constant 0 : i32
    return %c0_i32, %c0_i32_0 : i32, i32
  }
  func.func @transform_3(%arg0: i32) -> (i32, i32) {
    %c0_i32 = arith.constant 0 : i32
    %c0_i32_0 = arith.constant 0 : i32
    %c0_i32_1 = arith.constant 0 : i32
    return %c0_i32, %c0_i32_0 : i32, i32
  }
  func.func @transform_4(%arg0: i32) -> (i32, i32) {
    %c0_i32 = arith.constant 0 : i32
    %c0_i32_0 = arith.constant 0 : i32
    %c0_i32_1 = arith.constant 0 : i32
    return %c0_i32, %c0_i32_0 : i32, i32
  }
  func.func @transform_5(%arg0: i32) -> (i32, i32) {
    %c0_i32 = arith.constant 0 : i32
    %c0_i32_0 = arith.constant 0 : i32
    %c0_i32_1 = arith.constant 0 : i32
    return %c0_i32, %c0_i32_0 : i32, i32
  }
  func.func @transform_6(%arg0: i32) -> (i32, i32) {
    %c0_i32 = arith.constant 0 : i32
    %c0_i32_0 = arith.constant 0 : i32
    return %c0_i32, %arg0 : i32, i32
  }
}

module attributes {stable_mosaic.version = 11 : i64} {
  func.func @_conv_matmul_kernel(%arg0: i32, %arg1: memref<144x392xf32, #tpu.memory_space<vmem>>, %arg2: memref<8x144xf32, #tpu.memory_space<vmem>>, %arg3: memref<8x392xf32, #tpu.memory_space<vmem>>) attributes {dimension_semantics = [#tpu.dimension_semantics<parallel>], iteration_bounds = array<i64: 1>, scalar_prefetch = 0 : i64, scratch_operands = 0 : i64, tpu.core_type = #tpu.core_type<tc>, window_params = [{transform_indices = @transform_0, window_bounds = array<i64: 144, 392>}, {pipeline_mode = #tpu.pipeline_mode<synchronous>, transform_indices = @transform_1, window_bounds = array<i64: 8, 144>}, {transform_indices = @transform_2, window_bounds = array<i64: 8, 392>}]} {
    %c0 = arith.constant 0 : index
    %c0_0 = arith.constant 0 : index
    %0 = vector.load %arg1[%c0, %c0_0] : memref<144x392xf32, #tpu.memory_space<vmem>>, vector<144x392xf32>
    %c0_1 = arith.constant 0 : index
    %c0_2 = arith.constant 0 : index
    %1 = vector.load %arg2[%c0_1, %c0_2] : memref<8x144xf32, #tpu.memory_space<vmem>>, vector<8x144xf32>
    %cst = arith.constant dense<0.000000e+00> : vector<8x392xf32>
    %2 = tpu.matmul %1, %0, %cst {dimension_numbers = #tpu.dot_dimension_numbers<[1], [0], [0], [1], [0, 0, 1, 1], [], []>} : vector<8x144xf32>, vector<144x392xf32>, vector<8x392xf32> -> vector<8x392xf32>
    %c0_3 = arith.constant 0 : index
    %c0_4 = arith.constant 0 : index
    %3 = vector.load %arg3[%c0_3, %c0_4] : memref<8x392xf32, #tpu.memory_space<vmem>>, vector<8x392xf32>
    tpu.vector_store %arg3[%c0_3, %c0_4], %2 {strides = array<i32>} : memref<8x392xf32, #tpu.memory_space<vmem>>, vector<8x392xf32>,
    return
  }
  func.func @transform_0(%arg0: i32) -> (i32, i32) {
    %c0_i32 = arith.constant 0 : i32
    %c0_i32_0 = arith.constant 0 : i32
    return %c0_i32, %arg0 : i32, i32
  }
  func.func @transform_1(%arg0: i32) -> (i32, i32) {
    %c0_i32 = arith.constant 0 : i32
    %c0_i32_0 = arith.constant 0 : i32
    %c0_i32_1 = arith.constant 0 : i32
    return %c0_i32, %c0_i32_0 : i32, i32
  }
  func.func @transform_2(%arg0: i32) -> (i32, i32) {
    %c0_i32 = arith.constant 0 : i32
    %c0_i32_0 = arith.constant 0 : i32
    return %c0_i32, %arg0 : i32, i32
  }
}

module attributes {stable_mosaic.version = 11 : i64} {
  func.func @_conv_matmul_kernel(%arg0: i32, %arg1: memref<16x392xf32, #tpu.memory_space<vmem>>, %arg2: memref<8x392xf32, #tpu.memory_space<vmem>>, %arg3: memref<16x16xf32, #tpu.memory_space<vmem>>, %arg4: memref<16x8xf32, #tpu.memory_space<vmem>>, %arg5: memref<16x1xf32, #tpu.memory_space<vmem>>, %arg6: memref<16x1xf32, #tpu.memory_space<vmem>>, %arg7: memref<8x1xf32, #tpu.memory_space<vmem>>, %arg8: memref<8x1xf32, #tpu.memory_space<vmem>>, %arg9: memref<16x1xf32, #tpu.memory_space<vmem>>, %arg10: memref<16x1xf32, #tpu.memory_space<vmem>>, %arg11: memref<16x392xf32, #tpu.memory_space<vmem>>) attributes {dimension_semantics = [#tpu.dimension_semantics<parallel>], iteration_bounds = array<i64: 1>, scalar_prefetch = 0 : i64, scratch_operands = 0 : i64, tpu.core_type = #tpu.core_type<tc>, window_params = [{transform_indices = @transform_0, window_bounds = array<i64: 16, 392>}, {transform_indices = @transform_1, window_bounds = array<i64: 8, 392>}, {pipeline_mode = #tpu.pipeline_mode<synchronous>, transform_indices = @transform_2, window_bounds = array<i64: 16, 16>}, {pipeline_mode = #tpu.pipeline_mode<synchronous>, transform_indices = @transform_3, window_bounds = array<i64: 16, 8>}, {pipeline_mode = #tpu.pipeline_mode<synchronous>, transform_indices = @transform_4, window_bounds = array<i64: 16, 1>}, {pipeline_mode = #tpu.pipeline_mode<synchronous>, transform_indices = @transform_5, window_bounds = array<i64: 16, 1>}, {pipeline_mode = #tpu.pipeline_mode<synchronous>, transform_indices = @transform_6, window_bounds = array<i64: 8, 1>}, {pipeline_mode = #tpu.pipeline_mode<synchronous>, transform_indices = @transform_7, window_bounds = array<i64: 8, 1>}, {pipeline_mode = #tpu.pipeline_mode<synchronous>, transform_indices = @transform_8, window_bounds = array<i64: 16, 1>}, {pipeline_mode = #tpu.pipeline_mode<synchronous>, transform_indices = @transform_9, window_bounds = array<i64: 16, 1>}, {transform_indices = @transform_10, window_bounds = array<i64: 16, 392>}]} {
    %c0 = arith.constant 0 : index
    %c0_0 = arith.constant 0 : index
    %0 = vector.load %arg1[%c0, %c0_0] : memref<16x392xf32, #tpu.memory_space<vmem>>, vector<16x392xf32>
    %c0_1 = arith.constant 0 : index
    %c0_2 = arith.constant 0 : index
    %1 = vector.load %arg5[%c0_1, %c0_2] : memref<16x1xf32, #tpu.memory_space<vmem>>, vector<16x1xf32>
    %2 = vector.broadcast %1 : vector<16x1xf32> to vector<16x392xf32>
    %3 = arith.mulf %0, %2 : vector<16x392xf32>
    %c0_3 = arith.constant 0 : index
    %c0_4 = arith.constant 0 : index
    %4 = vector.load %arg6[%c0_3, %c0_4] : memref<16x1xf32, #tpu.memory_space<vmem>>, vector<16x1xf32>
    %5 = vector.broadcast %4 : vector<16x1xf32> to vector<16x392xf32>
    %6 = arith.addf %3, %5 : vector<16x392xf32>
    %cst = arith.constant 0.000000e+00 : f32
    %7 = vector.broadcast %cst : f32 to vector<16x392xf32>
    %8 = arith.maximumf %6, %7 : vector<16x392xf32>
    %c0_5 = arith.constant 0 : index
    %c0_6 = arith.constant 0 : index
    %9 = vector.load %arg3[%c0_5, %c0_6] : memref<16x16xf32, #tpu.memory_space<vmem>>, vector<16x16xf32>
    %cst_7 = arith.constant dense<0.000000e+00> : vector<16x392xf32>
    %10 = tpu.matmul %9, %8, %cst_7 {dimension_numbers = #tpu.dot_dimension_numbers<[1], [0], [0], [1], [0, 0, 1, 1], [], []>} : vector<16x16xf32>, vector<16x392xf32>, vector<16x392xf32> -> vector<16x392xf32>
    %c0_8 = arith.constant 0 : index
    %c0_9 = arith.constant 0 : index
    %11 = vector.load %arg2[%c0_8, %c0_9] : memref<8x392xf32, #tpu.memory_space<vmem>>, vector<8x392xf32>
    %c0_10 = arith.constant 0 : index
    %c0_11 = arith.constant 0 : index
    %12 = vector.load %arg7[%c0_10, %c0_11] : memref<8x1xf32, #tpu.memory_space<vmem>>, vector<8x1xf32>
    %13 = vector.broadcast %12 : vector<8x1xf32> to vector<8x392xf32>
    %14 = arith.mulf %11, %13 : vector<8x392xf32>
    %c0_12 = arith.constant 0 : index
    %c0_13 = arith.constant 0 : index
    %15 = vector.load %arg8[%c0_12, %c0_13] : memref<8x1xf32, #tpu.memory_space<vmem>>, vector<8x1xf32>
    %16 = vector.broadcast %15 : vector<8x1xf32> to vector<8x392xf32>
    %17 = arith.addf %14, %16 : vector<8x392xf32>
    %cst_14 = arith.constant 0.000000e+00 : f32
    %18 = vector.broadcast %cst_14 : f32 to vector<8x392xf32>
    %19 = arith.maximumf %17, %18 : vector<8x392xf32>
    %c0_15 = arith.constant 0 : index
    %c0_16 = arith.constant 0 : index
    %20 = vector.load %arg4[%c0_15, %c0_16] : memref<16x8xf32, #tpu.memory_space<vmem>>, vector<16x8xf32>
    %cst_17 = arith.constant dense<0.000000e+00> : vector<16x392xf32>
    %21 = tpu.matmul %20, %19, %cst_17 {dimension_numbers = #tpu.dot_dimension_numbers<[1], [0], [0], [1], [0, 0, 1, 1], [], []>} : vector<16x8xf32>, vector<8x392xf32>, vector<16x392xf32> -> vector<16x392xf32>
    %22 = arith.addf %10, %21 : vector<16x392xf32>
    %c0_18 = arith.constant 0 : index
    %c0_19 = arith.constant 0 : index
    %23 = vector.load %arg9[%c0_18, %c0_19] : memref<16x1xf32, #tpu.memory_space<vmem>>, vector<16x1xf32>
    %24 = vector.broadcast %23 : vector<16x1xf32> to vector<16x392xf32>
    %25 = arith.mulf %22, %24 : vector<16x392xf32>
    %c0_20 = arith.constant 0 : index
    %c0_21 = arith.constant 0 : index
    %26 = vector.load %arg10[%c0_20, %c0_21] : memref<16x1xf32, #tpu.memory_space<vmem>>, vector<16x1xf32>
    %27 = vector.broadcast %26 : vector<16x1xf32> to vector<16x392xf32>
    %28 = arith.addf %25, %27 : vector<16x392xf32>
    %cst_22 = arith.constant 0.000000e+00 : f32
    %29 = vector.broadcast %cst_22 : f32 to vector<16x392xf32>
    %30 = arith.maximumf %28, %29 : vector<16x392xf32>
    %c0_23 = arith.constant 0 : index
    %c0_24 = arith.constant 0 : index
    %31 = vector.load %arg11[%c0_23, %c0_24] : memref<16x392xf32, #tpu.memory_space<vmem>>, vector<16x392xf32>
    tpu.vector_store %arg11[%c0_23, %c0_24], %30 {strides = array<i32>} : memref<16x392xf32, #tpu.memory_space<vmem>>, vector<16x392xf32>,
    return
  }
  func.func @transform_0(%arg0: i32) -> (i32, i32) {
    %c0_i32 = arith.constant 0 : i32
    %c0_i32_0 = arith.constant 0 : i32
    return %c0_i32, %arg0 : i32, i32
  }
  func.func @transform_1(%arg0: i32) -> (i32, i32) {
    %c0_i32 = arith.constant 0 : i32
    %c0_i32_0 = arith.constant 0 : i32
    return %c0_i32, %arg0 : i32, i32
  }
  func.func @transform_2(%arg0: i32) -> (i32, i32) {
    %c0_i32 = arith.constant 0 : i32
    %c0_i32_0 = arith.constant 0 : i32
    %c0_i32_1 = arith.constant 0 : i32
    return %c0_i32, %c0_i32_0 : i32, i32
  }
  func.func @transform_3(%arg0: i32) -> (i32, i32) {
    %c0_i32 = arith.constant 0 : i32
    %c0_i32_0 = arith.constant 0 : i32
    %c0_i32_1 = arith.constant 0 : i32
    return %c0_i32, %c0_i32_0 : i32, i32
  }
  func.func @transform_4(%arg0: i32) -> (i32, i32) {
    %c0_i32 = arith.constant 0 : i32
    %c0_i32_0 = arith.constant 0 : i32
    %c0_i32_1 = arith.constant 0 : i32
    return %c0_i32, %c0_i32_0 : i32, i32
  }
  func.func @transform_5(%arg0: i32) -> (i32, i32) {
    %c0_i32 = arith.constant 0 : i32
    %c0_i32_0 = arith.constant 0 : i32
    %c0_i32_1 = arith.constant 0 : i32
    return %c0_i32, %c0_i32_0 : i32, i32
  }
  func.func @transform_6(%arg0: i32) -> (i32, i32) {
    %c0_i32 = arith.constant 0 : i32
    %c0_i32_0 = arith.constant 0 : i32
    %c0_i32_1 = arith.constant 0 : i32
    return %c0_i32, %c0_i32_0 : i32, i32
  }
  func.func @transform_7(%arg0: i32) -> (i32, i32) {
    %c0_i32 = arith.constant 0 : i32
    %c0_i32_0 = arith.constant 0 : i32
    %c0_i32_1 = arith.constant 0 : i32
    return %c0_i32, %c0_i32_0 : i32, i32
  }
  func.func @transform_8(%arg0: i32) -> (i32, i32) {
    %c0_i32 = arith.constant 0 : i32
    %c0_i32_0 = arith.constant 0 : i32
    %c0_i32_1 = arith.constant 0 : i32
    return %c0_i32, %c0_i32_0 : i32, i32
  }
  func.func @transform_9(%arg0: i32) -> (i32, i32) {
    %c0_i32 = arith.constant 0 : i32
    %c0_i32_0 = arith.constant 0 : i32
    %c0_i32_1 = arith.constant 0 : i32
    return %c0_i32, %c0_i32_0 : i32, i32
  }
  func.func @transform_10(%arg0: i32) -> (i32, i32) {
    %c0_i32 = arith.constant 0 : i32
    %c0_i32_0 = arith.constant 0 : i32
    return %c0_i32, %arg0 : i32, i32
  }
}

module attributes {stable_mosaic.version = 11 : i64} {
  func.func @_conv_matmul_kernel(%arg0: i32, %arg1: memref<16x98xf32, #tpu.memory_space<vmem>>, %arg2: memref<16x98xf32, #tpu.memory_space<vmem>>, %arg3: memref<16x98xf32, #tpu.memory_space<vmem>>, %arg4: memref<16x98xf32, #tpu.memory_space<vmem>>, %arg5: memref<8x98xf32, #tpu.memory_space<vmem>>, %arg6: memref<8x98xf32, #tpu.memory_space<vmem>>, %arg7: memref<8x98xf32, #tpu.memory_space<vmem>>, %arg8: memref<8x98xf32, #tpu.memory_space<vmem>>, %arg9: memref<8x98xf32, #tpu.memory_space<vmem>>, %arg10: memref<8x98xf32, #tpu.memory_space<vmem>>, %arg11: memref<8x98xf32, #tpu.memory_space<vmem>>, %arg12: memref<8x98xf32, #tpu.memory_space<vmem>>, %arg13: memref<16x16xf32, #tpu.memory_space<vmem>>, %arg14: memref<16x8xf32, #tpu.memory_space<vmem>>, %arg15: memref<16x8xf32, #tpu.memory_space<vmem>>, %arg16: memref<16x1xf32, #tpu.memory_space<vmem>>, %arg17: memref<16x1xf32, #tpu.memory_space<vmem>>, %arg18: memref<8x1xf32, #tpu.memory_space<vmem>>, %arg19: memref<8x1xf32, #tpu.memory_space<vmem>>, %arg20: memref<8x1xf32, #tpu.memory_space<vmem>>, %arg21: memref<8x1xf32, #tpu.memory_space<vmem>>, %arg22: memref<16x98xf32, #tpu.memory_space<vmem>>) attributes {dimension_semantics = [#tpu.dimension_semantics<parallel>], iteration_bounds = array<i64: 1>, scalar_prefetch = 0 : i64, scratch_operands = 0 : i64, tpu.core_type = #tpu.core_type<tc>, window_params = [{transform_indices = @transform_0, window_bounds = array<i64: 16, 98>}, {transform_indices = @transform_1, window_bounds = array<i64: 16, 98>}, {transform_indices = @transform_2, window_bounds = array<i64: 16, 98>}, {transform_indices = @transform_3, window_bounds = array<i64: 16, 98>}, {transform_indices = @transform_4, window_bounds = array<i64: 8, 98>}, {transform_indices = @transform_5, window_bounds = array<i64: 8, 98>}, {transform_indices = @transform_6, window_bounds = array<i64: 8, 98>}, {transform_indices = @transform_7, window_bounds = array<i64: 8, 98>}, {transform_indices = @transform_8, window_bounds = array<i64: 8, 98>}, {transform_indices = @transform_9, window_bounds = array<i64: 8, 98>}, {transform_indices = @transform_10, window_bounds = array<i64: 8, 98>}, {transform_indices = @transform_11, window_bounds = array<i64: 8, 98>}, {pipeline_mode = #tpu.pipeline_mode<synchronous>, transform_indices = @transform_12, window_bounds = array<i64: 16, 16>}, {pipeline_mode = #tpu.pipeline_mode<synchronous>, transform_indices = @transform_13, window_bounds = array<i64: 16, 8>}, {pipeline_mode = #tpu.pipeline_mode<synchronous>, transform_indices = @transform_14, window_bounds = array<i64: 16, 8>}, {pipeline_mode = #tpu.pipeline_mode<synchronous>, transform_indices = @transform_15, window_bounds = array<i64: 16, 1>}, {pipeline_mode = #tpu.pipeline_mode<synchronous>, transform_indices = @transform_16, window_bounds = array<i64: 16, 1>}, {pipeline_mode = #tpu.pipeline_mode<synchronous>, transform_indices = @transform_17, window_bounds = array<i64: 8, 1>}, {pipeline_mode = #tpu.pipeline_mode<synchronous>, transform_indices = @transform_18, window_bounds = array<i64: 8, 1>}, {pipeline_mode = #tpu.pipeline_mode<synchronous>, transform_indices = @transform_19, window_bounds = array<i64: 8, 1>}, {pipeline_mode = #tpu.pipeline_mode<synchronous>, transform_indices = @transform_20, window_bounds = array<i64: 8, 1>}, {transform_indices = @transform_21, window_bounds = array<i64: 16, 98>}]} {
    %c0 = arith.constant 0 : index
    %c0_0 = arith.constant 0 : index
    %0 = vector.load %arg1[%c0, %c0_0] : memref<16x98xf32, #tpu.memory_space<vmem>>, vector<16x98xf32>
    %c0_1 = arith.constant 0 : index
    %c0_2 = arith.constant 0 : index
    %1 = vector.load %arg16[%c0_1, %c0_2] : memref<16x1xf32, #tpu.memory_space<vmem>>, vector<16x1xf32>
    %2 = vector.broadcast %1 : vector<16x1xf32> to vector<16x98xf32>
    %3 = arith.mulf %0, %2 : vector<16x98xf32>
    %c0_3 = arith.constant 0 : index
    %c0_4 = arith.constant 0 : index
    %4 = vector.load %arg17[%c0_3, %c0_4] : memref<16x1xf32, #tpu.memory_space<vmem>>, vector<16x1xf32>
    %5 = vector.broadcast %4 : vector<16x1xf32> to vector<16x98xf32>
    %6 = arith.addf %3, %5 : vector<16x98xf32>
    %cst = arith.constant 0.000000e+00 : f32
    %7 = vector.broadcast %cst : f32 to vector<16x98xf32>
    %8 = arith.maximumf %6, %7 : vector<16x98xf32>
    %c0_5 = arith.constant 0 : index
    %c0_6 = arith.constant 0 : index
    %9 = vector.load %arg2[%c0_5, %c0_6] : memref<16x98xf32, #tpu.memory_space<vmem>>, vector<16x98xf32>
    %c0_7 = arith.constant 0 : index
    %c0_8 = arith.constant 0 : index
    %10 = vector.load %arg16[%c0_7, %c0_8] : memref<16x1xf32, #tpu.memory_space<vmem>>, vector<16x1xf32>
    %11 = vector.broadcast %10 : vector<16x1xf32> to vector<16x98xf32>
    %12 = arith.mulf %9, %11 : vector<16x98xf32>
    %c0_9 = arith.constant 0 : index
    %c0_10 = arith.constant 0 : index
    %13 = vector.load %arg17[%c0_9, %c0_10] : memref<16x1xf32, #tpu.memory_space<vmem>>, vector<16x1xf32>
    %14 = vector.broadcast %13 : vector<16x1xf32> to vector<16x98xf32>
    %15 = arith.addf %12, %14 : vector<16x98xf32>
    %cst_11 = arith.constant 0.000000e+00 : f32
    %16 = vector.broadcast %cst_11 : f32 to vector<16x98xf32>
    %17 = arith.maximumf %15, %16 : vector<16x98xf32>
    %18 = arith.addf %8, %17 : vector<16x98xf32>
    %c0_12 = arith.constant 0 : index
    %c0_13 = arith.constant 0 : index
    %19 = vector.load %arg3[%c0_12, %c0_13] : memref<16x98xf32, #tpu.memory_space<vmem>>, vector<16x98xf32>
    %c0_14 = arith.constant 0 : index
    %c0_15 = arith.constant 0 : index
    %20 = vector.load %arg16[%c0_14, %c0_15] : memref<16x1xf32, #tpu.memory_space<vmem>>, vector<16x1xf32>
    %21 = vector.broadcast %20 : vector<16x1xf32> to vector<16x98xf32>
    %22 = arith.mulf %19, %21 : vector<16x98xf32>
    %c0_16 = arith.constant 0 : index
    %c0_17 = arith.constant 0 : index
    %23 = vector.load %arg17[%c0_16, %c0_17] : memref<16x1xf32, #tpu.memory_space<vmem>>, vector<16x1xf32>
    %24 = vector.broadcast %23 : vector<16x1xf32> to vector<16x98xf32>
    %25 = arith.addf %22, %24 : vector<16x98xf32>
    %cst_18 = arith.constant 0.000000e+00 : f32
    %26 = vector.broadcast %cst_18 : f32 to vector<16x98xf32>
    %27 = arith.maximumf %25, %26 : vector<16x98xf32>
    %28 = arith.addf %18, %27 : vector<16x98xf32>
    %c0_19 = arith.constant 0 : index
    %c0_20 = arith.constant 0 : index
    %29 = vector.load %arg4[%c0_19, %c0_20] : memref<16x98xf32, #tpu.memory_space<vmem>>, vector<16x98xf32>
    %c0_21 = arith.constant 0 : index
    %c0_22 = arith.constant 0 : index
    %30 = vector.load %arg16[%c0_21, %c0_22] : memref<16x1xf32, #tpu.memory_space<vmem>>, vector<16x1xf32>
    %31 = vector.broadcast %30 : vector<16x1xf32> to vector<16x98xf32>
    %32 = arith.mulf %29, %31 : vector<16x98xf32>
    %c0_23 = arith.constant 0 : index
    %c0_24 = arith.constant 0 : index
    %33 = vector.load %arg17[%c0_23, %c0_24] : memref<16x1xf32, #tpu.memory_space<vmem>>, vector<16x1xf32>
    %34 = vector.broadcast %33 : vector<16x1xf32> to vector<16x98xf32>
    %35 = arith.addf %32, %34 : vector<16x98xf32>
    %cst_25 = arith.constant 0.000000e+00 : f32
    %36 = vector.broadcast %cst_25 : f32 to vector<16x98xf32>
    %37 = arith.maximumf %35, %36 : vector<16x98xf32>
    %38 = arith.addf %28, %37 : vector<16x98xf32>
    %cst_26 = arith.constant 2.500000e-01 : f32
    %39 = vector.broadcast %cst_26 : f32 to vector<16x98xf32>
    %40 = arith.mulf %38, %39 : vector<16x98xf32>
    %c0_27 = arith.constant 0 : index
    %c0_28 = arith.constant 0 : index
    %41 = vector.load %arg13[%c0_27, %c0_28] : memref<16x16xf32, #tpu.memory_space<vmem>>, vector<16x16xf32>
    %cst_29 = arith.constant dense<0.000000e+00> : vector<16x98xf32>
    %42 = tpu.matmul %41, %40, %cst_29 {dimension_numbers = #tpu.dot_dimension_numbers<[1], [0], [0], [1], [0, 0, 1, 1], [], []>} : vector<16x16xf32>, vector<16x98xf32>, vector<16x98xf32> -> vector<16x98xf32>
    %c0_30 = arith.constant 0 : index
    %c0_31 = arith.constant 0 : index
    %43 = vector.load %arg5[%c0_30, %c0_31] : memref<8x98xf32, #tpu.memory_space<vmem>>, vector<8x98xf32>
    %c0_32 = arith.constant 0 : index
    %c0_33 = arith.constant 0 : index
    %44 = vector.load %arg18[%c0_32, %c0_33] : memref<8x1xf32, #tpu.memory_space<vmem>>, vector<8x1xf32>
    %45 = vector.broadcast %44 : vector<8x1xf32> to vector<8x98xf32>
    %46 = arith.mulf %43, %45 : vector<8x98xf32>
    %c0_34 = arith.constant 0 : index
    %c0_35 = arith.constant 0 : index
    %47 = vector.load %arg19[%c0_34, %c0_35] : memref<8x1xf32, #tpu.memory_space<vmem>>, vector<8x1xf32>
    %48 = vector.broadcast %47 : vector<8x1xf32> to vector<8x98xf32>
    %49 = arith.addf %46, %48 : vector<8x98xf32>
    %cst_36 = arith.constant 0.000000e+00 : f32
    %50 = vector.broadcast %cst_36 : f32 to vector<8x98xf32>
    %51 = arith.maximumf %49, %50 : vector<8x98xf32>
    %c0_37 = arith.constant 0 : index
    %c0_38 = arith.constant 0 : index
    %52 = vector.load %arg6[%c0_37, %c0_38] : memref<8x98xf32, #tpu.memory_space<vmem>>, vector<8x98xf32>
    %c0_39 = arith.constant 0 : index
    %c0_40 = arith.constant 0 : index
    %53 = vector.load %arg18[%c0_39, %c0_40] : memref<8x1xf32, #tpu.memory_space<vmem>>, vector<8x1xf32>
    %54 = vector.broadcast %53 : vector<8x1xf32> to vector<8x98xf32>
    %55 = arith.mulf %52, %54 : vector<8x98xf32>
    %c0_41 = arith.constant 0 : index
    %c0_42 = arith.constant 0 : index
    %56 = vector.load %arg19[%c0_41, %c0_42] : memref<8x1xf32, #tpu.memory_space<vmem>>, vector<8x1xf32>
    %57 = vector.broadcast %56 : vector<8x1xf32> to vector<8x98xf32>
    %58 = arith.addf %55, %57 : vector<8x98xf32>
    %cst_43 = arith.constant 0.000000e+00 : f32
    %59 = vector.broadcast %cst_43 : f32 to vector<8x98xf32>
    %60 = arith.maximumf %58, %59 : vector<8x98xf32>
    %61 = arith.addf %51, %60 : vector<8x98xf32>
    %c0_44 = arith.constant 0 : index
    %c0_45 = arith.constant 0 : index
    %62 = vector.load %arg7[%c0_44, %c0_45] : memref<8x98xf32, #tpu.memory_space<vmem>>, vector<8x98xf32>
    %c0_46 = arith.constant 0 : index
    %c0_47 = arith.constant 0 : index
    %63 = vector.load %arg18[%c0_46, %c0_47] : memref<8x1xf32, #tpu.memory_space<vmem>>, vector<8x1xf32>
    %64 = vector.broadcast %63 : vector<8x1xf32> to vector<8x98xf32>
    %65 = arith.mulf %62, %64 : vector<8x98xf32>
    %c0_48 = arith.constant 0 : index
    %c0_49 = arith.constant 0 : index
    %66 = vector.load %arg19[%c0_48, %c0_49] : memref<8x1xf32, #tpu.memory_space<vmem>>, vector<8x1xf32>
    %67 = vector.broadcast %66 : vector<8x1xf32> to vector<8x98xf32>
    %68 = arith.addf %65, %67 : vector<8x98xf32>
    %cst_50 = arith.constant 0.000000e+00 : f32
    %69 = vector.broadcast %cst_50 : f32 to vector<8x98xf32>
    %70 = arith.maximumf %68, %69 : vector<8x98xf32>
    %71 = arith.addf %61, %70 : vector<8x98xf32>
    %c0_51 = arith.constant 0 : index
    %c0_52 = arith.constant 0 : index
    %72 = vector.load %arg8[%c0_51, %c0_52] : memref<8x98xf32, #tpu.memory_space<vmem>>, vector<8x98xf32>
    %c0_53 = arith.constant 0 : index
    %c0_54 = arith.constant 0 : index
    %73 = vector.load %arg18[%c0_53, %c0_54] : memref<8x1xf32, #tpu.memory_space<vmem>>, vector<8x1xf32>
    %74 = vector.broadcast %73 : vector<8x1xf32> to vector<8x98xf32>
    %75 = arith.mulf %72, %74 : vector<8x98xf32>
    %c0_55 = arith.constant 0 : index
    %c0_56 = arith.constant 0 : index
    %76 = vector.load %arg19[%c0_55, %c0_56] : memref<8x1xf32, #tpu.memory_space<vmem>>, vector<8x1xf32>
    %77 = vector.broadcast %76 : vector<8x1xf32> to vector<8x98xf32>
    %78 = arith.addf %75, %77 : vector<8x98xf32>
    %cst_57 = arith.constant 0.000000e+00 : f32
    %79 = vector.broadcast %cst_57 : f32 to vector<8x98xf32>
    %80 = arith.maximumf %78, %79 : vector<8x98xf32>
    %81 = arith.addf %71, %80 : vector<8x98xf32>
    %cst_58 = arith.constant 2.500000e-01 : f32
    %82 = vector.broadcast %cst_58 : f32 to vector<8x98xf32>
    %83 = arith.mulf %81, %82 : vector<8x98xf32>
    %c0_59 = arith.constant 0 : index
    %c0_60 = arith.constant 0 : index
    %84 = vector.load %arg14[%c0_59, %c0_60] : memref<16x8xf32, #tpu.memory_space<vmem>>, vector<16x8xf32>
    %cst_61 = arith.constant dense<0.000000e+00> : vector<16x98xf32>
    %85 = tpu.matmul %84, %83, %cst_61 {dimension_numbers = #tpu.dot_dimension_numbers<[1], [0], [0], [1], [0, 0, 1, 1], [], []>} : vector<16x8xf32>, vector<8x98xf32>, vector<16x98xf32> -> vector<16x98xf32>
    %86 = arith.addf %42, %85 : vector<16x98xf32>
    %c0_62 = arith.constant 0 : index
    %c0_63 = arith.constant 0 : index
    %87 = vector.load %arg9[%c0_62, %c0_63] : memref<8x98xf32, #tpu.memory_space<vmem>>, vector<8x98xf32>
    %c0_64 = arith.constant 0 : index
    %c0_65 = arith.constant 0 : index
    %88 = vector.load %arg20[%c0_64, %c0_65] : memref<8x1xf32, #tpu.memory_space<vmem>>, vector<8x1xf32>
    %89 = vector.broadcast %88 : vector<8x1xf32> to vector<8x98xf32>
    %90 = arith.mulf %87, %89 : vector<8x98xf32>
    %c0_66 = arith.constant 0 : index
    %c0_67 = arith.constant 0 : index
    %91 = vector.load %arg21[%c0_66, %c0_67] : memref<8x1xf32, #tpu.memory_space<vmem>>, vector<8x1xf32>
    %92 = vector.broadcast %91 : vector<8x1xf32> to vector<8x98xf32>
    %93 = arith.addf %90, %92 : vector<8x98xf32>
    %cst_68 = arith.constant 0.000000e+00 : f32
    %94 = vector.broadcast %cst_68 : f32 to vector<8x98xf32>
    %95 = arith.maximumf %93, %94 : vector<8x98xf32>
    %c0_69 = arith.constant 0 : index
    %c0_70 = arith.constant 0 : index
    %96 = vector.load %arg10[%c0_69, %c0_70] : memref<8x98xf32, #tpu.memory_space<vmem>>, vector<8x98xf32>
    %c0_71 = arith.constant 0 : index
    %c0_72 = arith.constant 0 : index
    %97 = vector.load %arg20[%c0_71, %c0_72] : memref<8x1xf32, #tpu.memory_space<vmem>>, vector<8x1xf32>
    %98 = vector.broadcast %97 : vector<8x1xf32> to vector<8x98xf32>
    %99 = arith.mulf %96, %98 : vector<8x98xf32>
    %c0_73 = arith.constant 0 : index
    %c0_74 = arith.constant 0 : index
    %100 = vector.load %arg21[%c0_73, %c0_74] : memref<8x1xf32, #tpu.memory_space<vmem>>, vector<8x1xf32>
    %101 = vector.broadcast %100 : vector<8x1xf32> to vector<8x98xf32>
    %102 = arith.addf %99, %101 : vector<8x98xf32>
    %cst_75 = arith.constant 0.000000e+00 : f32
    %103 = vector.broadcast %cst_75 : f32 to vector<8x98xf32>
    %104 = arith.maximumf %102, %103 : vector<8x98xf32>
    %105 = arith.addf %95, %104 : vector<8x98xf32>
    %c0_76 = arith.constant 0 : index
    %c0_77 = arith.constant 0 : index
    %106 = vector.load %arg11[%c0_76, %c0_77] : memref<8x98xf32, #tpu.memory_space<vmem>>, vector<8x98xf32>
    %c0_78 = arith.constant 0 : index
    %c0_79 = arith.constant 0 : index
    %107 = vector.load %arg20[%c0_78, %c0_79] : memref<8x1xf32, #tpu.memory_space<vmem>>, vector<8x1xf32>
    %108 = vector.broadcast %107 : vector<8x1xf32> to vector<8x98xf32>
    %109 = arith.mulf %106, %108 : vector<8x98xf32>
    %c0_80 = arith.constant 0 : index
    %c0_81 = arith.constant 0 : index
    %110 = vector.load %arg21[%c0_80, %c0_81] : memref<8x1xf32, #tpu.memory_space<vmem>>, vector<8x1xf32>
    %111 = vector.broadcast %110 : vector<8x1xf32> to vector<8x98xf32>
    %112 = arith.addf %109, %111 : vector<8x98xf32>
    %cst_82 = arith.constant 0.000000e+00 : f32
    %113 = vector.broadcast %cst_82 : f32 to vector<8x98xf32>
    %114 = arith.maximumf %112, %113 : vector<8x98xf32>
    %115 = arith.addf %105, %114 : vector<8x98xf32>
    %c0_83 = arith.constant 0 : index
    %c0_84 = arith.constant 0 : index
    %116 = vector.load %arg12[%c0_83, %c0_84] : memref<8x98xf32, #tpu.memory_space<vmem>>, vector<8x98xf32>
    %c0_85 = arith.constant 0 : index
    %c0_86 = arith.constant 0 : index
    %117 = vector.load %arg20[%c0_85, %c0_86] : memref<8x1xf32, #tpu.memory_space<vmem>>, vector<8x1xf32>
    %118 = vector.broadcast %117 : vector<8x1xf32> to vector<8x98xf32>
    %119 = arith.mulf %116, %118 : vector<8x98xf32>
    %c0_87 = arith.constant 0 : index
    %c0_88 = arith.constant 0 : index
    %120 = vector.load %arg21[%c0_87, %c0_88] : memref<8x1xf32, #tpu.memory_space<vmem>>, vector<8x1xf32>
    %121 = vector.broadcast %120 : vector<8x1xf32> to vector<8x98xf32>
    %122 = arith.addf %119, %121 : vector<8x98xf32>
    %cst_89 = arith.constant 0.000000e+00 : f32
    %123 = vector.broadcast %cst_89 : f32 to vector<8x98xf32>
    %124 = arith.maximumf %122, %123 : vector<8x98xf32>
    %125 = arith.addf %115, %124 : vector<8x98xf32>
    %cst_90 = arith.constant 2.500000e-01 : f32
    %126 = vector.broadcast %cst_90 : f32 to vector<8x98xf32>
    %127 = arith.mulf %125, %126 : vector<8x98xf32>
    %c0_91 = arith.constant 0 : index
    %c0_92 = arith.constant 0 : index
    %128 = vector.load %arg15[%c0_91, %c0_92] : memref<16x8xf32, #tpu.memory_space<vmem>>, vector<16x8xf32>
    %cst_93 = arith.constant dense<0.000000e+00> : vector<16x98xf32>
    %129 = tpu.matmul %128, %127, %cst_93 {dimension_numbers = #tpu.dot_dimension_numbers<[1], [0], [0], [1], [0, 0, 1, 1], [], []>} : vector<16x8xf32>, vector<8x98xf32>, vector<16x98xf32> -> vector<16x98xf32>
    %130 = arith.addf %86, %129 : vector<16x98xf32>
    %c0_94 = arith.constant 0 : index
    %c0_95 = arith.constant 0 : index
    %131 = vector.load %arg22[%c0_94, %c0_95] : memref<16x98xf32, #tpu.memory_space<vmem>>, vector<16x98xf32>
    tpu.vector_store %arg22[%c0_94, %c0_95], %130 {strides = array<i32>} : memref<16x98xf32, #tpu.memory_space<vmem>>, vector<16x98xf32>,
    return
  }
  func.func @transform_0(%arg0: i32) -> (i32, i32) {
    %c0_i32 = arith.constant 0 : i32
    %c0_i32_0 = arith.constant 0 : i32
    return %c0_i32, %arg0 : i32, i32
  }
  func.func @transform_1(%arg0: i32) -> (i32, i32) {
    %c0_i32 = arith.constant 0 : i32
    %c0_i32_0 = arith.constant 0 : i32
    return %c0_i32, %arg0 : i32, i32
  }
  func.func @transform_2(%arg0: i32) -> (i32, i32) {
    %c0_i32 = arith.constant 0 : i32
    %c0_i32_0 = arith.constant 0 : i32
    return %c0_i32, %arg0 : i32, i32
  }
  func.func @transform_3(%arg0: i32) -> (i32, i32) {
    %c0_i32 = arith.constant 0 : i32
    %c0_i32_0 = arith.constant 0 : i32
    return %c0_i32, %arg0 : i32, i32
  }
  func.func @transform_4(%arg0: i32) -> (i32, i32) {
    %c0_i32 = arith.constant 0 : i32
    %c0_i32_0 = arith.constant 0 : i32
    return %c0_i32, %arg0 : i32, i32
  }
  func.func @transform_5(%arg0: i32) -> (i32, i32) {
    %c0_i32 = arith.constant 0 : i32
    %c0_i32_0 = arith.constant 0 : i32
    return %c0_i32, %arg0 : i32, i32
  }
  func.func @transform_6(%arg0: i32) -> (i32, i32) {
    %c0_i32 = arith.constant 0 : i32
    %c0_i32_0 = arith.constant 0 : i32
    return %c0_i32, %arg0 : i32, i32
  }
  func.func @transform_7(%arg0: i32) -> (i32, i32) {
    %c0_i32 = arith.constant 0 : i32
    %c0_i32_0 = arith.constant 0 : i32
    return %c0_i32, %arg0 : i32, i32
  }
  func.func @transform_8(%arg0: i32) -> (i32, i32) {
    %c0_i32 = arith.constant 0 : i32
    %c0_i32_0 = arith.constant 0 : i32
    return %c0_i32, %arg0 : i32, i32
  }
  func.func @transform_9(%arg0: i32) -> (i32, i32) {
    %c0_i32 = arith.constant 0 : i32
    %c0_i32_0 = arith.constant 0 : i32
    return %c0_i32, %arg0 : i32, i32
  }
  func.func @transform_10(%arg0: i32) -> (i32, i32) {
    %c0_i32 = arith.constant 0 : i32
    %c0_i32_0 = arith.constant 0 : i32
    return %c0_i32, %arg0 : i32, i32
  }
  func.func @transform_11(%arg0: i32) -> (i32, i32) {
    %c0_i32 = arith.constant 0 : i32
    %c0_i32_0 = arith.constant 0 : i32
    return %c0_i32, %arg0 : i32, i32
  }
  func.func @transform_12(%arg0: i32) -> (i32, i32) {
    %c0_i32 = arith.constant 0 : i32
    %c0_i32_0 = arith.constant 0 : i32
    %c0_i32_1 = arith.constant 0 : i32
    return %c0_i32, %c0_i32_0 : i32, i32
  }
  func.func @transform_13(%arg0: i32) -> (i32, i32) {
    %c0_i32 = arith.constant 0 : i32
    %c0_i32_0 = arith.constant 0 : i32
    %c0_i32_1 = arith.constant 0 : i32
    return %c0_i32, %c0_i32_0 : i32, i32
  }
  func.func @transform_14(%arg0: i32) -> (i32, i32) {
    %c0_i32 = arith.constant 0 : i32
    %c0_i32_0 = arith.constant 0 : i32
    %c0_i32_1 = arith.constant 0 : i32
    return %c0_i32, %c0_i32_0 : i32, i32
  }
  func.func @transform_15(%arg0: i32) -> (i32, i32) {
    %c0_i32 = arith.constant 0 : i32
    %c0_i32_0 = arith.constant 0 : i32
    %c0_i32_1 = arith.constant 0 : i32
    return %c0_i32, %c0_i32_0 : i32, i32
  }
  func.func @transform_16(%arg0: i32) -> (i32, i32) {
    %c0_i32 = arith.constant 0 : i32
    %c0_i32_0 = arith.constant 0 : i32
    %c0_i32_1 = arith.constant 0 : i32
    return %c0_i32, %c0_i32_0 : i32, i32
  }
  func.func @transform_17(%arg0: i32) -> (i32, i32) {
    %c0_i32 = arith.constant 0 : i32
    %c0_i32_0 = arith.constant 0 : i32
    %c0_i32_1 = arith.constant 0 : i32
    return %c0_i32, %c0_i32_0 : i32, i32
  }
  func.func @transform_18(%arg0: i32) -> (i32, i32) {
    %c0_i32 = arith.constant 0 : i32
    %c0_i32_0 = arith.constant 0 : i32
    %c0_i32_1 = arith.constant 0 : i32
    return %c0_i32, %c0_i32_0 : i32, i32
  }
  func.func @transform_19(%arg0: i32) -> (i32, i32) {
    %c0_i32 = arith.constant 0 : i32
    %c0_i32_0 = arith.constant 0 : i32
    %c0_i32_1 = arith.constant 0 : i32
    return %c0_i32, %c0_i32_0 : i32, i32
  }
  func.func @transform_20(%arg0: i32) -> (i32, i32) {
    %c0_i32 = arith.constant 0 : i32
    %c0_i32_0 = arith.constant 0 : i32
    %c0_i32_1 = arith.constant 0 : i32
    return %c0_i32, %c0_i32_0 : i32, i32
  }
  func.func @transform_21(%arg0: i32) -> (i32, i32) {
    %c0_i32 = arith.constant 0 : i32
    %c0_i32_0 = arith.constant 0 : i32
    return %c0_i32, %arg0 : i32, i32
  }
}

module attributes {stable_mosaic.version = 11 : i64} {
  func.func @_conv_matmul_kernel(%arg0: i32, %arg1: memref<16x98xf32, #tpu.memory_space<vmem>>, %arg2: memref<16x16xf32, #tpu.memory_space<vmem>>, %arg3: memref<16x1xf32, #tpu.memory_space<vmem>>, %arg4: memref<16x1xf32, #tpu.memory_space<vmem>>, %arg5: memref<16x1xf32, #tpu.memory_space<vmem>>, %arg6: memref<16x1xf32, #tpu.memory_space<vmem>>, %arg7: memref<16x98xf32, #tpu.memory_space<vmem>>) attributes {dimension_semantics = [#tpu.dimension_semantics<parallel>], iteration_bounds = array<i64: 1>, scalar_prefetch = 0 : i64, scratch_operands = 0 : i64, tpu.core_type = #tpu.core_type<tc>, window_params = [{transform_indices = @transform_0, window_bounds = array<i64: 16, 98>}, {pipeline_mode = #tpu.pipeline_mode<synchronous>, transform_indices = @transform_1, window_bounds = array<i64: 16, 16>}, {pipeline_mode = #tpu.pipeline_mode<synchronous>, transform_indices = @transform_2, window_bounds = array<i64: 16, 1>}, {pipeline_mode = #tpu.pipeline_mode<synchronous>, transform_indices = @transform_3, window_bounds = array<i64: 16, 1>}, {pipeline_mode = #tpu.pipeline_mode<synchronous>, transform_indices = @transform_4, window_bounds = array<i64: 16, 1>}, {pipeline_mode = #tpu.pipeline_mode<synchronous>, transform_indices = @transform_5, window_bounds = array<i64: 16, 1>}, {transform_indices = @transform_6, window_bounds = array<i64: 16, 98>}]} {
    %c0 = arith.constant 0 : index
    %c0_0 = arith.constant 0 : index
    %0 = vector.load %arg1[%c0, %c0_0] : memref<16x98xf32, #tpu.memory_space<vmem>>, vector<16x98xf32>
    %c0_1 = arith.constant 0 : index
    %c0_2 = arith.constant 0 : index
    %1 = vector.load %arg3[%c0_1, %c0_2] : memref<16x1xf32, #tpu.memory_space<vmem>>, vector<16x1xf32>
    %2 = vector.broadcast %1 : vector<16x1xf32> to vector<16x98xf32>
    %3 = arith.mulf %0, %2 : vector<16x98xf32>
    %c0_3 = arith.constant 0 : index
    %c0_4 = arith.constant 0 : index
    %4 = vector.load %arg4[%c0_3, %c0_4] : memref<16x1xf32, #tpu.memory_space<vmem>>, vector<16x1xf32>
    %5 = vector.broadcast %4 : vector<16x1xf32> to vector<16x98xf32>
    %6 = arith.addf %3, %5 : vector<16x98xf32>
    %cst = arith.constant 0.000000e+00 : f32
    %7 = vector.broadcast %cst : f32 to vector<16x98xf32>
    %8 = arith.maximumf %6, %7 : vector<16x98xf32>
    %c0_5 = arith.constant 0 : index
    %c0_6 = arith.constant 0 : index
    %9 = vector.load %arg2[%c0_5, %c0_6] : memref<16x16xf32, #tpu.memory_space<vmem>>, vector<16x16xf32>
    %cst_7 = arith.constant dense<0.000000e+00> : vector<16x98xf32>
    %10 = tpu.matmul %9, %8, %cst_7 {dimension_numbers = #tpu.dot_dimension_numbers<[1], [0], [0], [1], [0, 0, 1, 1], [], []>} : vector<16x16xf32>, vector<16x98xf32>, vector<16x98xf32> -> vector<16x98xf32>
    %c0_8 = arith.constant 0 : index
    %c0_9 = arith.constant 0 : index
    %11 = vector.load %arg5[%c0_8, %c0_9] : memref<16x1xf32, #tpu.memory_space<vmem>>, vector<16x1xf32>
    %12 = vector.broadcast %11 : vector<16x1xf32> to vector<16x98xf32>
    %13 = arith.mulf %10, %12 : vector<16x98xf32>
    %c0_10 = arith.constant 0 : index
    %c0_11 = arith.constant 0 : index
    %14 = vector.load %arg6[%c0_10, %c0_11] : memref<16x1xf32, #tpu.memory_space<vmem>>, vector<16x1xf32>
    %15 = vector.broadcast %14 : vector<16x1xf32> to vector<16x98xf32>
    %16 = arith.addf %13, %15 : vector<16x98xf32>
    %cst_12 = arith.constant 0.000000e+00 : f32
    %17 = vector.broadcast %cst_12 : f32 to vector<16x98xf32>
    %18 = arith.maximumf %16, %17 : vector<16x98xf32>
    %c0_13 = arith.constant 0 : index
    %c0_14 = arith.constant 0 : index
    %19 = vector.load %arg7[%c0_13, %c0_14] : memref<16x98xf32, #tpu.memory_space<vmem>>, vector<16x98xf32>
    tpu.vector_store %arg7[%c0_13, %c0_14], %18 {strides = array<i32>} : memref<16x98xf32, #tpu.memory_space<vmem>>, vector<16x98xf32>,
    return
  }
  func.func @transform_0(%arg0: i32) -> (i32, i32) {
    %c0_i32 = arith.constant 0 : i32
    %c0_i32_0 = arith.constant 0 : i32
    return %c0_i32, %arg0 : i32, i32
  }
  func.func @transform_1(%arg0: i32) -> (i32, i32) {
    %c0_i32 = arith.constant 0 : i32
    %c0_i32_0 = arith.constant 0 : i32
    %c0_i32_1 = arith.constant 0 : i32
    return %c0_i32, %c0_i32_0 : i32, i32
  }
  func.func @transform_2(%arg0: i32) -> (i32, i32) {
    %c0_i32 = arith.constant 0 : i32
    %c0_i32_0 = arith.constant 0 : i32
    %c0_i32_1 = arith.constant 0 : i32
    return %c0_i32, %c0_i32_0 : i32, i32
  }
  func.func @transform_3(%arg0: i32) -> (i32, i32) {
    %c0_i32 = arith.constant 0 : i32
    %c0_i32_0 = arith.constant 0 : i32
    %c0_i32_1 = arith.constant 0 : i32
    return %c0_i32, %c0_i32_0 : i32, i32
  }
  func.func @transform_4(%arg0: i32) -> (i32, i32) {
    %c0_i32 = arith.constant 0 : i32
    %c0_i32_0 = arith.constant 0 : i32
    %c0_i32_1 = arith.constant 0 : i32
    return %c0_i32, %c0_i32_0 : i32, i32
  }
  func.func @transform_5(%arg0: i32) -> (i32, i32) {
    %c0_i32 = arith.constant 0 : i32
    %c0_i32_0 = arith.constant 0 : i32
    %c0_i32_1 = arith.constant 0 : i32
    return %c0_i32, %c0_i32_0 : i32, i32
  }
  func.func @transform_6(%arg0: i32) -> (i32, i32) {
    %c0_i32 = arith.constant 0 : i32
    %c0_i32_0 = arith.constant 0 : i32
    return %c0_i32, %arg0 : i32, i32
  }
}

module attributes {stable_mosaic.version = 11 : i64} {
  func.func @_conv_matmul_kernel(%arg0: i32, %arg1: memref<144x98xf32, #tpu.memory_space<vmem>>, %arg2: memref<8x144xf32, #tpu.memory_space<vmem>>, %arg3: memref<8x98xf32, #tpu.memory_space<vmem>>) attributes {dimension_semantics = [#tpu.dimension_semantics<parallel>], iteration_bounds = array<i64: 1>, scalar_prefetch = 0 : i64, scratch_operands = 0 : i64, tpu.core_type = #tpu.core_type<tc>, window_params = [{transform_indices = @transform_0, window_bounds = array<i64: 144, 98>}, {pipeline_mode = #tpu.pipeline_mode<synchronous>, transform_indices = @transform_1, window_bounds = array<i64: 8, 144>}, {transform_indices = @transform_2, window_bounds = array<i64: 8, 98>}]} {
    %c0 = arith.constant 0 : index
    %c0_0 = arith.constant 0 : index
    %0 = vector.load %arg1[%c0, %c0_0] : memref<144x98xf32, #tpu.memory_space<vmem>>, vector<144x98xf32>
    %c0_1 = arith.constant 0 : index
    %c0_2 = arith.constant 0 : index
    %1 = vector.load %arg2[%c0_1, %c0_2] : memref<8x144xf32, #tpu.memory_space<vmem>>, vector<8x144xf32>
    %cst = arith.constant dense<0.000000e+00> : vector<8x98xf32>
    %2 = tpu.matmul %1, %0, %cst {dimension_numbers = #tpu.dot_dimension_numbers<[1], [0], [0], [1], [0, 0, 1, 1], [], []>} : vector<8x144xf32>, vector<144x98xf32>, vector<8x98xf32> -> vector<8x98xf32>
    %c0_3 = arith.constant 0 : index
    %c0_4 = arith.constant 0 : index
    %3 = vector.load %arg3[%c0_3, %c0_4] : memref<8x98xf32, #tpu.memory_space<vmem>>, vector<8x98xf32>
    tpu.vector_store %arg3[%c0_3, %c0_4], %2 {strides = array<i32>} : memref<8x98xf32, #tpu.memory_space<vmem>>, vector<8x98xf32>,
    return
  }
  func.func @transform_0(%arg0: i32) -> (i32, i32) {
    %c0_i32 = arith.constant 0 : i32
    %c0_i32_0 = arith.constant 0 : i32
    return %c0_i32, %arg0 : i32, i32
  }
  func.func @transform_1(%arg0: i32) -> (i32, i32) {
    %c0_i32 = arith.constant 0 : i32
    %c0_i32_0 = arith.constant 0 : i32
    %c0_i32_1 = arith.constant 0 : i32
    return %c0_i32, %c0_i32_0 : i32, i32
  }
  func.func @transform_2(%arg0: i32) -> (i32, i32) {
    %c0_i32 = arith.constant 0 : i32
    %c0_i32_0 = arith.constant 0 : i32
    return %c0_i32, %arg0 : i32, i32
  }
}

module attributes {stable_mosaic.version = 11 : i64} {
  func.func @_conv_matmul_kernel(%arg0: i32, %arg1: memref<16x98xf32, #tpu.memory_space<vmem>>, %arg2: memref<8x98xf32, #tpu.memory_space<vmem>>, %arg3: memref<16x16xf32, #tpu.memory_space<vmem>>, %arg4: memref<16x8xf32, #tpu.memory_space<vmem>>, %arg5: memref<16x1xf32, #tpu.memory_space<vmem>>, %arg6: memref<16x1xf32, #tpu.memory_space<vmem>>, %arg7: memref<8x1xf32, #tpu.memory_space<vmem>>, %arg8: memref<8x1xf32, #tpu.memory_space<vmem>>, %arg9: memref<16x1xf32, #tpu.memory_space<vmem>>, %arg10: memref<16x1xf32, #tpu.memory_space<vmem>>, %arg11: memref<16x98xf32, #tpu.memory_space<vmem>>) attributes {dimension_semantics = [#tpu.dimension_semantics<parallel>], iteration_bounds = array<i64: 1>, scalar_prefetch = 0 : i64, scratch_operands = 0 : i64, tpu.core_type = #tpu.core_type<tc>, window_params = [{transform_indices = @transform_0, window_bounds = array<i64: 16, 98>}, {transform_indices = @transform_1, window_bounds = array<i64: 8, 98>}, {pipeline_mode = #tpu.pipeline_mode<synchronous>, transform_indices = @transform_2, window_bounds = array<i64: 16, 16>}, {pipeline_mode = #tpu.pipeline_mode<synchronous>, transform_indices = @transform_3, window_bounds = array<i64: 16, 8>}, {pipeline_mode = #tpu.pipeline_mode<synchronous>, transform_indices = @transform_4, window_bounds = array<i64: 16, 1>}, {pipeline_mode = #tpu.pipeline_mode<synchronous>, transform_indices = @transform_5, window_bounds = array<i64: 16, 1>}, {pipeline_mode = #tpu.pipeline_mode<synchronous>, transform_indices = @transform_6, window_bounds = array<i64: 8, 1>}, {pipeline_mode = #tpu.pipeline_mode<synchronous>, transform_indices = @transform_7, window_bounds = array<i64: 8, 1>}, {pipeline_mode = #tpu.pipeline_mode<synchronous>, transform_indices = @transform_8, window_bounds = array<i64: 16, 1>}, {pipeline_mode = #tpu.pipeline_mode<synchronous>, transform_indices = @transform_9, window_bounds = array<i64: 16, 1>}, {transform_indices = @transform_10, window_bounds = array<i64: 16, 98>}]} {
    %c0 = arith.constant 0 : index
    %c0_0 = arith.constant 0 : index
    %0 = vector.load %arg1[%c0, %c0_0] : memref<16x98xf32, #tpu.memory_space<vmem>>, vector<16x98xf32>
    %c0_1 = arith.constant 0 : index
    %c0_2 = arith.constant 0 : index
    %1 = vector.load %arg5[%c0_1, %c0_2] : memref<16x1xf32, #tpu.memory_space<vmem>>, vector<16x1xf32>
    %2 = vector.broadcast %1 : vector<16x1xf32> to vector<16x98xf32>
    %3 = arith.mulf %0, %2 : vector<16x98xf32>
    %c0_3 = arith.constant 0 : index
    %c0_4 = arith.constant 0 : index
    %4 = vector.load %arg6[%c0_3, %c0_4] : memref<16x1xf32, #tpu.memory_space<vmem>>, vector<16x1xf32>
    %5 = vector.broadcast %4 : vector<16x1xf32> to vector<16x98xf32>
    %6 = arith.addf %3, %5 : vector<16x98xf32>
    %cst = arith.constant 0.000000e+00 : f32
    %7 = vector.broadcast %cst : f32 to vector<16x98xf32>
    %8 = arith.maximumf %6, %7 : vector<16x98xf32>
    %c0_5 = arith.constant 0 : index
    %c0_6 = arith.constant 0 : index
    %9 = vector.load %arg3[%c0_5, %c0_6] : memref<16x16xf32, #tpu.memory_space<vmem>>, vector<16x16xf32>
    %cst_7 = arith.constant dense<0.000000e+00> : vector<16x98xf32>
    %10 = tpu.matmul %9, %8, %cst_7 {dimension_numbers = #tpu.dot_dimension_numbers<[1], [0], [0], [1], [0, 0, 1, 1], [], []>} : vector<16x16xf32>, vector<16x98xf32>, vector<16x98xf32> -> vector<16x98xf32>
    %c0_8 = arith.constant 0 : index
    %c0_9 = arith.constant 0 : index
    %11 = vector.load %arg2[%c0_8, %c0_9] : memref<8x98xf32, #tpu.memory_space<vmem>>, vector<8x98xf32>
    %c0_10 = arith.constant 0 : index
    %c0_11 = arith.constant 0 : index
    %12 = vector.load %arg7[%c0_10, %c0_11] : memref<8x1xf32, #tpu.memory_space<vmem>>, vector<8x1xf32>
    %13 = vector.broadcast %12 : vector<8x1xf32> to vector<8x98xf32>
    %14 = arith.mulf %11, %13 : vector<8x98xf32>
    %c0_12 = arith.constant 0 : index
    %c0_13 = arith.constant 0 : index
    %15 = vector.load %arg8[%c0_12, %c0_13] : memref<8x1xf32, #tpu.memory_space<vmem>>, vector<8x1xf32>
    %16 = vector.broadcast %15 : vector<8x1xf32> to vector<8x98xf32>
    %17 = arith.addf %14, %16 : vector<8x98xf32>
    %cst_14 = arith.constant 0.000000e+00 : f32
    %18 = vector.broadcast %cst_14 : f32 to vector<8x98xf32>
    %19 = arith.maximumf %17, %18 : vector<8x98xf32>
    %c0_15 = arith.constant 0 : index
    %c0_16 = arith.constant 0 : index
    %20 = vector.load %arg4[%c0_15, %c0_16] : memref<16x8xf32, #tpu.memory_space<vmem>>, vector<16x8xf32>
    %cst_17 = arith.constant dense<0.000000e+00> : vector<16x98xf32>
    %21 = tpu.matmul %20, %19, %cst_17 {dimension_numbers = #tpu.dot_dimension_numbers<[1], [0], [0], [1], [0, 0, 1, 1], [], []>} : vector<16x8xf32>, vector<8x98xf32>, vector<16x98xf32> -> vector<16x98xf32>
    %22 = arith.addf %10, %21 : vector<16x98xf32>
    %c0_18 = arith.constant 0 : index
    %c0_19 = arith.constant 0 : index
    %23 = vector.load %arg9[%c0_18, %c0_19] : memref<16x1xf32, #tpu.memory_space<vmem>>, vector<16x1xf32>
    %24 = vector.broadcast %23 : vector<16x1xf32> to vector<16x98xf32>
    %25 = arith.mulf %22, %24 : vector<16x98xf32>
    %c0_20 = arith.constant 0 : index
    %c0_21 = arith.constant 0 : index
    %26 = vector.load %arg10[%c0_20, %c0_21] : memref<16x1xf32, #tpu.memory_space<vmem>>, vector<16x1xf32>
    %27 = vector.broadcast %26 : vector<16x1xf32> to vector<16x98xf32>
    %28 = arith.addf %25, %27 : vector<16x98xf32>
    %cst_22 = arith.constant 0.000000e+00 : f32
    %29 = vector.broadcast %cst_22 : f32 to vector<16x98xf32>
    %30 = arith.maximumf %28, %29 : vector<16x98xf32>
    %c0_23 = arith.constant 0 : index
    %c0_24 = arith.constant 0 : index
    %31 = vector.load %arg11[%c0_23, %c0_24] : memref<16x98xf32, #tpu.memory_space<vmem>>, vector<16x98xf32>
    tpu.vector_store %arg11[%c0_23, %c0_24], %30 {strides = array<i32>} : memref<16x98xf32, #tpu.memory_space<vmem>>, vector<16x98xf32>,
    return
  }
  func.func @transform_0(%arg0: i32) -> (i32, i32) {
    %c0_i32 = arith.constant 0 : i32
    %c0_i32_0 = arith.constant 0 : i32
    return %c0_i32, %arg0 : i32, i32
  }
  func.func @transform_1(%arg0: i32) -> (i32, i32) {
    %c0_i32 = arith.constant 0 : i32
    %c0_i32_0 = arith.constant 0 : i32
    return %c0_i32, %arg0 : i32, i32
  }
  func.func @transform_2(%arg0: i32) -> (i32, i32) {
    %c0_i32 = arith.constant 0 : i32
    %c0_i32_0 = arith.constant 0 : i32
    %c0_i32_1 = arith.constant 0 : i32
    return %c0_i32, %c0_i32_0 : i32, i32
  }
  func.func @transform_3(%arg0: i32) -> (i32, i32) {
    %c0_i32 = arith.constant 0 : i32
    %c0_i32_0 = arith.constant 0 : i32
    %c0_i32_1 = arith.constant 0 : i32
    return %c0_i32, %c0_i32_0 : i32, i32
  }
  func.func @transform_4(%arg0: i32) -> (i32, i32) {
    %c0_i32 = arith.constant 0 : i32
    %c0_i32_0 = arith.constant 0 : i32
    %c0_i32_1 = arith.constant 0 : i32
    return %c0_i32, %c0_i32_0 : i32, i32
  }
  func.func @transform_5(%arg0: i32) -> (i32, i32) {
    %c0_i32 = arith.constant 0 : i32
    %c0_i32_0 = arith.constant 0 : i32
    %c0_i32_1 = arith.constant 0 : i32
    return %c0_i32, %c0_i32_0 : i32, i32
  }
  func.func @transform_6(%arg0: i32) -> (i32, i32) {
    %c0_i32 = arith.constant 0 : i32
    %c0_i32_0 = arith.constant 0 : i32
    %c0_i32_1 = arith.constant 0 : i32
    return %c0_i32, %c0_i32_0 : i32, i32
  }
  func.func @transform_7(%arg0: i32) -> (i32, i32) {
    %c0_i32 = arith.constant 0 : i32
    %c0_i32_0 = arith.constant 0 : i32
    %c0_i32_1 = arith.constant 0 : i32
    return %c0_i32, %c0_i32_0 : i32, i32
  }
  func.func @transform_8(%arg0: i32) -> (i32, i32) {
    %c0_i32 = arith.constant 0 : i32
    %c0_i32_0 = arith.constant 0 : i32
    %c0_i32_1 = arith.constant 0 : i32
    return %c0_i32, %c0_i32_0 : i32, i32
  }
  func.func @transform_9(%arg0: i32) -> (i32, i32) {
    %c0_i32 = arith.constant 0 : i32
    %c0_i32_0 = arith.constant 0 : i32
    %c0_i32_1 = arith.constant 0 : i32
    return %c0_i32, %c0_i32_0 : i32, i32
  }
  func.func @transform_10(%arg0: i32) -> (i32, i32) {
    %c0_i32 = arith.constant 0 : i32
    %c0_i32_0 = arith.constant 0 : i32
    return %c0_i32, %arg0 : i32, i32
  }
}

module attributes {stable_mosaic.version = 11 : i64} {
  func.func @_cls_head_kernel(%arg0: memref<16x2x49xf32, #tpu.memory_space<vmem>>, %arg1: memref<8x2x49xf32, #tpu.memory_space<vmem>>, %arg2: memref<8x2x49xf32, #tpu.memory_space<vmem>>, %arg3: memref<16x1x1xf32, #tpu.memory_space<vmem>>, %arg4: memref<16x1x1xf32, #tpu.memory_space<vmem>>, %arg5: memref<8x1x1xf32, #tpu.memory_space<vmem>>, %arg6: memref<8x1x1xf32, #tpu.memory_space<vmem>>, %arg7: memref<8x1x1xf32, #tpu.memory_space<vmem>>, %arg8: memref<8x1x1xf32, #tpu.memory_space<vmem>>, %arg9: memref<10x16xf32, #tpu.memory_space<vmem>>, %arg10: memref<10x8xf32, #tpu.memory_space<vmem>>, %arg11: memref<10x8xf32, #tpu.memory_space<vmem>>, %arg12: memref<10x1xf32, #tpu.memory_space<vmem>>, %arg13: memref<10x2xf32, #tpu.memory_space<vmem>>) attributes {dimension_semantics = [], scalar_prefetch = 0 : i64, scratch_operands = 0 : i64, tpu.core_type = #tpu.core_type<tc>} {
    %c0 = arith.constant 0 : index
    %c0_0 = arith.constant 0 : index
    %c0_1 = arith.constant 0 : index
    %0 = vector.load %arg0[%c0, %c0_0, %c0_1] : memref<16x2x49xf32, #tpu.memory_space<vmem>>, vector<16x2x49xf32>
    %c0_2 = arith.constant 0 : index
    %c0_3 = arith.constant 0 : index
    %c0_4 = arith.constant 0 : index
    %1 = vector.load %arg3[%c0_2, %c0_3, %c0_4] : memref<16x1x1xf32, #tpu.memory_space<vmem>>, vector<16x1x1xf32>
    %2 = vector.broadcast %1 : vector<16x1x1xf32> to vector<16x2x49xf32>
    %3 = arith.mulf %0, %2 : vector<16x2x49xf32>
    %c0_5 = arith.constant 0 : index
    %c0_6 = arith.constant 0 : index
    %c0_7 = arith.constant 0 : index
    %4 = vector.load %arg4[%c0_5, %c0_6, %c0_7] : memref<16x1x1xf32, #tpu.memory_space<vmem>>, vector<16x1x1xf32>
    %5 = vector.broadcast %4 : vector<16x1x1xf32> to vector<16x2x49xf32>
    %6 = arith.addf %3, %5 : vector<16x2x49xf32>
    %cst = arith.constant 0.000000e+00 : f32
    %7 = vector.broadcast %cst : f32 to vector<16x2x49xf32>
    %8 = arith.maximumf %6, %7 : vector<16x2x49xf32>
    %cst_8 = arith.constant dense<0.000000e+00> : vector<16x2xf32>
    %9 = vector.multi_reduction <add>, %8, %cst_8 [2] : vector<16x2x49xf32> to vector<16x2xf32>
    %cst_9 = arith.constant 4.900000e+01 : f32
    %10 = vector.broadcast %cst_9 : f32 to vector<16x2xf32>
    %11 = arith.divf %9, %10 : vector<16x2xf32>
    %c0_10 = arith.constant 0 : index
    %c0_11 = arith.constant 0 : index
    %12 = vector.load %arg9[%c0_10, %c0_11] : memref<10x16xf32, #tpu.memory_space<vmem>>, vector<10x16xf32>
    %cst_12 = arith.constant dense<0.000000e+00> : vector<10x2xf32>
    %13 = tpu.matmul %12, %11, %cst_12 {dimension_numbers = #tpu.dot_dimension_numbers<[1], [0], [0], [1], [0, 0, 1, 1], [], []>} : vector<10x16xf32>, vector<16x2xf32>, vector<10x2xf32> -> vector<10x2xf32>
    %c0_13 = arith.constant 0 : index
    %c0_14 = arith.constant 0 : index
    %c0_15 = arith.constant 0 : index
    %14 = vector.load %arg1[%c0_13, %c0_14, %c0_15] : memref<8x2x49xf32, #tpu.memory_space<vmem>>, vector<8x2x49xf32>
    %c0_16 = arith.constant 0 : index
    %c0_17 = arith.constant 0 : index
    %c0_18 = arith.constant 0 : index
    %15 = vector.load %arg5[%c0_16, %c0_17, %c0_18] : memref<8x1x1xf32, #tpu.memory_space<vmem>>, vector<8x1x1xf32>
    %16 = vector.broadcast %15 : vector<8x1x1xf32> to vector<8x2x49xf32>
    %17 = arith.mulf %14, %16 : vector<8x2x49xf32>
    %c0_19 = arith.constant 0 : index
    %c0_20 = arith.constant 0 : index
    %c0_21 = arith.constant 0 : index
    %18 = vector.load %arg6[%c0_19, %c0_20, %c0_21] : memref<8x1x1xf32, #tpu.memory_space<vmem>>, vector<8x1x1xf32>
    %19 = vector.broadcast %18 : vector<8x1x1xf32> to vector<8x2x49xf32>
    %20 = arith.addf %17, %19 : vector<8x2x49xf32>
    %cst_22 = arith.constant 0.000000e+00 : f32
    %21 = vector.broadcast %cst_22 : f32 to vector<8x2x49xf32>
    %22 = arith.maximumf %20, %21 : vector<8x2x49xf32>
    %cst_23 = arith.constant dense<0.000000e+00> : vector<8x2xf32>
    %23 = vector.multi_reduction <add>, %22, %cst_23 [2] : vector<8x2x49xf32> to vector<8x2xf32>
    %cst_24 = arith.constant 4.900000e+01 : f32
    %24 = vector.broadcast %cst_24 : f32 to vector<8x2xf32>
    %25 = arith.divf %23, %24 : vector<8x2xf32>
    %c0_25 = arith.constant 0 : index
    %c0_26 = arith.constant 0 : index
    %26 = vector.load %arg10[%c0_25, %c0_26] : memref<10x8xf32, #tpu.memory_space<vmem>>, vector<10x8xf32>
    %cst_27 = arith.constant dense<0.000000e+00> : vector<10x2xf32>
    %27 = tpu.matmul %26, %25, %cst_27 {dimension_numbers = #tpu.dot_dimension_numbers<[1], [0], [0], [1], [0, 0, 1, 1], [], []>} : vector<10x8xf32>, vector<8x2xf32>, vector<10x2xf32> -> vector<10x2xf32>
    %28 = arith.addf %13, %27 : vector<10x2xf32>
    %c0_28 = arith.constant 0 : index
    %c0_29 = arith.constant 0 : index
    %c0_30 = arith.constant 0 : index
    %29 = vector.load %arg2[%c0_28, %c0_29, %c0_30] : memref<8x2x49xf32, #tpu.memory_space<vmem>>, vector<8x2x49xf32>
    %c0_31 = arith.constant 0 : index
    %c0_32 = arith.constant 0 : index
    %c0_33 = arith.constant 0 : index
    %30 = vector.load %arg7[%c0_31, %c0_32, %c0_33] : memref<8x1x1xf32, #tpu.memory_space<vmem>>, vector<8x1x1xf32>
    %31 = vector.broadcast %30 : vector<8x1x1xf32> to vector<8x2x49xf32>
    %32 = arith.mulf %29, %31 : vector<8x2x49xf32>
    %c0_34 = arith.constant 0 : index
    %c0_35 = arith.constant 0 : index
    %c0_36 = arith.constant 0 : index
    %33 = vector.load %arg8[%c0_34, %c0_35, %c0_36] : memref<8x1x1xf32, #tpu.memory_space<vmem>>, vector<8x1x1xf32>
    %34 = vector.broadcast %33 : vector<8x1x1xf32> to vector<8x2x49xf32>
    %35 = arith.addf %32, %34 : vector<8x2x49xf32>
    %cst_37 = arith.constant 0.000000e+00 : f32
    %36 = vector.broadcast %cst_37 : f32 to vector<8x2x49xf32>
    %37 = arith.maximumf %35, %36 : vector<8x2x49xf32>
    %cst_38 = arith.constant dense<0.000000e+00> : vector<8x2xf32>
    %38 = vector.multi_reduction <add>, %37, %cst_38 [2] : vector<8x2x49xf32> to vector<8x2xf32>
    %cst_39 = arith.constant 4.900000e+01 : f32
    %39 = vector.broadcast %cst_39 : f32 to vector<8x2xf32>
    %40 = arith.divf %38, %39 : vector<8x2xf32>
    %c0_40 = arith.constant 0 : index
    %c0_41 = arith.constant 0 : index
    %41 = vector.load %arg11[%c0_40, %c0_41] : memref<10x8xf32, #tpu.memory_space<vmem>>, vector<10x8xf32>
    %cst_42 = arith.constant dense<0.000000e+00> : vector<10x2xf32>
    %42 = tpu.matmul %41, %40, %cst_42 {dimension_numbers = #tpu.dot_dimension_numbers<[1], [0], [0], [1], [0, 0, 1, 1], [], []>} : vector<10x8xf32>, vector<8x2xf32>, vector<10x2xf32> -> vector<10x2xf32>
    %43 = arith.addf %28, %42 : vector<10x2xf32>
    %c0_43 = arith.constant 0 : index
    %c0_44 = arith.constant 0 : index
    %44 = vector.load %arg12[%c0_43, %c0_44] : memref<10x1xf32, #tpu.memory_space<vmem>>, vector<10x1xf32>
    %45 = vector.broadcast %44 : vector<10x1xf32> to vector<10x2xf32>
    %46 = arith.addf %43, %45 : vector<10x2xf32>
    %c0_45 = arith.constant 0 : index
    %c0_46 = arith.constant 0 : index
    %47 = vector.load %arg13[%c0_45, %c0_46] : memref<10x2xf32, #tpu.memory_space<vmem>>, vector<10x2xf32>
    tpu.vector_store %arg13[%c0_45, %c0_46], %46 {strides = array<i32>} : memref<10x2xf32, #tpu.memory_space<vmem>>, vector<10x2xf32>,
    return
  }
}

</mosaic_0001>

<bundles_post_ra>
// kernel: densenet_forward.12
= control target key start
LH: loop header
LB: loop body
LE: loop exit
PB: predicated region body
PF: predicated region fallthrough
CT: control target
= control target key end

     0   :  { %s2414_s15 = smov 0   ;;  %s2416_s16 = smov 0   ;;  %s3614_s0 = inlined_call_operand.vmem [shape: f32[147,1568], index: 0, kind: input, shape index: {}]   ;;  %s3615_s1 = inlined_call_operand.vmem [shape: f32[16,147], index: 1, kind: input, shape index: {}]   ;;  %s3616_s2 = inlined_call_operand.vmem [shape: f32[16,1], index: 2, kind: input, shape index: {}]   ;;  %s3617_s3 = inlined_call_operand.vmem [shape: f32[16,1], index: 3, kind: input, shape index: {}]   ;;  %s3618_s4 = inlined_call_operand.vmem [shape: f32[16,1568], index: 4, kind: output, shape index: {}]  }
   0x1   :  { %s2418_s17 = smov 0  }
   0x2 LB: > { %s2430_s18 = sadd.s32 4294967295, %s2254_s17   ;;  %s2433_s19 = sadd.s32 1, %s2254_s17   ;;  %s2254_s17 = sphi %s2418_s17, %s3652_s17   ;;  %s2250_s16 = sphi %s2416_s16, %s3651_s16   ;;  %s2246_s15 = sphi %s2414_s15, %s3650_s15  }
   0x3   : > { %s18_s20 = ssub.s32 %s2254_s17, %s2433_s19  ;;  %s21_s21 = sadd.s32 1, %s2250_s16 }
   0x4   : > { %p19_p0 = scmp.eq.s32.totalorder %s18_s20, 0  ;;  %p28_p1 = scmp.ne.s32.totalorder %s2250_s16, %s2246_s15 }
   0x5   : > { %p29_p2 = scmp.eq.s32.totalorder %s2254_s17, 0  ;;  %p121_p3 = scmp.eq.s32.totalorder %s2430_s18, 1 }
   0x6   : > { %s2443_s22 = scalar_select %p19_p0, %s2250_s16, %s21_s21  }
   0x7   : > { %p30_p4 = por %p29_p2, %p28_p1  ;;  %p2445_p5 = por %p121_p3, %p28_p1 }
   0x8   : > { %p1726_p6 = scmp.ge.s32.totalorder %s2254_s17, 2 }
   0xa   : > { %152 = sbr.rel (%p1726_p6) target bundleno = 242 (0xf2), region = 28 }
   0xf   : > { %155 = sbr.rel (!%p30_p4) target bundleno = 242 (0xf2), region = 32  ;;  %s157_s24 = sand.u32 (%p30_p4), 1, %s2250_s16  }
  0x10   : > { %s160_s25 = smul.u32 (%p30_p4), 7, %s2254_s17 }
  0x11   : > { %s1814_s26 = smul.u32 (%p30_p4), 1064, %s157_s24 }
  0x12   : > { %s161_s27 = ssub.s32 (%p30_p4), 13, %s160_s25  ;;  %s1804_s28 = smul.u32 (%p30_p4), 56, %s2254_s17 }
  0x13   : > { %p162_p7 = scmp.lt.s32.totalorder (%p30_p4), %s161_s27, 7  ;;  %s2460_s8 = scalar_lea.vmem (%p30_p4), [#allocation2], %s1814_s26  }
  0x14   : > { %s2456_s5 = scalar_lea.vmem %s3614_s0, %s1804_s28  }
  0x15   : > { %s3654_s27 = smov (!%p162_p7, %s161_s27), 7 }
  0x16   : > { %s164_s6 = smul.u32 152, %s3654_s27  ;;  %s2458_s7 = sshll.u32 %s3654_s27, 3 }
  0x18   : > { %p1730_p8 = scmp.eq.s32.totalorder %s164_s6, 0 }
  0x19   : > { %p172_p9 = scmp.lt.u32.totalorder (!%p1730_p8), %s2458_s7, 8 }
  0x1a   : > { %171 = sbr.rel (%p1730_p8) target bundleno = 242 (0xf2), region = 36 }
  0x1f   : > { %175 = sbr.rel (%p172_p9) target bundleno = 215 (0xd7), region = 40  ;;  %s2464_s9 = sand.u32 (!%p172_p9), 7, %s2458_s7  }
  0x20   : > { %p228_p10 = scmp.eq.s32.totalorder (!%p172_p9), %s2464_s9, 0  ;;  %p1731_p11 = scmp.ne.s32.totalorder (!%p172_p9), %s2464_s9, 0 }
  0x24   : > { %231 = sbr.rel (%p1731_p11) target bundleno = 114 (0x72), region = 55  ;;  %s232_s10 = sshrl.u32 (!%p1731_p11), %s2458_s7, 3 }
  0x25   : > { %s2471_s11 = sshrl.u32 (!%p1731_p11), %s232_s10, 1 }
  0x26   : > { %p1732_p12 = scmp.le.s32.totalorder (!%p1731_p11), %s2471_s11, 0 }
  0x29   : > { %1596 = sbr.rel (%p1732_p12) target bundleno = 85 (0x55), region = 233  ;;  %s3620_s12 = smov (!%p1732_p12), %s2460_s8 }
  0x2a   : > { %s3621_s13 = smov (!%p1732_p12), %s2456_s5  ;;  %s2480_s14 = smov (!%p1732_p12), 0  }
  0x2b   : > { %s2482_s20 = smov (!%p1732_p12), 0  }
  0x2e LB: >> { %v243_v0 = vld [vmem:[%s2262_s13] sm:$0xff]  ;;  %v245_v1 = vld [vmem:[%s2262_s13 + $0x8] sm:$0xff]  ;;  %s319_s21 = sadd.s32 1, %s2266_s14  ;;  %v249_v3 = vld [vmem:[%s2262_s13 + $0x70] sm:$0xff]  ;;  %s237_s20 = sadd.s32 1, %s2270_s20   ;;  %s2270_s20 = sphi %s2482_s20, %s237_s20   ;;  %s2266_s14 = sphi %s2480_s14, %s3624_s14   ;;  %s2262_s13 = sphi %s3621_s13, %s3623_s13   ;;  %s2258_s12 = sphi %s3620_s12, %s3622_s12  }
  0x2f   : >> { %v247_v2 = vld [vmem:[%s2262_s13 + $0x68] sm:$0xff]  ;;  %244 = vst [vmem:[%s2258_s12] sm:$0xff] %v243_v0  ;;  %p320_p13 = scmp.ge.s32.totalorder %s319_s21, %s2471_s11  ;;  %v251_v4 = vld [vmem:[%s2262_s13 + $0xd0] sm:$0xff]  ;;  %v253_v5 = vld [vmem:[%s2262_s13 + $0xd8] sm:$0xff]  ;;  %p236_p0 = scmp.ge.s32.totalorder %s237_s20, %s2471_s11 }
  0x30   : >> { %246 = vst [vmem:[%s2258_s12 + $0x8] sm:$0xff] %v245_v1  ;;  %v255_v6 = vld [vmem:[%s2262_s13 + $0x138] sm:$0xff]  ;;  %v257_v7 = vld [vmem:[%s2262_s13 + $0x140] sm:$0xff]  ;;  %v261_v9 = vld [vmem:[%s2262_s13 + $0x1a8] sm:$0xff] }
  0x31   : >> { %248 = vst [vmem:[%s2258_s12 + $0x38] sm:$0xff] %v247_v2  ;;  %s3656_s21 = smov (%p320_p13, %s319_s21), 0  ;;  %v259_v8 = vld [vmem:[%s2262_s13 + $0x1a0] sm:$0xff]  ;;  %v263_v10 = vld [vmem:[%s2262_s13 + $0x208] sm:$0xff]  ;;  %v265_v11 = vld [vmem:[%s2262_s13 + $0x210] sm:$0xff] }
  0x32   : >> { %250 = vst [vmem:[%s2258_s12 + $0x40] sm:$0xff] %v249_v3  ;;  %s1733_s24 = sshll.u32 %s3656_s21, 4  ;;  %v267_v12 = vld [vmem:[%s2262_s13 + $0x270] sm:$0xff]  ;;  %v269_v13 = vld [vmem:[%s2262_s13 + $0x278] sm:$0xff]  ;;  %v273_v15 = vld [vmem:[%s2262_s13 + $0x2e0] sm:$0xff]  ;;  %s3624_s14 = smov %s3656_s21 }
  0x33   : >> { %252 = vst [vmem:[%s2258_s12 + $0x70] sm:$0xff] %v251_v4  ;;  %s2514_s25 = scalar_lea.vmem %s2456_s5, %s1733_s24   ;;  %s2517_s26 = scalar_lea.vmem %s2460_s8, %s1733_s24 [#allocation2]   ;;  %v271_v14 = vld [vmem:[%s2262_s13 + $0x2d8] sm:$0xff]  ;;  %v275_v16 = vld [vmem:[%s2262_s13 + $0x340] sm:$0xff]  ;;  %v277_v17 = vld [vmem:[%s2262_s13 + $0x348] sm:$0xff] }
  0x34   : >> { %254 = vst [vmem:[%s2258_s12 + $0x78] sm:$0xff] %v253_v5  ;;  %v279_v18 = vld [vmem:[%s2262_s13 + $0x3a8] sm:$0xff]  ;;  %v281_v19 = vld [vmem:[%s2262_s13 + $0x3b0] sm:$0xff]  ;;  %v285_v21 = vld [vmem:[%s2262_s13 + $0x418] sm:$0xff] }
  0x35   : >> { %256 = vst [vmem:[%s2258_s12 + $0xa8] sm:$0xff] %v255_v6  ;;  %v283_v20 = vld [vmem:[%s2262_s13 + $0x410] sm:$0xff]  ;;  %v287_v22 = vld [vmem:[%s2262_s13 + $0x478] sm:$0xff]  ;;  %v289_v23 = vld [vmem:[%s2262_s13 + $0x480] sm:$0xff] }
  0x36   : >> { %258 = vst [vmem:[%s2258_s12 + $0xb0] sm:$0xff] %v257_v7  ;;  %v291_v24 = vld [vmem:[%s2262_s13 + $0x4e0] sm:$0xff]  ;;  %v293_v25 = vld [vmem:[%s2262_s13 + $0x4e8] sm:$0xff]  ;;  %v297_v27 = vld [vmem:[%s2262_s13 + $0x550] sm:$0xff] }
  0x37   : >> { %260 = vst [vmem:[%s2258_s12 + $0xe0] sm:$0xff] %v259_v8  ;;  %v295_v26 = vld [vmem:[%s2262_s13 + $0x548] sm:$0xff]  ;;  %v299_v28 = vld [vmem:[%s2262_s13 + $0x5b0] sm:$0xff]  ;;  %v301_v29 = vld [vmem:[%s2262_s13 + $0x5b8] sm:$0xff] }
  0x38   : >> { %262 = vst [vmem:[%s2258_s12 + $0xe8] sm:$0xff] %v261_v9  ;;  %v303_v30 = vld [vmem:[%s2262_s13 + $0x618] sm:$0xff]  ;;  %v305_v31 = vld [vmem:[%s2262_s13 + $0x620] sm:$0xff]  ;;  %v309_v33 = vld [vmem:[%s2262_s13 + $0x688] sm:$0xff] }
  0x39   : >> { %264 = vst [vmem:[%s2258_s12 + $0x118] sm:$0xff] %v263_v10  ;;  %v307_v32 = vld [vmem:[%s2262_s13 + $0x680] sm:$0xff]  ;;  %v311_v34 = vld [vmem:[%s2262_s13 + $0x6e8] sm:$0xff]  ;;  %v313_v35 = vld [vmem:[%s2262_s13 + $0x6f0] sm:$0xff] }
  0x3a   : >> { %266 = vst [vmem:[%s2258_s12 + $0x120] sm:$0xff] %v265_v11  ;;  %v315_v36 = vld [vmem:[%s2262_s13 + $0x750] sm:$0xff]  ;;  %v317_v37 = vld [vmem:[%s2262_s13 + $0x758] sm:$0xff]  ;;  %s3623_s13 = smov %s2514_s25 }
  0x3b   : >> { %268 = vst [vmem:[%s2258_s12 + $0x150] sm:$0xff] %v267_v12 }
  0x3c   : >> { %270 = vst [vmem:[%s2258_s12 + $0x158] sm:$0xff] %v269_v13 }
  0x3d   : >> { %272 = vst [vmem:[%s2258_s12 + $0x188] sm:$0xff] %v271_v14 }
  0x3e   : >> { %274 = vst [vmem:[%s2258_s12 + $0x190] sm:$0xff] %v273_v15 }
  0x3f   : >> { %276 = vst [vmem:[%s2258_s12 + $0x1c0] sm:$0xff] %v275_v16 }
  0x40   : >> { %278 = vst [vmem:[%s2258_s12 + $0x1c8] sm:$0xff] %v277_v17 }
  0x41   : >> { %280 = vst [vmem:[%s2258_s12 + $0x1f8] sm:$0xff] %v279_v18 }
  0x42   : >> { %282 = vst [vmem:[%s2258_s12 + $0x200] sm:$0xff] %v281_v19 }
  0x43   : >> { %284 = vst [vmem:[%s2258_s12 + $0x230] sm:$0xff] %v283_v20 }
  0x44   : >> { %286 = vst [vmem:[%s2258_s12 + $0x238] sm:$0xff] %v285_v21 }
  0x45   : >> { %288 = vst [vmem:[%s2258_s12 + $0x268] sm:$0xff] %v287_v22 }
  0x46   : >> { %290 = vst [vmem:[%s2258_s12 + $0x270] sm:$0xff] %v289_v23 }
  0x47   : >> { %292 = vst [vmem:[%s2258_s12 + $0x2a0] sm:$0xff] %v291_v24 }
  0x48   : >> { %294 = vst [vmem:[%s2258_s12 + $0x2a8] sm:$0xff] %v293_v25 }
  0x49   : >> { %296 = vst [vmem:[%s2258_s12 + $0x2d8] sm:$0xff] %v295_v26 }
  0x4a   : >> { %298 = vst [vmem:[%s2258_s12 + $0x2e0] sm:$0xff] %v297_v27 }
  0x4b   : >> { %300 = vst [vmem:[%s2258_s12 + $0x310] sm:$0xff] %v299_v28 }
  0x4c   : >> { %302 = vst [vmem:[%s2258_s12 + $0x318] sm:$0xff] %v301_v29 }
  0x4d   : >> { %304 = vst [vmem:[%s2258_s12 + $0x348] sm:$0xff] %v303_v30 }
  0x4e   : >> { %306 = vst [vmem:[%s2258_s12 + $0x350] sm:$0xff] %v305_v31 }
  0x4f   : >> { %308 = vst [vmem:[%s2258_s12 + $0x380] sm:$0xff] %v307_v32 }
  0x50   : >> { %310 = vst [vmem:[%s2258_s12 + $0x388] sm:$0xff] %v309_v33  ;;  %239 = sbr.rel (!%p236_p0) target bundleno = 46 (0x2e), region = 239 }
  0x51   : >> { %312 = vst [vmem:[%s2258_s12 + $0x3b8] sm:$0xff] %v311_v34 }
  0x52   : >> { %314 = vst [vmem:[%s2258_s12 + $0x3c0] sm:$0xff] %v313_v35 }
  0x53   : >> { %316 = vst [vmem:[%s2258_s12 + $0x3f0] sm:$0xff] %v315_v36 }
  0x54   : >> { %318 = vst [vmem:[%s2258_s12 + $0x3f8] sm:$0xff] %v317_v37  ;;  %s3622_s12 = smov %s2517_s26 }
  0x55 PF: > { %s2595_s27 = sand.u32 1, %s232_s10   ;;  %s1805_s28 = sshll.u32 %s2471_s11, 4 }
  0x56   : > { %s2599_s29 = scalar_lea.vmem %s2456_s5, %s1805_s28   ;;  %s2602_s30 = scalar_lea.vmem %s2460_s8, %s1805_s28 [#allocation2]  }
  0x57   : > { %p1738_p1 = scmp.le.s32.totalorder %s2595_s27, 0 }
  0x58   : > { %s3625_s6 = smov (!%p1738_p1), %s2602_s30  ;;  %s3626_s12 = smov (!%p1738_p1), %s2599_s29 }
  0x59   : > { %1610 = sbr.rel (%p1738_p1) target bundleno = 114 (0x72), region = 244  ;;  %s2611_s13 = smov (!%p1738_p1), 0  }
  0x5a   : > { %s2613_s14 = smov (!%p1738_p1), 0  }
  0x5e LB: >> { %v342_v38 = vld [vmem:[%s2278_s12] sm:$0xff]  ;;  %v344_v39 = vld [vmem:[%s2278_s12 + $0x68] sm:$0xff]  ;;  %v346_v40 = vld [vmem:[%s2278_s12 + $0xd0] sm:$0xff]  ;;  %s380_s10 = sadd.s32 1, %s2282_s13  ;;  %s336_s14 = sadd.s32 1, %s2286_s14   ;;  %s2286_s14 = sphi %s2613_s14, %s336_s14   ;;  %s2282_s13 = sphi %s2611_s13, %s3629_s13   ;;  %s2278_s12 = sphi %s3626_s12, %s3628_s12   ;;  %s2274_s6 = sphi %s3625_s6, %s3627_s6  }
  0x5f   : >> { %343 = vst [vmem:[%s2274_s6] sm:$0xff] %v342_v38  ;;  %v348_v41 = vld [vmem:[%s2278_s12 + $0x138] sm:$0xff]  ;;  %p381_p2 = scmp.ge.s32.totalorder %s380_s10, %s2595_s27  ;;  %v350_v42 = vld [vmem:[%s2278_s12 + $0x1a0] sm:$0xff]  ;;  %v352_v43 = vld [vmem:[%s2278_s12 + $0x208] sm:$0xff]  ;;  %p335_p3 = scmp.ge.s32.totalorder %s336_s14, %s2595_s27 }
  0x60   : >> { %345 = vst [vmem:[%s2274_s6 + $0x38] sm:$0xff] %v344_v39  ;;  %v354_v44 = vld [vmem:[%s2278_s12 + $0x270] sm:$0xff]  ;;  %v356_v45 = vld [vmem:[%s2278_s12 + $0x2d8] sm:$0xff]  ;;  %v358_v46 = vld [vmem:[%s2278_s12 + $0x340] sm:$0xff] }
  0x61   : >> { %347 = vst [vmem:[%s2274_s6 + $0x70] sm:$0xff] %v346_v40  ;;  %s3658_s10 = smov (%p381_p2, %s380_s10), 0  ;;  %v360_v47 = vld [vmem:[%s2278_s12 + $0x3a8] sm:$0xff]  ;;  %v362_v48 = vld [vmem:[%s2278_s12 + $0x410] sm:$0xff]  ;;  %v364_v49 = vld [vmem:[%s2278_s12 + $0x478] sm:$0xff] }
  0x62   : >> { %349 = vst [vmem:[%s2274_s6 + $0xa8] sm:$0xff] %v348_v41  ;;  %s1739_s11 = sshll.u32 %s3658_s10, 3  ;;  %v366_v50 = vld [vmem:[%s2278_s12 + $0x4e0] sm:$0xff]  ;;  %v368_v51 = vld [vmem:[%s2278_s12 + $0x548] sm:$0xff]  ;;  %v370_v52 = vld [vmem:[%s2278_s12 + $0x5b0] sm:$0xff]  ;;  %s3629_s13 = smov %s3658_s10 }
  0x63   : >> { %351 = vst [vmem:[%s2274_s6 + $0xe0] sm:$0xff] %v350_v42  ;;  %s385_s20 = scalar_lea.vmem %s2599_s29, %s1739_s11   ;;  %s386_s21 = scalar_lea.vmem %s2602_s30, %s1739_s11 [#allocation2]   ;;  %v372_v53 = vld [vmem:[%s2278_s12 + $0x618] sm:$0xff]  ;;  %v374_v54 = vld [vmem:[%s2278_s12 + $0x680] sm:$0xff]  ;;  %v376_v55 = vld [vmem:[%s2278_s12 + $0x6e8] sm:$0xff] }
  0x64   : >> { %353 = vst [vmem:[%s2274_s6 + $0x118] sm:$0xff] %v352_v43  ;;  %v378_v56 = vld [vmem:[%s2278_s12 + $0x750] sm:$0xff]  ;;  %s3628_s12 = smov %s385_s20 }
  0x65   : >> { %355 = vst [vmem:[%s2274_s6 + $0x150] sm:$0xff] %v354_v44 }
  0x66   : >> { %357 = vst [vmem:[%s2274_s6 + $0x188] sm:$0xff] %v356_v45 }
  0x67   : >> { %359 = vst [vmem:[%s2274_s6 + $0x1c0] sm:$0xff] %v358_v46 }
  0x68   : >> { %361 = vst [vmem:[%s2274_s6 + $0x1f8] sm:$0xff] %v360_v47 }
  0x69   : >> { %363 = vst [vmem:[%s2274_s6 + $0x230] sm:$0xff] %v362_v48 }
  0x6a   : >> { %365 = vst [vmem:[%s2274_s6 + $0x268] sm:$0xff] %v364_v49 }
  0x6b   : >> { %367 = vst [vmem:[%s2274_s6 + $0x2a0] sm:$0xff] %v366_v50 }
  0x6c   : >> { %369 = vst [vmem:[%s2274_s6 + $0x2d8] sm:$0xff] %v368_v51 }
  0x6d   : >> { %371 = vst [vmem:[%s2274_s6 + $0x310] sm:$0xff] %v370_v52  ;;  %338 = sbr.rel (!%p335_p3) target bundleno = 94 (0x5e), region = 250 }
  0x6e   : >> { %373 = vst [vmem:[%s2274_s6 + $0x348] sm:$0xff] %v372_v53 }
  0x6f   : >> { %375 = vst [vmem:[%s2274_s6 + $0x380] sm:$0xff] %v374_v54 }
  0x70   : >> { %377 = vst [vmem:[%s2274_s6 + $0x3b8] sm:$0xff] %v376_v55 }
  0x71   : >> { %379 = vst [vmem:[%s2274_s6 + $0x3f0] sm:$0xff] %v378_v56  ;;  %s3627_s6 = smov %s386_s21 }
  0x72 PF: > { %389 = sbr.rel (%p228_p10) target bundleno = 215 (0xd7), region = 73  ;;  %s391_s24 = ssub.s32 (!%p228_p10), %s2458_s7, %s2464_s9 }
  0x73   : > { %s395_s25 = sshrl.u32 (!%p228_p10), %s2458_s7, 3  ;;  %s2686_s26 = scalar_lea.vmem (!%p228_p10), %s2456_s5, %s391_s24 }
  0x74   : > { %s2689_s28 = scalar_lea.vmem (!%p228_p10), %s2460_s8, %s391_s24 [#allocation2]  ;;  %s2693_s14 = sshrl.u32 (!%p228_p10), %s395_s25, 1 }
  0x75   : > { %p1741_p4 = scmp.le.s32.totalorder (!%p228_p10), %s2693_s14, 0 }
  0x77   : > { %1624 = sbr.rel (%p1741_p4) target bundleno = 163 (0xa3), region = 255  ;;  %s3630_s27 = smov (!%p1741_p4), %s2460_s8 }
  0x78   : > { %s3631_s29 = smov (!%p1741_p4), %s2456_s5  ;;  %s2702_s30 = smov (!%p1741_p4), 0  }
  0x79   : > { %s2704_s6 = smov (!%p1741_p4), 0  }
  0x7c LB: >> { %v406_v57 = vld [vmem:[%s2294_s29] sm:$0xff]  ;;  %v408_v58 = vld [vmem:[%s2294_s29 + $0x8] sm:$0xff]  ;;  %s482_s12 = sadd.s32 1, %s2298_s30  ;;  %v412_v60 = vld [vmem:[%s2294_s29 + $0x70] sm:$0xff]  ;;  %s400_s6 = sadd.s32 1, %s2302_s6   ;;  %s2302_s6 = sphi %s2704_s6, %s400_s6   ;;  %s2298_s30 = sphi %s2702_s30, %s3634_s30   ;;  %s2294_s29 = sphi %s3631_s29, %s3633_s29   ;;  %s2290_s27 = sphi %s3630_s27, %s3632_s27  }
  0x7d   : >> { %v410_v59 = vld [vmem:[%s2294_s29 + $0x68] sm:$0xff]  ;;  %407 = vst [vmem:[%s2290_s27] sm:$0xff] %v406_v57  ;;  %p483_p6 = scmp.ge.s32.totalorder %s482_s12, %s2693_s14  ;;  %v414_v61 = vld [vmem:[%s2294_s29 + $0xd0] sm:$0xff]  ;;  %v416_v62 = vld [vmem:[%s2294_s29 + $0xd8] sm:$0xff]  ;;  %p399_p7 = scmp.ge.s32.totalorder %s400_s6, %s2693_s14 }
  0x7e   : >> { %409 = vst [vmem:[%s2290_s27 + $0x8] sm:$0xff] %v408_v58  ;;  %v418_v63 = vld [vmem:[%s2294_s29 + $0x138] sm:$0xff]  ;;  %v420_v0 = vld [vmem:[%s2294_s29 + $0x140] sm:$0xff]  ;;  %v424_v2 = vld [vmem:[%s2294_s29 + $0x1a8] sm:$0xff] }
  0x7f   : >> { %411 = vst [vmem:[%s2290_s27 + $0x38] sm:$0xff] %v410_v59  ;;  %s3660_s12 = smov (%p483_p6, %s482_s12), 0  ;;  %v422_v1 = vld [vmem:[%s2294_s29 + $0x1a0] sm:$0xff]  ;;  %v426_v3 = vld [vmem:[%s2294_s29 + $0x208] sm:$0xff]  ;;  %v428_v4 = vld [vmem:[%s2294_s29 + $0x210] sm:$0xff] }
  0x80   : >> { %413 = vst [vmem:[%s2290_s27 + $0x40] sm:$0xff] %v412_v60  ;;  %s1742_s13 = sshll.u32 %s3660_s12, 4  ;;  %v430_v5 = vld [vmem:[%s2294_s29 + $0x270] sm:$0xff]  ;;  %v432_v6 = vld [vmem:[%s2294_s29 + $0x278] sm:$0xff]  ;;  %v436_v8 = vld [vmem:[%s2294_s29 + $0x2e0] sm:$0xff]  ;;  %s3634_s30 = smov %s3660_s12 }
  0x81   : >> { %415 = vst [vmem:[%s2290_s27 + $0x70] sm:$0xff] %v414_v61  ;;  %s2736_s10 = scalar_lea.vmem %s2456_s5, %s1742_s13   ;;  %s2739_s11 = scalar_lea.vmem %s2460_s8, %s1742_s13 [#allocation2]   ;;  %v434_v7 = vld [vmem:[%s2294_s29 + $0x2d8] sm:$0xff]  ;;  %v438_v9 = vld [vmem:[%s2294_s29 + $0x340] sm:$0xff]  ;;  %v440_v10 = vld [vmem:[%s2294_s29 + $0x348] sm:$0xff] }
  0x82   : >> { %417 = vst [vmem:[%s2290_s27 + $0x78] sm:$0xff] %v416_v62  ;;  %v442_v11 = vld [vmem:[%s2294_s29 + $0x3a8] sm:$0xff]  ;;  %v444_v12 = vld [vmem:[%s2294_s29 + $0x3b0] sm:$0xff]  ;;  %v448_v14 = vld [vmem:[%s2294_s29 + $0x418] sm:$0xff] }
  0x83   : >> { %419 = vst [vmem:[%s2290_s27 + $0xa8] sm:$0xff] %v418_v63  ;;  %v446_v13 = vld [vmem:[%s2294_s29 + $0x410] sm:$0xff]  ;;  %v450_v15 = vld [vmem:[%s2294_s29 + $0x478] sm:$0xff]  ;;  %v452_v16 = vld [vmem:[%s2294_s29 + $0x480] sm:$0xff] }
  0x84   : >> { %421 = vst [vmem:[%s2290_s27 + $0xb0] sm:$0xff] %v420_v0  ;;  %v454_v17 = vld [vmem:[%s2294_s29 + $0x4e0] sm:$0xff]  ;;  %v456_v18 = vld [vmem:[%s2294_s29 + $0x4e8] sm:$0xff]  ;;  %v460_v20 = vld [vmem:[%s2294_s29 + $0x550] sm:$0xff] }
  0x85   : >> { %423 = vst [vmem:[%s2290_s27 + $0xe0] sm:$0xff] %v422_v1  ;;  %v458_v19 = vld [vmem:[%s2294_s29 + $0x548] sm:$0xff]  ;;  %v462_v21 = vld [vmem:[%s2294_s29 + $0x5b0] sm:$0xff]  ;;  %v464_v22 = vld [vmem:[%s2294_s29 + $0x5b8] sm:$0xff] }
  0x86   : >> { %425 = vst [vmem:[%s2290_s27 + $0xe8] sm:$0xff] %v424_v2  ;;  %v466_v23 = vld [vmem:[%s2294_s29 + $0x618] sm:$0xff]  ;;  %v468_v24 = vld [vmem:[%s2294_s29 + $0x620] sm:$0xff]  ;;  %v472_v26 = vld [vmem:[%s2294_s29 + $0x688] sm:$0xff] }
  0x87   : >> { %427 = vst [vmem:[%s2290_s27 + $0x118] sm:$0xff] %v426_v3  ;;  %v470_v25 = vld [vmem:[%s2294_s29 + $0x680] sm:$0xff]  ;;  %v474_v27 = vld [vmem:[%s2294_s29 + $0x6e8] sm:$0xff]  ;;  %v476_v28 = vld [vmem:[%s2294_s29 + $0x6f0] sm:$0xff] }
  0x88   : >> { %429 = vst [vmem:[%s2290_s27 + $0x120] sm:$0xff] %v428_v4  ;;  %v478_v29 = vld [vmem:[%s2294_s29 + $0x750] sm:$0xff]  ;;  %v480_v30 = vld [vmem:[%s2294_s29 + $0x758] sm:$0xff]  ;;  %s3633_s29 = smov %s2736_s10 }
  0x89   : >> { %431 = vst [vmem:[%s2290_s27 + $0x150] sm:$0xff] %v430_v5 }
  0x8a   : >> { %433 = vst [vmem:[%s2290_s27 + $0x158] sm:$0xff] %v432_v6 }
  0x8b   : >> { %435 = vst [vmem:[%s2290_s27 + $0x188] sm:$0xff] %v434_v7 }
  0x8c   : >> { %437 = vst [vmem:[%s2290_s27 + $0x190] sm:$0xff] %v436_v8 }
  0x8d   : >> { %439 = vst [vmem:[%s2290_s27 + $0x1c0] sm:$0xff] %v438_v9 }
  0x8e   : >> { %441 = vst [vmem:[%s2290_s27 + $0x1c8] sm:$0xff] %v440_v10 }
  0x8f   : >> { %443 = vst [vmem:[%s2290_s27 + $0x1f8] sm:$0xff] %v442_v11 }
  0x90   : >> { %445 = vst [vmem:[%s2290_s27 + $0x200] sm:$0xff] %v444_v12 }
  0x91   : >> { %447 = vst [vmem:[%s2290_s27 + $0x230] sm:$0xff] %v446_v13 }
  0x92   : >> { %449 = vst [vmem:[%s2290_s27 + $0x238] sm:$0xff] %v448_v14 }
  0x93   : >> { %451 = vst [vmem:[%s2290_s27 + $0x268] sm:$0xff] %v450_v15 }
  0x94   : >> { %453 = vst [vmem:[%s2290_s27 + $0x270] sm:$0xff] %v452_v16 }
  0x95   : >> { %455 = vst [vmem:[%s2290_s27 + $0x2a0] sm:$0xff] %v454_v17 }
  0x96   : >> { %457 = vst [vmem:[%s2290_s27 + $0x2a8] sm:$0xff] %v456_v18 }
  0x97   : >> { %459 = vst [vmem:[%s2290_s27 + $0x2d8] sm:$0xff] %v458_v19 }
  0x98   : >> { %461 = vst [vmem:[%s2290_s27 + $0x2e0] sm:$0xff] %v460_v20 }
  0x99   : >> { %463 = vst [vmem:[%s2290_s27 + $0x310] sm:$0xff] %v462_v21 }
  0x9a   : >> { %465 = vst [vmem:[%s2290_s27 + $0x318] sm:$0xff] %v464_v22 }
  0x9b   : >> { %467 = vst [vmem:[%s2290_s27 + $0x348] sm:$0xff] %v466_v23 }
  0x9c   : >> { %469 = vst [vmem:[%s2290_s27 + $0x350] sm:$0xff] %v468_v24 }
  0x9d   : >> { %471 = vst [vmem:[%s2290_s27 + $0x380] sm:$0xff] %v470_v25 }
  0x9e   : >> { %473 = vst [vmem:[%s2290_s27 + $0x388] sm:$0xff] %v472_v26  ;;  %402 = sbr.rel (!%p399_p7) target bundleno = 124 (0x7c), region = 261 }
  0x9f   : >> { %475 = vst [vmem:[%s2290_s27 + $0x3b8] sm:$0xff] %v474_v27 }
  0xa0   : >> { %477 = vst [vmem:[%s2290_s27 + $0x3c0] sm:$0xff] %v476_v28 }
  0xa1   : >> { %479 = vst [vmem:[%s2290_s27 + $0x3f0] sm:$0xff] %v478_v29 }
  0xa2   : >> { %481 = vst [vmem:[%s2290_s27 + $0x3f8] sm:$0xff] %v480_v30  ;;  %s3632_s27 = smov %s2739_s11 }
  0xa3 PF: > { %s2817_s20 = sand.u32 1, %s395_s25   ;;  %s1807_s21 = sshll.u32 %s2693_s14, 4 }
  0xa4   : > { %s2821_s24 = scalar_lea.vmem %s2456_s5, %s1807_s21   ;;  %s2824_s13 = scalar_lea.vmem %s2460_s8, %s1807_s21 [#allocation2]  }
  0xa5   : > { %p1747_p8 = scmp.le.s32.totalorder %s2817_s20, 0 }
  0xa6   : > { %s3635_s6 = smov (!%p1747_p8), %s2824_s13  ;;  %s3636_s27 = smov (!%p1747_p8), %s2821_s24 }
  0xa7   : > { %1638 = sbr.rel (%p1747_p8) target bundleno = 192 (0xc0), region = 266  ;;  %s2833_s29 = smov (!%p1747_p8), 0  }
  0xa8   : > { %s2835_s30 = smov (!%p1747_p8), 0  }
  0xac LB: >> { %v505_v31 = vld [vmem:[%s2310_s27] sm:$0xff]  ;;  %v507_v32 = vld [vmem:[%s2310_s27 + $0x68] sm:$0xff]  ;;  %v509_v33 = vld [vmem:[%s2310_s27 + $0xd0] sm:$0xff]  ;;  %s543_s25 = sadd.s32 1, %s2314_s29  ;;  %s499_s30 = sadd.s32 1, %s2318_s30   ;;  %s2318_s30 = sphi %s2835_s30, %s499_s30   ;;  %s2314_s29 = sphi %s2833_s29, %s3639_s29   ;;  %s2310_s27 = sphi %s3636_s27, %s3638_s27   ;;  %s2306_s6 = sphi %s3635_s6, %s3637_s6  }
  0xad   : >> { %506 = vst [vmem:[%s2306_s6] sm:$0xff] %v505_v31  ;;  %v511_v34 = vld [vmem:[%s2310_s27 + $0x138] sm:$0xff]  ;;  %p544_p9 = scmp.ge.s32.totalorder %s543_s25, %s2817_s20  ;;  %v513_v35 = vld [vmem:[%s2310_s27 + $0x1a0] sm:$0xff]  ;;  %v515_v36 = vld [vmem:[%s2310_s27 + $0x208] sm:$0xff]  ;;  %p498_p10 = scmp.ge.s32.totalorder %s499_s30, %s2817_s20 }
  0xae   : >> { %508 = vst [vmem:[%s2306_s6 + $0x38] sm:$0xff] %v507_v32  ;;  %v517_v37 = vld [vmem:[%s2310_s27 + $0x270] sm:$0xff]  ;;  %v519_v38 = vld [vmem:[%s2310_s27 + $0x2d8] sm:$0xff]  ;;  %v521_v39 = vld [vmem:[%s2310_s27 + $0x340] sm:$0xff] }
  0xaf   : >> { %510 = vst [vmem:[%s2306_s6 + $0x70] sm:$0xff] %v509_v33  ;;  %s3662_s25 = smov (%p544_p9, %s543_s25), 0  ;;  %v523_v40 = vld [vmem:[%s2310_s27 + $0x3a8] sm:$0xff]  ;;  %v525_v41 = vld [vmem:[%s2310_s27 + $0x410] sm:$0xff]  ;;  %v527_v42 = vld [vmem:[%s2310_s27 + $0x478] sm:$0xff] }
  0xb0   : >> { %512 = vst [vmem:[%s2306_s6 + $0xa8] sm:$0xff] %v511_v34  ;;  %s1748_s14 = sshll.u32 %s3662_s25, 3  ;;  %v529_v43 = vld [vmem:[%s2310_s27 + $0x4e0] sm:$0xff]  ;;  %v531_v44 = vld [vmem:[%s2310_s27 + $0x548] sm:$0xff]  ;;  %v533_v45 = vld [vmem:[%s2310_s27 + $0x5b0] sm:$0xff]  ;;  %s3639_s29 = smov %s3662_s25 }
  0xb1   : >> { %514 = vst [vmem:[%s2306_s6 + $0xe0] sm:$0xff] %v513_v35  ;;  %s548_s12 = scalar_lea.vmem %s2821_s24, %s1748_s14   ;;  %s549_s10 = scalar_lea.vmem %s2824_s13, %s1748_s14 [#allocation2]   ;;  %v535_v46 = vld [vmem:[%s2310_s27 + $0x618] sm:$0xff]  ;;  %v537_v47 = vld [vmem:[%s2310_s27 + $0x680] sm:$0xff]  ;;  %v539_v48 = vld [vmem:[%s2310_s27 + $0x6e8] sm:$0xff] }
  0xb2   : >> { %516 = vst [vmem:[%s2306_s6 + $0x118] sm:$0xff] %v515_v36  ;;  %v541_v49 = vld [vmem:[%s2310_s27 + $0x750] sm:$0xff]  ;;  %s3638_s27 = smov %s548_s12 }
  0xb3   : >> { %518 = vst [vmem:[%s2306_s6 + $0x150] sm:$0xff] %v517_v37 }
  0xb4   : >> { %520 = vst [vmem:[%s2306_s6 + $0x188] sm:$0xff] %v519_v38 }
  0xb5   : >> { %522 = vst [vmem:[%s2306_s6 + $0x1c0] sm:$0xff] %v521_v39 }
  0xb6   : >> { %524 = vst [vmem:[%s2306_s6 + $0x1f8] sm:$0xff] %v523_v40 }
  0xb7   : >> { %526 = vst [vmem:[%s2306_s6 + $0x230] sm:$0xff] %v525_v41 }
  0xb8   : >> { %528 = vst [vmem:[%s2306_s6 + $0x268] sm:$0xff] %v527_v42 }
  0xb9   : >> { %530 = vst [vmem:[%s2306_s6 + $0x2a0] sm:$0xff] %v529_v43 }
  0xba   : >> { %532 = vst [vmem:[%s2306_s6 + $0x2d8] sm:$0xff] %v531_v44 }
  0xbb   : >> { %534 = vst [vmem:[%s2306_s6 + $0x310] sm:$0xff] %v533_v45  ;;  %501 = sbr.rel (!%p498_p10) target bundleno = 172 (0xac), region = 272 }
  0xbc   : >> { %536 = vst [vmem:[%s2306_s6 + $0x348] sm:$0xff] %v535_v46 }
  0xbd   : >> { %538 = vst [vmem:[%s2306_s6 + $0x380] sm:$0xff] %v537_v47 }
  0xbe   : >> { %540 = vst [vmem:[%s2306_s6 + $0x3b8] sm:$0xff] %v539_v48 }
  0xbf   : >> { %542 = vst [vmem:[%s2306_s6 + $0x3f0] sm:$0xff] %v541_v49  ;;  %s3637_s6 = smov %s549_s10 }
  0xc0 PF: > { %s2384_s11 = smov 1  }
  0xc1   : > { %s550_s21 = sshll.u32 %s2384_s11, %s2464_s9 }
  0xc2   : > { %s2903_s30 = sadd.s32 4294967295, %s550_s21 }
  0xc3   : > { %v560_v50 = vld [vmem:[%s2686_s26] sm:%s2903_s30]  ;;  %v562_v51 = vld [vmem:[%s2686_s26 + $0x68] sm:%s2903_s30] }
  0xc4   : > { %561 = vst [vmem:[%s2689_s28] sm:%s2903_s30] %v560_v50  ;;  %v564_v52 = vld [vmem:[%s2686_s26 + $0xd0] sm:%s2903_s30] }
  0xc5   : > { %563 = vst [vmem:[%s2689_s28 + $0x38] sm:%s2903_s30] %v562_v51  ;;  %v566_v53 = vld [vmem:[%s2686_s26 + $0x138] sm:%s2903_s30] }
  0xc6   : > { %565 = vst [vmem:[%s2689_s28 + $0x70] sm:%s2903_s30] %v564_v52  ;;  %v568_v54 = vld [vmem:[%s2686_s26 + $0x1a0] sm:%s2903_s30] }
  0xc7   : > { %567 = vst [vmem:[%s2689_s28 + $0xa8] sm:%s2903_s30] %v566_v53  ;;  %v570_v55 = vld [vmem:[%s2686_s26 + $0x208] sm:%s2903_s30] }
  0xc8   : > { %569 = vst [vmem:[%s2689_s28 + $0xe0] sm:%s2903_s30] %v568_v54  ;;  %v572_v56 = vld [vmem:[%s2686_s26 + $0x270] sm:%s2903_s30] }
  0xc9   : > { %571 = vst [vmem:[%s2689_s28 + $0x118] sm:%s2903_s30] %v570_v55  ;;  %v574_v57 = vld [vmem:[%s2686_s26 + $0x2d8] sm:%s2903_s30] }
  0xca   : > { %573 = vst [vmem:[%s2689_s28 + $0x150] sm:%s2903_s30] %v572_v56  ;;  %v576_v58 = vld [vmem:[%s2686_s26 + $0x340] sm:%s2903_s30] }
  0xcb   : > { %575 = vst [vmem:[%s2689_s28 + $0x188] sm:%s2903_s30] %v574_v57  ;;  %v578_v59 = vld [vmem:[%s2686_s26 + $0x3a8] sm:%s2903_s30] }
  0xcc   : > { %577 = vst [vmem:[%s2689_s28 + $0x1c0] sm:%s2903_s30] %v576_v58  ;;  %v580_v60 = vld [vmem:[%s2686_s26 + $0x410] sm:%s2903_s30] }
  0xcd   : > { %579 = vst [vmem:[%s2689_s28 + $0x1f8] sm:%s2903_s30] %v578_v59  ;;  %v582_v61 = vld [vmem:[%s2686_s26 + $0x478] sm:%s2903_s30] }
  0xce   : > { %581 = vst [vmem:[%s2689_s28 + $0x230] sm:%s2903_s30] %v580_v60  ;;  %v584_v62 = vld [vmem:[%s2686_s26 + $0x4e0] sm:%s2903_s30] }
  0xcf   : > { %583 = vst [vmem:[%s2689_s28 + $0x268] sm:%s2903_s30] %v582_v61  ;;  %v586_v63 = vld [vmem:[%s2686_s26 + $0x548] sm:%s2903_s30] }
  0xd0   : > { %585 = vst [vmem:[%s2689_s28 + $0x2a0] sm:%s2903_s30] %v584_v62  ;;  %v588_v0 = vld [vmem:[%s2686_s26 + $0x5b0] sm:%s2903_s30] }
  0xd1   : > { %587 = vst [vmem:[%s2689_s28 + $0x2d8] sm:%s2903_s30] %v586_v63  ;;  %v590_v1 = vld [vmem:[%s2686_s26 + $0x618] sm:%s2903_s30] }
  0xd2   : > { %589 = vst [vmem:[%s2689_s28 + $0x310] sm:%s2903_s30] %v588_v0  ;;  %v592_v2 = vld [vmem:[%s2686_s26 + $0x680] sm:%s2903_s30] }
  0xd3   : > { %591 = vst [vmem:[%s2689_s28 + $0x348] sm:%s2903_s30] %v590_v1  ;;  %v594_v3 = vld [vmem:[%s2686_s26 + $0x6e8] sm:%s2903_s30] }
  0xd4   : > { %593 = vst [vmem:[%s2689_s28 + $0x380] sm:%s2903_s30] %v592_v2  ;;  %v596_v4 = vld [vmem:[%s2686_s26 + $0x750] sm:%s2903_s30] }
  0xd5   : > { %595 = vst [vmem:[%s2689_s28 + $0x3b8] sm:%s2903_s30] %v594_v3 }
  0xd6   : > { %597 = vst [vmem:[%s2689_s28 + $0x3f0] sm:%s2903_s30] %v596_v4 }
  0xd7 PF: > { %p1751_p11 = scmp.ge.u32.totalorder %s2458_s7, 8 }
  0xd8   : > { %s2385_s9 = smov (!%p1751_p11), 1  }
  0xd9   : > { %178 = sbr.rel (%p1751_p11) target bundleno = 242 (0xf2), region = 44  ;;  %s179_s26 = sshll.u32 (!%p1751_p11), %s2385_s9, %s2458_s7 }
  0xda   : > { %s2983_s28 = sadd.s32 (!%p1751_p11), 4294967295, %s179_s26 }
  0xde   : > { %v189_v5 = vld [vmem:[%s2456_s5] sm:%s2983_s28]  ;;  %v191_v6 = vld [vmem:[%s2456_s5 + $0x68] sm:%s2983_s28] }
  0xdf   : > { %190 = vst [vmem:[%s2460_s8] sm:%s2983_s28] %v189_v5  ;;  %v193_v7 = vld [vmem:[%s2456_s5 + $0xd0] sm:%s2983_s28] }
  0xe0   : > { %192 = vst [vmem:[%s2460_s8 + $0x38] sm:%s2983_s28] %v191_v6  ;;  %v195_v8 = vld [vmem:[%s2456_s5 + $0x138] sm:%s2983_s28] }
  0xe1   : > { %194 = vst [vmem:[%s2460_s8 + $0x70] sm:%s2983_s28] %v193_v7  ;;  %v197_v9 = vld [vmem:[%s2456_s5 + $0x1a0] sm:%s2983_s28] }
  0xe2   : > { %196 = vst [vmem:[%s2460_s8 + $0xa8] sm:%s2983_s28] %v195_v8  ;;  %v199_v10 = vld [vmem:[%s2456_s5 + $0x208] sm:%s2983_s28] }
  0xe3   : > { %198 = vst [vmem:[%s2460_s8 + $0xe0] sm:%s2983_s28] %v197_v9  ;;  %v201_v11 = vld [vmem:[%s2456_s5 + $0x270] sm:%s2983_s28] }
  0xe4   : > { %200 = vst [vmem:[%s2460_s8 + $0x118] sm:%s2983_s28] %v199_v10  ;;  %v203_v12 = vld [vmem:[%s2456_s5 + $0x2d8] sm:%s2983_s28] }
  0xe5   : > { %202 = vst [vmem:[%s2460_s8 + $0x150] sm:%s2983_s28] %v201_v11  ;;  %v205_v13 = vld [vmem:[%s2456_s5 + $0x340] sm:%s2983_s28] }
  0xe6   : > { %204 = vst [vmem:[%s2460_s8 + $0x188] sm:%s2983_s28] %v203_v12  ;;  %v207_v14 = vld [vmem:[%s2456_s5 + $0x3a8] sm:%s2983_s28] }
  0xe7   : > { %206 = vst [vmem:[%s2460_s8 + $0x1c0] sm:%s2983_s28] %v205_v13  ;;  %v209_v15 = vld [vmem:[%s2456_s5 + $0x410] sm:%s2983_s28] }
  0xe8   : > { %208 = vst [vmem:[%s2460_s8 + $0x1f8] sm:%s2983_s28] %v207_v14  ;;  %v211_v16 = vld [vmem:[%s2456_s5 + $0x478] sm:%s2983_s28] }
  0xe9   : > { %210 = vst [vmem:[%s2460_s8 + $0x230] sm:%s2983_s28] %v209_v15  ;;  %v213_v17 = vld [vmem:[%s2456_s5 + $0x4e0] sm:%s2983_s28] }
  0xea   : > { %212 = vst [vmem:[%s2460_s8 + $0x268] sm:%s2983_s28] %v211_v16  ;;  %v215_v18 = vld [vmem:[%s2456_s5 + $0x548] sm:%s2983_s28] }
  0xeb   : > { %214 = vst [vmem:[%s2460_s8 + $0x2a0] sm:%s2983_s28] %v213_v17  ;;  %v217_v19 = vld [vmem:[%s2456_s5 + $0x5b0] sm:%s2983_s28] }
  0xec   : > { %216 = vst [vmem:[%s2460_s8 + $0x2d8] sm:%s2983_s28] %v215_v18  ;;  %v219_v20 = vld [vmem:[%s2456_s5 + $0x618] sm:%s2983_s28] }
  0xed   : > { %218 = vst [vmem:[%s2460_s8 + $0x310] sm:%s2983_s28] %v217_v19  ;;  %v221_v21 = vld [vmem:[%s2456_s5 + $0x680] sm:%s2983_s28] }
  0xee   : > { %220 = vst [vmem:[%s2460_s8 + $0x348] sm:%s2983_s28] %v219_v20  ;;  %v223_v22 = vld [vmem:[%s2456_s5 + $0x6e8] sm:%s2983_s28] }
  0xef   : > { %222 = vst [vmem:[%s2460_s8 + $0x380] sm:%s2983_s28] %v221_v21  ;;  %v225_v23 = vld [vmem:[%s2456_s5 + $0x750] sm:%s2983_s28] }
  0xf0   : > { %224 = vst [vmem:[%s2460_s8 + $0x3b8] sm:%s2983_s28] %v223_v22 }
  0xf1   : > { %226 = vst [vmem:[%s2460_s8 + $0x3f0] sm:%s2983_s28] %v225_v23 }
  0xf2 PF: > { %p1753_p12 = scmp.ge.s32.totalorder %s2254_s17, 1  ;;  %p600_p13 = scmp.lt.s32.totalorder %s2254_s17, 3 }
  0xf4   : > { %p601_p0 = pnand %p1753_p12, %p600_p13 }
  0xf5   : > { %s607_s7 = sand.u32 (!%p601_p0), 1, %s2246_s15  }
  0xf6   : > { %604 = sbr.rel (%p601_p0) target bundleno = 628 (0x274), region = 98 }
  0xf7   : > { %s1815_s20 = smul.u32 (!%p601_p0), 1064, %s607_s7 }
  0xf8   : > { %s1816_s28 = smul.u32 (!%p601_p0), 112, %s607_s7 }
  0xf9   : > { %s3066_s24 = scalar_lea.vmem (!%p601_p0), [#allocation2], %s1815_s20 }
  0xfa   : > { %s3292_s20 = scalar_lea.vmem (!%p601_p0), [#allocation3], %s1816_s28  }
  0xfb   : > { %vm785_vm0 = vcmask 1042432   ;;  %v747_v24 = vld [vmem:[%s3066_s24 + $0x350] sm:$0xff]  ;;  %v740_v25 = vld [vmem:[%s3066_s24 + $0x318] sm:$0xff]  ;;  %v746_v26 = vld [vmem:[%s3066_s24 + $0x348] sm:$0xff]  ;;  %vm778_vm1 = vcmask 154624   ;;  %s1216_s15 = smul.u32 (%p2445_p5), 7, %s2430_s18 }
  0xfc   : > { %853 = vmatpush.msra.mxu2 %v747_v24  ;;  %v768_v27 = vld [vmem:[%s3066_s24 + $0x3f8] sm:$0x7]  ;;  %v733_v28 = vld [vmem:[%s3066_s24 + $0x2e0] sm:$0xff]  ;;  %807 = vmatpush.msra.mxu0 %v746_v26  ;;  %v739_v29 = vld [vmem:[%s3066_s24 + $0x310] sm:$0xff]  ;;  %s1809_s7 = smul.u32 (%p2445_p5), 56, %s2430_s18 }
  0xfd   : > { %1757 = vmatpush.msk.msra.mxu3 %vm785_vm0, %v768_v27  ;;  %v767_v30 = vld [vmem:[%s3066_s24 + $0x3f0] sm:$0x7]  ;;  %v761_v31 = vld [vmem:[%s3066_s24 + $0x3c0] sm:$0xff]  ;;  %v732_v32 = vld [vmem:[%s3066_s24 + $0x2d8] sm:$0xff] }
  0xfe   : > { %854 = vmatpush.msra.mxu2 %v740_v25  ;;  %1754 = vmatpush.msk.msra.mxu1 %vm785_vm0, %v767_v30  ;;  %v760_v33 = vld [vmem:[%s3066_s24 + $0x3b8] sm:$0xff]  ;;  %v726_v34 = vld [vmem:[%s3066_s24 + $0x2a8] sm:$0xff]  ;;  %v725_v36 = vld [vmem:[%s3066_s24 + $0x2a0] sm:$0xff]  ;;  %s3343_s8 = scalar_lea.vmem (%p2445_p5), %s3618_s4, %s1809_s7  }
  0xff   : > { %808 = vmatpush.msra.mxu0 %v739_v29  ;;  %890 = vmatpush.msra.mxu3 %v761_v31  ;;  %v754_v35 = vld [vmem:[%s3066_s24 + $0x388] sm:$0xff]  ;;  %v769_v37 = vld [vmem:[%s3066_s24 + $0x400] sm:$0x7]  ;;  %v719_v39 = vld [vmem:[%s3066_s24 + $0x270] sm:$0xff] }
 0x100   : > { %855 = vmatpush.msra.mxu2 %v733_v28  ;;  %844 = vmatpush.msra.mxu1 %v760_v33  ;;  %v753_v38 = vld [vmem:[%s3066_s24 + $0x380] sm:$0xff]  ;;  %v748_v40 = vld [vmem:[%s3066_s24 + $0x358] sm:$0xff]  ;;  %v718_v41 = vld [vmem:[%s3066_s24 + $0x268] sm:$0xff] }
 0x101   : > { %809 = vmatpush.msra.mxu0 %v732_v32  ;;  %891 = vmatpush.msra.mxu3 %v754_v35  ;;  %v762_v42 = vld [vmem:[%s3066_s24 + $0x3c8] sm:$0xff]  ;;  %v712_v43 = vld [vmem:[%s3066_s24 + $0x238] sm:$0xff]  ;;  %v741_v44 = vld [vmem:[%s3066_s24 + $0x320] sm:$0xff] }
 0x102   : > { %856 = vmatpush.msra.mxu2 %v726_v34  ;;  %845 = vmatpush.msra.mxu1 %v753_v38  ;;  %v711_v45 = vld [vmem:[%s3066_s24 + $0x230] sm:$0xff]  ;;  %v705_v47 = vld [vmem:[%s3066_s24 + $0x200] sm:$0xff]  ;;  %v704_v50 = vld [vmem:[%s3066_s24 + $0x1f8] sm:$0xff] }
 0x103   : > { %1760 = vmatpush.msk.msrb.mxu3 %vm785_vm0, %v769_v37  ;;  %810 = vmatpush.msra.mxu0 %v725_v36  ;;  %v755_v46 = vld [vmem:[%s3066_s24 + $0x390] sm:$0xff]  ;;  %v3098_v48 = vld [vmem:[%s3615_s1 + $0x8] sm:$0xff]  ;;  %v684_v59 = vld [vmem:[%s3066_s24 + $0x158] sm:$0xff] }
 0x104   : > { %857 = vmatpush.msra.mxu2 %v719_v39  ;;  %899 = vmatpush.msrb.mxu1 %v748_v40  ;;  %v749_v49 = vld [vmem:[%s3066_s24 + $0x360] sm:$0xff]  ;;  %v698_v51 = vld [vmem:[%s3066_s24 + $0x1c8] sm:$0xff]  ;;  %v691_v55 = vld [vmem:[%s3066_s24 + $0x190] sm:$0xff] }
 0x105   : > { %811 = vmatpush.msra.mxu0 %v718_v41  ;;  %936 = vmatpush.msrb.mxu3 %v762_v42  ;;  %v734_v52 = vld [vmem:[%s3066_s24 + $0x2e8] sm:$0xff]  ;;  %v697_v54 = vld [vmem:[%s3066_s24 + $0x1c0] sm:$0xff]  ;;  %v727_v56 = vld [vmem:[%s3066_s24 + $0x2b0] sm:$0xff] }
 0x106   : > { %858 = vmatpush.msra.mxu2 %v712_v43  ;;  %900 = vmatpush.msrb.mxu1 %v741_v44  ;;  %v742_v53 = vld [vmem:[%s3066_s24 + $0x328] sm:$0xff]  ;;  %v735_v57 = vld [vmem:[%s3066_s24 + $0x2f0] sm:$0xff]  ;;  %v720_v60 = vld [vmem:[%s3066_s24 + $0x278] sm:$0xff] }
 0x107   : > { %812 = vmatpush.msra.mxu0 %v711_v45  ;;  %937 = vmatpush.msrb.mxu3 %v755_v46  ;;  %v690_v58 = vld [vmem:[%s3066_s24 + $0x188] sm:$0xff]  ;;  %v728_v61 = vld [vmem:[%s3066_s24 + $0x2b8] sm:$0xff]  ;;  %v683_v62 = vld [vmem:[%s3066_s24 + $0x150] sm:$0xff] }
 0x108   : > { %859 = vmatpush.msra.mxu2 %v705_v47  ;;  %1758 = vmatmul.msk.f32.vlgmr.msra.gmra.mxu3 %vm778_vm1, %v3098_v48  ;;  %v677_v63 = vld [vmem:[%s3066_s24 + $0x120] sm:$0xff]  ;;  %v676_v2 = vld [vmem:[%s3066_s24 + $0x118] sm:$0xff]  ;;  %v670_v3 = vld [vmem:[%s3066_s24 + $0xe8] sm:$0xff] }
 0x109   : > { %945 = vmatpush.msra.mxu3 %v749_v49  ;;  %813 = vmatpush.msra.mxu0 %v704_v50  ;;  %v713_v0 = vld [vmem:[%s3066_s24 + $0x240] sm:$0xff]  ;;  %v706_v4 = vld [vmem:[%s3066_s24 + $0x208] sm:$0xff]  ;;  %v663_v7 = vld [vmem:[%s3066_s24 + $0xb0] sm:$0xff] }
 0x10a   : > { %860 = vmatpush.msra.mxu2 %v698_v51  ;;  %901 = vmatpush.msrb.mxu1 %v734_v52  ;;  %v721_v1 = vld [vmem:[%s3066_s24 + $0x280] sm:$0xff]  ;;  %v714_v5 = vld [vmem:[%s3066_s24 + $0x248] sm:$0xff]  ;;  %v699_v8 = vld [vmem:[%s3066_s24 + $0x1d0] sm:$0xff] }
 0x10b   : > { %946 = vmatpush.msra.mxu3 %v742_v53  ;;  %814 = vmatpush.msra.mxu0 %v697_v54  ;;  %v669_v6 = vld [vmem:[%s3066_s24 + $0xe0] sm:$0xff]  ;;  %v707_v9 = vld [vmem:[%s3066_s24 + $0x210] sm:$0xff]  ;;  %v656_v10 = vld [vmem:[%s3066_s24 + $0x78] sm:$0xff]  ;;  %v2386_v53 = vmov 0  }
 0x10c   : > { %861 = vmatpush.msra.mxu2 %v691_v55  ;;  %902 = vmatpush.msrb.mxu1 %v727_v56  ;;  %v662_v11 = vld [vmem:[%s3066_s24 + $0xa8] sm:$0xff]  ;;  %v692_v12 = vld [vmem:[%s3066_s24 + $0x198] sm:$0xff]  ;;  %v649_v14 = vld [vmem:[%s3066_s24 + $0x40] sm:$0xff] }
 0x10d   : > { %947 = vmatpush.msra.mxu3 %v735_v57  ;;  %815 = vmatpush.msra.mxu0 %v690_v58  ;;  %v700_v13 = vld [vmem:[%s3066_s24 + $0x1d8] sm:$0xff]  ;;  %v655_v15 = vld [vmem:[%s3066_s24 + $0x70] sm:$0xff]  ;;  %v685_v16 = vld [vmem:[%s3066_s24 + $0x160] sm:$0xff] }
 0x10e   : > { %862 = vmatpush.msra.mxu2 %v684_v59  ;;  %903 = vmatpush.msrb.mxu1 %v720_v60  ;;  %v693_v17 = vld [vmem:[%s3066_s24 + $0x1a0] sm:$0xff]  ;;  %v642_v18 = vld [vmem:[%s3066_s24 + $0x8] sm:$0xff]  ;;  %v648_v19 = vld [vmem:[%s3066_s24 + $0x38] sm:$0xff] }
 0x10f   : > { %948 = vmatpush.msra.mxu3 %v728_v61  ;;  %816 = vmatpush.msra.mxu0 %v683_v62  ;;  %v3142_v20 = vld [vmem:[%s3615_s1] sm:$0xff]  ;;  %v678_v21 = vld [vmem:[%s3066_s24 + $0x128] sm:$0xff]  ;;  %v671_v25 = vld [vmem:[%s3066_s24 + $0xf0] sm:$0xff] }
 0x110   : > { %863 = vmatpush.msra.mxu2 %v677_v63  ;;  %904 = vmatpush.msrb.mxu1 %v713_v0  ;;  %v750_v22 = vld [vmem:[%s3066_s24 + $0x368] sm:$0xff]  ;;  %v641_v24 = vld [vmem:[%s3066_s24] sm:$0xff]  ;;  %v743_v26 = vld [vmem:[%s3066_s24 + $0x330] sm:$0xff] }
 0x111   : > { %949 = vmatpush.msra.mxu3 %v721_v1  ;;  %817 = vmatpush.msra.mxu0 %v676_v2  ;;  %v686_v23 = vld [vmem:[%s3066_s24 + $0x168] sm:$0xff]  ;;  %v3154_v27 = vld [vmem:[%s3615_s1 + $0x18] sm:$0xff]  ;;  %v729_v32 = vld [vmem:[%s3066_s24 + $0x2c0] sm:$0xff] }
 0x112   : > { %864 = vmatpush.msra.mxu2 %v670_v3  ;;  %905 = vmatpush.msrb.mxu1 %v706_v4  ;;  %v679_v28 = vld [vmem:[%s3066_s24 + $0x130] sm:$0xff]  ;;  %v736_v29 = vld [vmem:[%s3066_s24 + $0x2f8] sm:$0xff]  ;;  %v770_v31 = vld [vmem:[%s3066_s24 + $0x408] sm:$0x7] }
 0x113   : > { %950 = vmatpush.msra.mxu3 %v714_v5  ;;  %818 = vmatpush.msra.mxu0 %v669_v6  ;;  %v664_v30 = vld [vmem:[%s3066_s24 + $0xb8] sm:$0xff]  ;;  %v3168_v34 = vld [vmem:[%s3615_s1 + $0x10] sm:$0xff]  ;;  %v657_v35 = vld [vmem:[%s3066_s24 + $0x80] sm:$0xff] }
 0x114   : > { %865 = vmatpush.msra.mxu2 %v663_v7  ;;  %906 = vmatpush.msrb.mxu1 %v699_v8  ;;  %v672_v33 = vld [vmem:[%s3066_s24 + $0xf8] sm:$0xff]  ;;  %v722_v36 = vld [vmem:[%s3066_s24 + $0x288] sm:$0xff]  ;;  %v665_v37 = vld [vmem:[%s3066_s24 + $0xc0] sm:$0xff] }
 0x115   : > { %1755 = vmatmul.msk.f32.vlgmr.msra.gmra.mxu1 %vm778_vm1, %v3098_v48  ;;  %951 = vmatpush.msra.mxu3 %v707_v9  ;;  %v650_v38 = vld [vmem:[%s3066_s24 + $0x48] sm:$0xff]  ;;  %v763_v39 = vld [vmem:[%s3066_s24 + $0x3d0] sm:$0xff]  ;;  %v708_v43 = vld [vmem:[%s3066_s24 + $0x218] sm:$0xff] }
 0x116   : > { %866 = vmatpush.msra.mxu2 %v656_v10  ;;  %819 = vmatpush.msra.mxu0 %v662_v11  ;;  %v715_v40 = vld [vmem:[%s3066_s24 + $0x250] sm:$0xff]  ;;  %v658_v41 = vld [vmem:[%s3066_s24 + $0x88] sm:$0xff]  ;;  %v756_v45 = vld [vmem:[%s3066_s24 + $0x398] sm:$0xff] }
 0x117   : > { %907 = vmatpush.msrb.mxu1 %v692_v12  ;;  %952 = vmatpush.msra.mxu3 %v700_v13  ;;  %v643_v42 = vld [vmem:[%s3066_s24 + $0x10] sm:$0xff]  ;;  %v701_v46 = vld [vmem:[%s3066_s24 + $0x1e0] sm:$0xff]  ;;  %v644_v49 = vld [vmem:[%s3066_s24 + $0x18] sm:$0xff] }
 0x118   : > { %867 = vmatpush.msra.mxu2 %v649_v14  ;;  %820 = vmatpush.msra.mxu0 %v655_v15  ;;  %v651_v44 = vld [vmem:[%s3066_s24 + $0x50] sm:$0xff]  ;;  %v694_v50 = vld [vmem:[%s3066_s24 + $0x1a8] sm:$0xff]  ;;  %v744_v51 = vld [vmem:[%s3066_s24 + $0x338] sm:$0xff] }
 0x119   : > { %908 = vmatpush.msrb.mxu1 %v685_v16  ;;  %953 = vmatpush.msra.mxu3 %v693_v17  ;;  %v751_v47 = vld [vmem:[%s3066_s24 + $0x370] sm:$0xff]  ;;  %v752_v52 = vld [vmem:[%s3066_s24 + $0x378] sm:$0xff]  ;;  %v737_v56 = vld [vmem:[%s3066_s24 + $0x300] sm:$0xff] }
 0x11a   : > { %868 = vmatpush.msra.mxu2 %v642_v18  ;;  %821 = vmatpush.msra.mxu0 %v648_v19  ;;  %v1129_v54 = vld [vmem:[%s3616_s2] sm:$0xff]  ;;  %v687_v55 = vld [vmem:[%s3066_s24 + $0x170] sm:$0xff]  ;;  %v730_v60 = vld [vmem:[%s3066_s24 + $0x2c8] sm:$0xff] }
 0x11b   : > { %869 = vmatmul.f32.vlgmr.msra.gmra.mxu2 %v3142_v20  ;;  %909 = vmatpush.msrb.mxu1 %v678_v21  ;;  %v745_v57 = vld [vmem:[%s3066_s24 + $0x340] sm:$0xff]  ;;  %v680_v58 = vld [vmem:[%s3066_s24 + $0x138] sm:$0xff]  ;;  %v738_v61 = vld [vmem:[%s3066_s24 + $0x308] sm:$0xff] }
 0x11c   : > { %991 = vmatpush.msrb.mxu2 %v750_v22  ;;  %954 = vmatpush.msra.mxu3 %v686_v23  ;;  %v1155_v59 = vld [vmem:[%s3617_s3] sm:$0xff]  ;;  %v771_v62 = vld [vmem:[%s3066_s24 + $0x410] sm:$0x7]  ;;  %v666_v2 = vld [vmem:[%s3066_s24 + $0xc8] sm:$0xff] }
 0x11d   : > { %822 = vmatpush.msra.mxu0 %v641_v24  ;;  %910 = vmatpush.msrb.mxu1 %v671_v25  ;;  %v673_v63 = vld [vmem:[%s3066_s24 + $0x100] sm:$0xff]  ;;  %v723_v0 = vld [vmem:[%s3066_s24 + $0x290] sm:$0xff]  ;;  %v716_v3 = vld [vmem:[%s3066_s24 + $0x258] sm:$0xff] }
 0x11e   : > { %992 = vmatpush.msrb.mxu2 %v743_v26  ;;  %823 = vmatmul.f32.vlgmr.msra.gmra.mxu0 %v3142_v20  ;;  %v731_v1 = vld [vmem:[%s3066_s24 + $0x2d0] sm:$0xff]  ;;  %v724_v4 = vld [vmem:[%s3066_s24 + $0x298] sm:$0xff]  ;;  %v1130_v5 = vld [vmem:[%s3616_s2 + $0x8] sm:$0xff] }
 0x11f   : > { %1756 = vmatmul.msk.f32.gmra.mxu1 %vm778_vm1, %v3154_v27  ;;  %955 = vmatpush.msra.mxu3 %v679_v28  ;;  %v659_v6 = vld [vmem:[%s3066_s24 + $0x90] sm:$0xff]  ;;  %v764_v7 = vld [vmem:[%s3066_s24 + $0x3d8] sm:$0xff]  ;;  %v709_v8 = vld [vmem:[%s3066_s24 + $0x220] sm:$0xff] }
 0x120   : > { %993 = vmatpush.msrb.mxu2 %v736_v29  ;;  %911 = vmatpush.msrb.mxu1 %v664_v30  ;;  %v717_v9 = vld [vmem:[%s3066_s24 + $0x260] sm:$0xff]  ;;  %v652_v11 = vld [vmem:[%s3066_s24 + $0x58] sm:$0xff]  ;;  %v702_v13 = vld [vmem:[%s3066_s24 + $0x1e8] sm:$0xff] }
 0x121   : > { %1759 = vmatmul.msk.f32.gmra.mxu3 %vm778_vm1, %v3154_v27  ;;  %1763 = vmatpush.msk.msrb.mxu0 %vm785_vm0, %v770_v31  ;;  %v1156_v10 = vld [vmem:[%s3617_s3 + $0x8] sm:$0xff]  ;;  %v695_v16 = vld [vmem:[%s3066_s24 + $0x1b0] sm:$0xff]  ;;  %v688_v19 = vld [vmem:[%s3066_s24 + $0x178] sm:$0xff] }
 0x122   : > { %994 = vmatpush.msrb.mxu2 %v729_v32  ;;  %956 = vmatpush.msra.mxu3 %v672_v33  ;;  %v757_v12 = vld [vmem:[%s3066_s24 + $0x3a0] sm:$0xff]  ;;  %v710_v14 = vld [vmem:[%s3066_s24 + $0x228] sm:$0xff]  ;;  %v703_v17 = vld [vmem:[%s3066_s24 + $0x1f0] sm:$0xff] }
 0x123   : > { %872 = vmatmul.f32.gmra.mxu2 %v3168_v34  ;;  %912 = vmatpush.msrb.mxu1 %v657_v35  ;;  %v645_v15 = vld [vmem:[%s3066_s24 + $0x20] sm:$0xff]  ;;  %v696_v21 = vld [vmem:[%s3066_s24 + $0x1b8] sm:$0xff]  ;;  %v766_v23 = vld [vmem:[%s3066_s24 + $0x3e8] sm:$0xff] }
 0x124   : > { %995 = vmatpush.msrb.mxu2 %v722_v36  ;;  %957 = vmatpush.msra.mxu3 %v665_v37  ;;  %v773_v18 = vld [vmem:[%s3066_s24 + $0x420] sm:$0x7]  ;;  %v772_v22 = vld [vmem:[%s3066_s24 + $0x418] sm:$0x7]  ;;  %v759_v28 = vld [vmem:[%s3066_s24 + $0x3b0] sm:$0xff] }
 0x125   : > { %913 = vmatpush.msrb.mxu1 %v650_v38  ;;  %982 = vmatpush.msrb.mxu0 %v763_v39  ;;  %v681_v24 = vld [vmem:[%s3066_s24 + $0x140] sm:$0xff]  ;;  %v674_v29 = vld [vmem:[%s3066_s24 + $0x108] sm:$0xff]  ;;  %v667_v31 = vld [vmem:[%s3066_s24 + $0xd0] sm:$0xff] }
 0x126   : > { %996 = vmatpush.msrb.mxu2 %v715_v40  ;;  %958 = vmatpush.msra.mxu3 %v658_v41  ;;  %v689_v25 = vld [vmem:[%s3066_s24 + $0x180] sm:$0xff]  ;;  %v682_v30 = vld [vmem:[%s3066_s24 + $0x148] sm:$0xff]  ;;  %v675_v32 = vld [vmem:[%s3066_s24 + $0x110] sm:$0xff] }
 0x127   : > { %914 = vmatpush.msrb.mxu1 %v643_v42  ;;  %826 = vmatmul.f32.gmra.mxu0 %v3168_v34  ;;  %v765_v26 = vld [vmem:[%s3066_s24 + $0x3e0] sm:$0xff]  ;;  %v660_v33 = vld [vmem:[%s3066_s24 + $0x98] sm:$0xff]  ;;  %v758_v36 = vld [vmem:[%s3066_s24 + $0x3a8] sm:$0xff] }
 0x128   : > { %997 = vmatpush.msrb.mxu2 %v708_v43  ;;  %915 = vmatmul.f32.vlgmr.msrb.gmra.mxu1 %v3142_v20  ;;  %v668_v35 = vld [vmem:[%s3066_s24 + $0xd8] sm:$0xff]  ;;  %v653_v37 = vld [vmem:[%s3066_s24 + $0x60] sm:$0xff]  ;;  %v646_v39 = vld [vmem:[%s3066_s24 + $0x28] sm:$0xff] }
 0x129   : > { %959 = vmatpush.msra.mxu3 %v651_v44  ;;  %983 = vmatpush.msrb.mxu0 %v756_v45  ;;  %v661_v38 = vld [vmem:[%s3066_s24 + $0xa0] sm:$0xff]  ;;  %v654_v40 = vld [vmem:[%s3066_s24 + $0x68] sm:$0xff]  ;;  %v647_v41 = vld [vmem:[%s3066_s24 + $0x30] sm:$0xff]  ;;  %s1217_s24 = ssub.s32 (%p2445_p5), 13, %s1216_s15 }
 0x12a   : > { %998 = vmatpush.msrb.mxu2 %v701_v46  ;;  %1761 = vmatmul.msk.f32.vlgmr.msrb.gmra.mxu3 %vm778_vm1, %v3098_v48  ;;  %p1218_p1 = scmp.lt.s32.totalorder (%p2445_p5), %s1217_s24, 7 }
 0x12b   : > { %1037 = vmatpush.msra.mxu0 %v751_v47  ;;  %2102 = vset.pattern.permute.xlu0 %v2386_v53 }
 0x12c   : > { %960 = vmatpush.msra.mxu3 %v644_v49  ;;  %999 = vmatpush.msrb.mxu2 %v694_v50 }
 0x12d   : > { %1038 = vmatpush.msra.mxu0 %v744_v51  ;;  %1133 = vperm.xlu0 %2102, %v1129_v54  }
 0x12e   : > { %1083 = vmatpush.msrb.mxu3 %v752_v52  ;;  %1000 = vmatpush.msrb.mxu2 %v687_v55 }
 0x12f   : > { %1039 = vmatpush.msra.mxu0 %v737_v56  ;;  %2103 = vset.pattern.permute.xlu1 %v2386_v53 }
 0x130   : > { %1084 = vmatpush.msrb.mxu3 %v745_v57  ;;  %1001 = vmatpush.msrb.mxu2 %v680_v58 }
 0x131   : > { %1159 = vperm.xlu1 %2103, %v1155_v59   ;;  %1040 = vmatpush.msra.mxu0 %v730_v60 }
 0x132   : > { %1085 = vmatpush.msrb.mxu3 %v738_v61  ;;  %918 = vmatmul.f32.gmra.mxu1 %v3168_v34 }
 0x133   : > { %1766 = vmatpush.msk.msra.mxu1 %vm785_vm0, %v771_v62  ;;  %1002 = vmatpush.msrb.mxu2 %v673_v63 }
 0x134   : > { %1041 = vmatpush.msra.mxu0 %v723_v0  ;;  %1086 = vmatpush.msrb.mxu3 %v731_v1 }
 0x135   : > { %1762 = vmatmul.msk.f32.gmra.mxu3 %vm778_vm1, %v3154_v27  ;;  %1003 = vmatpush.msrb.mxu2 %v666_v2 }
 0x136   : > { %1042 = vmatpush.msra.mxu0 %v716_v3  ;;  %1087 = vmatpush.msrb.mxu3 %v724_v4 }
 0x137   : > { %1138 = vperm.xlu0 %2102, %v1130_v5   ;;  %1004 = vmatpush.msrb.mxu2 %v659_v6 }
 0x138   : > { %1028 = vmatpush.msra.mxu1 %v764_v7  ;;  %1043 = vmatpush.msra.mxu0 %v709_v8 }
 0x139   : > { %1088 = vmatpush.msrb.mxu3 %v717_v9  ;;  %1164 = vperm.xlu1 %2103, %v1156_v10  }
 0x13a   : > { %1005 = vmatpush.msrb.mxu2 %v652_v11  ;;  %1029 = vmatpush.msra.mxu1 %v757_v12 }
 0x13b   : > { %1044 = vmatpush.msra.mxu0 %v702_v13  ;;  %1089 = vmatpush.msrb.mxu3 %v710_v14 }
 0x13c   : > { %1764 = vmatmul.msk.f32.vlgmr.msrb.gmra.mxu0 %vm778_vm1, %v3098_v48  ;;  %1767 = vmatmul.msk.f32.vlgmr.msra.gmra.mxu1 %vm778_vm1, %v3098_v48 }
 0x13d   : > { %1006 = vmatpush.msrb.mxu2 %v645_v15  ;;  %1045 = vmatpush.msra.mxu0 %v695_v16 }
 0x13e   : > { %1090 = vmatpush.msrb.mxu3 %v703_v17  ;;  %1007 = vmatmul.f32.vlgmr.msrb.gmra.mxu2 %v3142_v20 }
 0x13f   : > { %961 = vmatmul.f32.vlgmr.msra.gmra.mxu3 %v3142_v20  ;;  %1772 = vmatpush.msk.msra.mxu2 %vm785_vm0, %v773_v18 }
 0x140   : > { %1046 = vmatpush.msra.mxu0 %v688_v19  ;;  %1091 = vmatpush.msrb.mxu3 %v696_v21 }
 0x141   : > { %1769 = vmatpush.msk.msrb.mxu1 %vm785_vm0, %v772_v22  ;;  %1120 = vmatpush.msra.mxu2 %v766_v23 }
 0x142   : > { %1047 = vmatpush.msra.mxu0 %v681_v24  ;;  %1092 = vmatpush.msrb.mxu3 %v689_v25 }
 0x143   : > { %1074 = vmatpush.msrb.mxu1 %v765_v26  ;;  %1121 = vmatpush.msra.mxu2 %v759_v28 }
 0x144   : > { %1048 = vmatpush.msra.mxu0 %v674_v29  ;;  %1093 = vmatpush.msrb.mxu3 %v682_v30 }
 0x145   : > { %1765 = vmatmul.msk.f32.gmra.mxu0 %vm778_vm1, %v3154_v27  ;;  %1768 = vmatmul.msk.f32.gmra.mxu1 %vm778_vm1, %v3154_v27 }
 0x146   : > { %1049 = vmatpush.msra.mxu0 %v667_v31  ;;  %1094 = vmatpush.msrb.mxu3 %v675_v32 }
 0x147   : > { %964 = vmatmul.f32.gmra.mxu3 %v3168_v34  ;;  %1010 = vmatmul.f32.gmra.mxu2 %v3168_v34 }
 0x148   : > { %1050 = vmatpush.msra.mxu0 %v660_v33  ;;  %1095 = vmatpush.msrb.mxu3 %v668_v35 }
 0x149   : > { %1075 = vmatpush.msrb.mxu1 %v758_v36 }
 0x14a   : > { %1051 = vmatpush.msra.mxu0 %v653_v37  ;;  %1096 = vmatpush.msrb.mxu3 %v661_v38 }
 0x14c   : > { %1052 = vmatpush.msra.mxu0 %v646_v39  ;;  %1097 = vmatpush.msrb.mxu3 %v654_v40 }
 0x14d   : > { %1053 = vmatmul.f32.vlgmr.msra.gmra.mxu0 %v3142_v20  ;;  %1770 = vmatmul.msk.f32.vlgmr.msrb.gmra.mxu1 %vm778_vm1, %v3098_v48 }
 0x14e   : > { %1098 = vmatpush.msrb.mxu3 %v647_v41 }
 0x14f   : > { %1099 = vmatmul.f32.vlgmr.msrb.gmra.mxu3 %v3142_v20  ;;  %1773 = vmatmul.msk.f32.vlgmr.msra.gmra.mxu2 %vm778_vm1, %v3098_v48 }
 0x155   : > { %1056 = vmatmul.f32.gmra.mxu0 %v3168_v34  ;;  %1771 = vmatmul.msk.f32.gmra.mxu1 %vm778_vm1, %v3154_v27 }
 0x157   : > { %1102 = vmatmul.f32.gmra.mxu3 %v3168_v34  ;;  %1774 = vmatmul.msk.f32.gmra.mxu2 %vm778_vm1, %v3154_v27 }
 0x18b   : > { %v893_v44 = vpop.f32.mrf.mxu3 }
 0x192   : > { %v847_v42 = vpop.f32.mrf.mxu1 }
 0x19b   : > { %v824_v43 = vpop.f32.mrf.mxu0 }
 0x19c   : > { %v850_v45 = vpop.f32.mrf.mxu1  ;;  %v848_v46 = vadd.f32 %v847_v42, %v824_v43 }
 0x19e   : > { %v870_v20 = vpop.f32.mrf.mxu2 }
 0x19f   : > { %v894_v47 = vadd.f32 %v893_v44, %v870_v20  ;;  %v3282_v49 = vpop.permute.xlu0 %1133 }
 0x1a0   : > { %v1141_v48 = vmul.f32 %v3282_v49, %v848_v46 }
 0x1a1   : > { %v1142_v50 = vmul.f32 %v3282_v49, %v894_v47 }
 0x1a3   : > { %v3288_v51 = vpop.permute.xlu1 %1159 }
 0x1a4   : > { %v1167_v34 = vadd.f32 %v3288_v51, %v1141_v48  ;;  %v1168_v27 = vadd.f32 %v3288_v51, %v1142_v50  ;;  %v827_v52 = vpop.f32.mrf.mxu0  ;;  %v896_v53 = vpop.f32.mrf.mxu3 }
 0x1a5   : > { %v916_v54 = vpop.f32.mrf.mxu1  ;;  %v851_v57 = vadd.f32 %v850_v45, %v827_v52 }
 0x1a6   : > { %v1181_v55 = vmax.f32 %v1167_v34, 0.0  ;;  %v1182_v56 = vmax.f32 %v1168_v27, 0.0  ;;  %v873_v58 = vpop.f32.mrf.mxu2 }
 0x1a7   : > { %v897_v59 = vadd.f32 %v896_v53, %v873_v58 }
 0x1a8   : > { %1195 = vst [vmem:[%s3292_s20] sm:$0xff] %v1181_v55 }
 0x1a9   : > { %1196 = vst [vmem:[%s3292_s20 + $0x8] sm:$0xff] %v1182_v56  ;;  %v3296_v60 = vpop.permute.xlu0 %1138 }
 0x1aa   : > { %v1148_v61 = vmul.f32 %v3296_v60, %v851_v57  ;;  %v1149_v62 = vmul.f32 %v3296_v60, %v897_v59 }
 0x1ab   : > { %v3300_v63 = vpop.permute.xlu1 %1164 }
 0x1ac   : > { %v1174_v0 = vadd.f32 %v3300_v63, %v1148_v61  ;;  %v1175_v1 = vadd.f32 %v3300_v63, %v1149_v62 }
 0x1ad   : > { %v939_v4 = vpop.f32.mrf.mxu3 }
 0x1ae   : > { %v1188_v2 = vmax.f32 %v1174_v0, 0.0  ;;  %v1189_v3 = vmax.f32 %v1175_v1, 0.0  ;;  %v940_v6 = vadd.f32 %v939_v4, %v916_v54 }
 0x1af   : > { %v919_v5 = vpop.f32.mrf.mxu1 }
 0x1b0   : > { %1202 = vst [vmem:[%s3292_s20 + $0x38] sm:$0xff] %v1188_v2  ;;  %v1143_v7 = vmul.f32 %v3282_v49, %v940_v6 }
 0x1b1   : > { %1203 = vst [vmem:[%s3292_s20 + $0x40] sm:$0xff] %v1189_v3 }
 0x1b2   : > { %v1169_v8 = vadd.f32 %v3288_v51, %v1143_v7 }
 0x1b4   : > { %v1183_v9 = vmax.f32 %v1169_v8, 0.0 }
 0x1b6   : > { %1197 = vst [vmem:[%s3292_s20 + $0x10] sm:$0xff] %v1183_v9 }
 0x1b8   : > { %v942_v10 = vpop.f32.mrf.mxu3 }
 0x1b9   : > { %v943_v11 = vadd.f32 %v942_v10, %v919_v5  ;;  %v985_v12 = vpop.f32.mrf.mxu0  ;;  %v1031_v13 = vpop.f32.mrf.mxu1 }
 0x1bb   : > { %v1150_v14 = vmul.f32 %v3296_v60, %v943_v11 }
 0x1bd   : > { %v1176_v15 = vadd.f32 %v3300_v63, %v1150_v14 }
 0x1bf   : > { %v1190_v16 = vmax.f32 %v1176_v15, 0.0 }
 0x1c1   : > { %1204 = vst [vmem:[%s3292_s20 + $0x48] sm:$0xff] %v1190_v16  ;;  %v1008_v17 = vpop.f32.mrf.mxu2 }
 0x1c2   : > { %v962_v18 = vpop.f32.mrf.mxu3  ;;  %v988_v19 = vpop.f32.mrf.mxu0  ;;  %v1032_v21 = vadd.f32 %v1031_v13, %v1008_v17 }
 0x1c3   : > { %v986_v22 = vadd.f32 %v985_v12, %v962_v18  ;;  %v1034_v23 = vpop.f32.mrf.mxu1 }
 0x1c4   : > { %v1145_v24 = vmul.f32 %v3282_v49, %v1032_v21 }
 0x1c5   : > { %v1144_v25 = vmul.f32 %v3282_v49, %v986_v22 }
 0x1c6   : > { %v1171_v26 = vadd.f32 %v3288_v51, %v1145_v24 }
 0x1c7   : > { %v1170_v28 = vadd.f32 %v3288_v51, %v1144_v25 }
 0x1c8   : > { %v1185_v29 = vmax.f32 %v1171_v26, 0.0 }
 0x1c9   : > { %v1184_v30 = vmax.f32 %v1170_v28, 0.0 }
 0x1ca   : > { %1199 = vst [vmem:[%s3292_s20 + $0x20] sm:$0xff] %v1185_v29  ;;  %v965_v31 = vpop.f32.mrf.mxu3  ;;  %v1011_v32 = vpop.f32.mrf.mxu2 }
 0x1cb   : > { %1198 = vst [vmem:[%s3292_s20 + $0x18] sm:$0xff] %v1184_v30  ;;  %v989_v33 = vadd.f32 %v988_v19, %v965_v31  ;;  %v1035_v35 = vadd.f32 %v1034_v23, %v1011_v32  ;;  %v1054_v36 = vpop.f32.mrf.mxu0  ;;  %v1077_v37 = vpop.f32.mrf.mxu1 }
 0x1cc   : > { %v1078_v38 = vadd.f32 %v1077_v37, %v1054_v36 }
 0x1cd   : > { %v1151_v39 = vmul.f32 %v3296_v60, %v989_v33  ;;  %v1152_v40 = vmul.f32 %v3296_v60, %v1035_v35 }
 0x1ce   : > { %v1146_v41 = vmul.f32 %v3282_v49, %v1078_v38 }
 0x1cf   : > { %v1177_v42 = vadd.f32 %v3300_v63, %v1151_v39  ;;  %v1178_v43 = vadd.f32 %v3300_v63, %v1152_v40 }
 0x1d0   : > { %v1172_v44 = vadd.f32 %v3288_v51, %v1146_v41 }
 0x1d1   : > { %v1191_v45 = vmax.f32 %v1177_v42, 0.0  ;;  %v1192_v46 = vmax.f32 %v1178_v43, 0.0 }
 0x1d2   : > { %v1186_v20 = vmax.f32 %v1172_v44, 0.0  ;;  %v1100_v47 = vpop.f32.mrf.mxu3  ;;  %v1123_v48 = vpop.f32.mrf.mxu2 }
 0x1d3   : > { %1205 = vst [vmem:[%s3292_s20 + $0x50] sm:$0xff] %v1191_v45  ;;  %v1057_v50 = vpop.f32.mrf.mxu0  ;;  %v1080_v34 = vpop.f32.mrf.mxu1  ;;  %v1124_v27 = vadd.f32 %v1123_v48, %v1100_v47 }
 0x1d4   : > { %1206 = vst [vmem:[%s3292_s20 + $0x58] sm:$0xff] %v1192_v46  ;;  %v1081_v52 = vadd.f32 %v1080_v34, %v1057_v50 }
 0x1d5   : > { %1200 = vst [vmem:[%s3292_s20 + $0x28] sm:$0xff] %v1186_v20  ;;  %v1147_v53 = vmul.f32 %v3282_v49, %v1124_v27 }
 0x1d6   : > { %v1153_v54 = vmul.f32 %v3296_v60, %v1081_v52 }
 0x1d7   : > { %v1173_v55 = vadd.f32 %v3288_v51, %v1147_v53 }
 0x1d8   : > { %v1179_v56 = vadd.f32 %v3300_v63, %v1153_v54 }
 0x1d9   : > { %v1187_v57 = vmax.f32 %v1173_v55, 0.0 }
 0x1da   : > { %v1193_v58 = vmax.f32 %v1179_v56, 0.0  ;;  %v1103_v59 = vpop.f32.mrf.mxu3  ;;  %v1126_v61 = vpop.f32.mrf.mxu2 }
 0x1db   : > { %1201 = vst [vmem:[%s3292_s20 + $0x30] sm:$0xff] %v1187_v57  ;;  %v1127_v62 = vadd.f32 %v1126_v61, %v1103_v59 }
 0x1dc   : > { %1207 = vst [vmem:[%s3292_s20 + $0x60] sm:$0xff] %v1193_v58 }
 0x1dd   : > { %v1154_v0 = vmul.f32 %v3296_v60, %v1127_v62 }
 0x1df   : > { %v1180_v1 = vadd.f32 %v3300_v63, %v1154_v0  ;;  %1215 = sbr.rel (!%p2445_p5) target bundleno = 628 (0x274), region = 106 }
 0x1e1   : > { %v1194_v2 = vmax.f32 %v1180_v1, 0.0 }
 0x1e3   : > { %1208 = vst [vmem:[%s3292_s20 + $0x68] sm:$0xff] %v1194_v2 }
 0x1e4   : > { %s3664_s24 = smov (!%p1218_p1, %s1217_s24), 7 }
 0x1e5   : > { %s1775_s13 = sshll.u32 %s3664_s24, 4  ;;  %s3345_s6 = sshll.u32 %s3664_s24, 3 }
 0x1e6   : > { %p1779_p2 = scmp.eq.s32.totalorder %s1775_s13, 0 }
 0x1e7   : > { %p1228_p3 = scmp.lt.u32.totalorder (!%p1779_p2), %s3345_s6, 8 }
 0x1e8   : > { %1227 = sbr.rel (%p1779_p2) target bundleno = 628 (0x274), region = 110 }
 0x1ed   : > { %1231 = sbr.rel (%p1228_p3) target bundleno = 618 (0x26a), region = 114  ;;  %s3349_s23 = sand.u32 (!%p1228_p3), 7, %s3345_s6  }
 0x1ee   : > { %p1250_p5 = scmp.eq.s32.totalorder (!%p1228_p3), %s3349_s23, 0  ;;  %p1780_p4 = scmp.ne.s32.totalorder (!%p1228_p3), %s3349_s23, 0 }
 0x1f2   : > { %1253 = sbr.rel (%p1780_p4) target bundleno = 555 (0x22b), region = 129  ;;  %s1254_s18 = sshrl.u32 (!%p1780_p4), %s3345_s6, 3 }
 0x1f3   : > { %s3356_s27 = sshrl.u32 (!%p1780_p4), %s1254_s18, 4 }
 0x1f4   : > { %p1781_p6 = scmp.le.s32.totalorder (!%p1780_p4), %s3356_s27, 0 }
 0x1f7   : > { %1652 = sbr.rel (%p1781_p6) target bundleno = 538 (0x21a), region = 277  ;;  %s3640_s29 = smov (!%p1781_p6), %s3343_s8 }
 0x1f8   : > { %s3641_s25 = smov (!%p1781_p6), %s3292_s20  ;;  %s3365_s14 = smov (!%p1781_p6), 0  }
 0x1f9   : > { %s3367_s12 = smov (!%p1781_p6), 0  }
 0x1fc LB: >> { %v1265_v49 = vld [vmem:[%s2326_s25] sm:$0xff]  ;;  %v1267_v51 = vld [vmem:[%s2326_s25 + $0x8] sm:$0xff]  ;;  %v1269_v60 = vld [vmem:[%s2326_s25 + $0x10] sm:$0xff]  ;;  %s1329_s10 = sadd.s32 1, %s2330_s14  ;;  %s1259_s12 = sadd.s32 1, %s2334_s12   ;;  %s2334_s12 = sphi %s3367_s12, %s1259_s12   ;;  %s2330_s14 = sphi %s3365_s14, %s3644_s14   ;;  %s2326_s25 = sphi %s3641_s25, %s3643_s25   ;;  %s2322_s29 = sphi %s3640_s29, %s3642_s29  }
 0x1fd   : >> { %1266 = vst [vmem:[%s2322_s29] sm:$0xff] %v1265_v49  ;;  %v1271_v63 = vld [vmem:[%s2326_s25 + $0x18] sm:$0xff]  ;;  %v1273_v3 = vld [vmem:[%s2326_s25 + $0x20] sm:$0xff]  ;;  %v1275_v4 = vld [vmem:[%s2326_s25 + $0x28] sm:$0xff]  ;;  %p1330_p7 = scmp.ge.s32.totalorder %s1329_s10, %s3356_s27  ;;  %p1258_p8 = scmp.ge.s32.totalorder %s1259_s12, %s3356_s27 }
 0x1fe   : >> { %1268 = vst [vmem:[%s2322_s29 + $0x8] sm:$0xff] %v1267_v51  ;;  %v1277_v5 = vld [vmem:[%s2326_s25 + $0x30] sm:$0xff]  ;;  %v1279_v6 = vld [vmem:[%s2326_s25 + $0x38] sm:$0xff]  ;;  %v1281_v7 = vld [vmem:[%s2326_s25 + $0x40] sm:$0xff] }
 0x1ff   : >> { %1270 = vst [vmem:[%s2322_s29 + $0x10] sm:$0xff] %v1269_v60  ;;  %s3666_s10 = smov (%p1330_p7, %s1329_s10), 0  ;;  %v1283_v8 = vld [vmem:[%s2326_s25 + $0x48] sm:$0xff]  ;;  %v1285_v9 = vld [vmem:[%s2326_s25 + $0x50] sm:$0xff]  ;;  %v1287_v10 = vld [vmem:[%s2326_s25 + $0x58] sm:$0xff] }
 0x200   : >> { %1272 = vst [vmem:[%s2322_s29 + $0x18] sm:$0xff] %v1271_v63  ;;  %s1782_s11 = sshll.u32 %s3666_s10, 7  ;;  %v1289_v11 = vld [vmem:[%s2326_s25 + $0x60] sm:$0xff]  ;;  %v1309_v12 = vld [vmem:[%s2326_s25 + $0x68] sm:$0xff]  ;;  %v1311_v13 = vld [vmem:[%s2326_s25 + $0x70] sm:$0xff]  ;;  %s3644_s14 = smov %s3666_s10 }
 0x201   : >> { %1274 = vst [vmem:[%s2322_s29 + $0x20] sm:$0xff] %v1273_v3  ;;  %s3403_s21 = scalar_lea.vmem %s3292_s20, %s1782_s11 [#allocation3]   ;;  %s3406_s30 = scalar_lea.vmem %s3343_s8, %s1782_s11   ;;  %v1313_v14 = vld [vmem:[%s2326_s25 + $0x78] sm:$0xff]  ;;  %v1315_v15 = vld [vmem:[%s2326_s25 + $0x80] sm:$0xff]  ;;  %v1317_v16 = vld [vmem:[%s2326_s25 + $0x88] sm:$0xff] }
 0x202   : >> { %1276 = vst [vmem:[%s2322_s29 + $0x28] sm:$0xff] %v1275_v4  ;;  %v1319_v17 = vld [vmem:[%s2326_s25 + $0x90] sm:$0xff]  ;;  %v1321_v18 = vld [vmem:[%s2326_s25 + $0x98] sm:$0xff]  ;;  %v1323_v19 = vld [vmem:[%s2326_s25 + $0xa0] sm:$0xff] }
 0x203   : >> { %1278 = vst [vmem:[%s2322_s29 + $0x30] sm:$0xff] %v1277_v5  ;;  %v1325_v21 = vld [vmem:[%s2326_s25 + $0xa8] sm:$0xff]  ;;  %v1327_v22 = vld [vmem:[%s2326_s25 + $0xb0] sm:$0xff]  ;;  %s3643_s25 = smov %s3403_s21 }
 0x204   : >> { %1280 = vst [vmem:[%s2322_s29 + $0x38] sm:$0xff] %v1279_v6 }
 0x205   : >> { %1282 = vst [vmem:[%s2322_s29 + $0x40] sm:$0xff] %v1281_v7 }
 0x206   : >> { %1284 = vst [vmem:[%s2322_s29 + $0x48] sm:$0xff] %v1283_v8 }
 0x207   : >> { %1286 = vst [vmem:[%s2322_s29 + $0x50] sm:$0xff] %v1285_v9 }
 0x208   : >> { %1288 = vst [vmem:[%s2322_s29 + $0x58] sm:$0xff] %v1287_v10 }
 0x209   : >> { %1290 = vst [vmem:[%s2322_s29 + $0x60] sm:$0xff] %v1289_v11 }
 0x20a   : >> { %1298 = vst [vmem:[%s2322_s29 + $0x68] sm:$0xff] %v1279_v6 }
 0x20b   : >> { %1300 = vst [vmem:[%s2322_s29 + $0x70] sm:$0xff] %v1281_v7 }
 0x20c   : >> { %1302 = vst [vmem:[%s2322_s29 + $0x78] sm:$0xff] %v1283_v8 }
 0x20d   : >> { %1304 = vst [vmem:[%s2322_s29 + $0x80] sm:$0xff] %v1285_v9 }
 0x20e   : >> { %1306 = vst [vmem:[%s2322_s29 + $0x88] sm:$0xff] %v1287_v10 }
 0x20f   : >> { %1308 = vst [vmem:[%s2322_s29 + $0x90] sm:$0xff] %v1289_v11 }
 0x210   : >> { %1310 = vst [vmem:[%s2322_s29 + $0x98] sm:$0xff] %v1309_v12 }
 0x211   : >> { %1312 = vst [vmem:[%s2322_s29 + $0xa0] sm:$0xff] %v1311_v13 }
 0x212   : >> { %1314 = vst [vmem:[%s2322_s29 + $0xa8] sm:$0xff] %v1313_v14 }
 0x213   : >> { %1316 = vst [vmem:[%s2322_s29 + $0xb0] sm:$0xff] %v1315_v15 }
 0x214   : >> { %1318 = vst [vmem:[%s2322_s29 + $0xb8] sm:$0xff] %v1317_v16 }
 0x215   : >> { %1320 = vst [vmem:[%s2322_s29 + $0xc0] sm:$0xff] %v1319_v17  ;;  %1261 = sbr.rel (!%p1258_p8) target bundleno = 508 (0x1fc), region = 283 }
 0x216   : >> { %1322 = vst [vmem:[%s2322_s29 + $0xc8] sm:$0xff] %v1321_v18 }
 0x217   : >> { %1324 = vst [vmem:[%s2322_s29 + $0xd0] sm:$0xff] %v1323_v19 }
 0x218   : >> { %1326 = vst [vmem:[%s2322_s29 + $0xd8] sm:$0xff] %v1325_v21 }
 0x219   : >> { %1328 = vst [vmem:[%s2322_s29 + $0xe0] sm:$0xff] %v1327_v22  ;;  %s3642_s29 = smov %s3406_s30 }
 0x21a PF: > { %s3456_s9 = sand.u32 15, %s1254_s18   ;;  %s1810_s26 = sshll.u32 %s3356_s27, 7 }
 0x21b   : > { %s3460_s28 = scalar_lea.vmem %s3292_s20, %s1810_s26 [#allocation3]   ;;  %s1342_s15 = scalar_lea.vmem %s3343_s8, %s1810_s26  }
 0x21c   : > { %p1787_p9 = scmp.le.s32.totalorder %s3456_s9, 0 }
 0x21d   : > { %s2336_s7 = smov (!%p1787_p9), %s1342_s15   ;;  %s2340_s24 = smov (!%p1787_p9), %s3460_s28  }
 0x21e   : > { %1666 = sbr.rel (%p1787_p9) target bundleno = 555 (0x22b), region = 288  ;;  %s2344_s17 = smov (!%p1787_p9), 0  }
 0x21f   : > { %s2348_s5 = smov (!%p1787_p9), 0  }
 0x223 LB: >> { %v1352_v23 = vld [vmem:[%s2342_s24] sm:$0xff]  ;;  %v1354_v24 = vld [vmem:[%s2342_s24 + $0x38] sm:$0xff]  ;;  %s1356_s13 = sadd.s32 1, %s2346_s17  ;;  %s1346_s5 = sadd.s32 1, %s2350_s5   ;;  %s2350_s5 = sphi %s2348_s5, %s1346_s5   ;;  %s2346_s17 = sphi %s2344_s17, %s2345_s17   ;;  %s2342_s24 = sphi %s2340_s24, %s1361_s24   ;;  %s2338_s7 = sphi %s2336_s7, %s1362_s7  }
 0x224   : >> { %1353 = vst [vmem:[%s2338_s7] sm:$0xff] %v1352_v23  ;;  %p1357_p10 = scmp.ge.s32.totalorder %s1356_s13, %s3456_s9  ;;  %p1345_p11 = scmp.ge.s32.totalorder %s1346_s5, %s3456_s9 }
 0x225   : >> { %1355 = vst [vmem:[%s2338_s7 + $0x68] sm:$0xff] %v1354_v24 }
 0x226   : >> { %s3668_s13 = smov (%p1357_p10, %s1356_s13), 0  ;;  %1348 = sbr.rel (!%p1345_p11) target bundleno = 547 (0x223), region = 294 }
 0x227   : >> { %s1788_s18 = sshll.u32 %s3668_s13, 3  ;;  %s2345_s17 = smov %s3668_s13  }
 0x228   : >> { %s1361_s24 = scalar_lea.vmem %s3460_s28, %s1788_s18 [#allocation3]   ;;  %s1362_s7 = scalar_lea.vmem %s1342_s15, %s1788_s18  }
 0x22b PF: > { %1365 = sbr.rel (%p1250_p5) target bundleno = 618 (0x26a), region = 147  ;;  %s1367_s27 = ssub.s32 (!%p1250_p5), %s3345_s6, %s3349_s23 }
 0x22c   : > { %s1371_s29 = sshrl.u32 (!%p1250_p5), %s3345_s6, 3  ;;  %s3474_s25 = scalar_lea.vmem (!%p1250_p5), %s3292_s20, %s1367_s27 [#allocation3] }
 0x22d   : > { %s3477_s14 = scalar_lea.vmem (!%p1250_p5), %s3343_s8, %s1367_s27  ;;  %s3481_s12 = sshrl.u32 (!%p1250_p5), %s1371_s29, 4 }
 0x22e   : > { %p1790_p12 = scmp.le.s32.totalorder (!%p1250_p5), %s3481_s12, 0 }
 0x230   : > { %1680 = sbr.rel (%p1790_p12) target bundleno = 595 (0x253), region = 299  ;;  %s3645_s10 = smov (!%p1790_p12), %s3343_s8 }
 0x231   : > { %s3646_s11 = smov (!%p1790_p12), %s3292_s20  ;;  %s3490_s21 = smov (!%p1790_p12), 0  }
 0x232   : > { %s3492_s30 = smov (!%p1790_p12), 0  }
 0x235 LB: >> { %v1382_v25 = vld [vmem:[%s2358_s11] sm:$0xff]  ;;  %v1384_v26 = vld [vmem:[%s2358_s11 + $0x8] sm:$0xff]  ;;  %v1386_v28 = vld [vmem:[%s2358_s11 + $0x10] sm:$0xff]  ;;  %s1446_s9 = sadd.s32 1, %s2362_s21  ;;  %s1376_s30 = sadd.s32 1, %s2366_s30   ;;  %s2366_s30 = sphi %s3492_s30, %s1376_s30   ;;  %s2362_s21 = sphi %s3490_s21, %s3649_s21   ;;  %s2358_s11 = sphi %s3646_s11, %s3648_s11   ;;  %s2354_s10 = sphi %s3645_s10, %s3647_s10  }
 0x236   : >> { %1383 = vst [vmem:[%s2354_s10] sm:$0xff] %v1382_v25  ;;  %v1388_v29 = vld [vmem:[%s2358_s11 + $0x18] sm:$0xff]  ;;  %v1390_v30 = vld [vmem:[%s2358_s11 + $0x20] sm:$0xff]  ;;  %v1392_v31 = vld [vmem:[%s2358_s11 + $0x28] sm:$0xff]  ;;  %p1447_p13 = scmp.ge.s32.totalorder %s1446_s9, %s3481_s12  ;;  %p1375_p0 = scmp.ge.s32.totalorder %s1376_s30, %s3481_s12 }
 0x237   : >> { %1385 = vst [vmem:[%s2354_s10 + $0x8] sm:$0xff] %v1384_v26  ;;  %v1394_v32 = vld [vmem:[%s2358_s11 + $0x30] sm:$0xff]  ;;  %v1396_v33 = vld [vmem:[%s2358_s11 + $0x38] sm:$0xff]  ;;  %v1398_v35 = vld [vmem:[%s2358_s11 + $0x40] sm:$0xff] }
 0x238   : >> { %1387 = vst [vmem:[%s2354_s10 + $0x10] sm:$0xff] %v1386_v28  ;;  %s3670_s9 = smov (%p1447_p13, %s1446_s9), 0  ;;  %v1400_v36 = vld [vmem:[%s2358_s11 + $0x48] sm:$0xff]  ;;  %v1402_v37 = vld [vmem:[%s2358_s11 + $0x50] sm:$0xff]  ;;  %v1404_v38 = vld [vmem:[%s2358_s11 + $0x58] sm:$0xff] }
 0x239   : >> { %1389 = vst [vmem:[%s2354_s10 + $0x18] sm:$0xff] %v1388_v29  ;;  %s1791_s26 = sshll.u32 %s3670_s9, 7  ;;  %v1406_v39 = vld [vmem:[%s2358_s11 + $0x60] sm:$0xff]  ;;  %v1426_v40 = vld [vmem:[%s2358_s11 + $0x68] sm:$0xff]  ;;  %v1428_v41 = vld [vmem:[%s2358_s11 + $0x70] sm:$0xff]  ;;  %s3649_s21 = smov %s3670_s9 }
 0x23a   : >> { %1391 = vst [vmem:[%s2354_s10 + $0x20] sm:$0xff] %v1390_v30  ;;  %s3528_s28 = scalar_lea.vmem %s3292_s20, %s1791_s26 [#allocation3]   ;;  %s3531_s15 = scalar_lea.vmem %s3343_s8, %s1791_s26   ;;  %v1430_v42 = vld [vmem:[%s2358_s11 + $0x78] sm:$0xff]  ;;  %v1432_v43 = vld [vmem:[%s2358_s11 + $0x80] sm:$0xff]  ;;  %v1434_v44 = vld [vmem:[%s2358_s11 + $0x88] sm:$0xff] }
 0x23b   : >> { %1393 = vst [vmem:[%s2354_s10 + $0x28] sm:$0xff] %v1392_v31  ;;  %v1436_v45 = vld [vmem:[%s2358_s11 + $0x90] sm:$0xff]  ;;  %v1438_v46 = vld [vmem:[%s2358_s11 + $0x98] sm:$0xff]  ;;  %v1440_v20 = vld [vmem:[%s2358_s11 + $0xa0] sm:$0xff] }
 0x23c   : >> { %1395 = vst [vmem:[%s2354_s10 + $0x30] sm:$0xff] %v1394_v32  ;;  %v1442_v47 = vld [vmem:[%s2358_s11 + $0xa8] sm:$0xff]  ;;  %v1444_v48 = vld [vmem:[%s2358_s11 + $0xb0] sm:$0xff]  ;;  %s3648_s11 = smov %s3528_s28 }
 0x23d   : >> { %1397 = vst [vmem:[%s2354_s10 + $0x38] sm:$0xff] %v1396_v33 }
 0x23e   : >> { %1399 = vst [vmem:[%s2354_s10 + $0x40] sm:$0xff] %v1398_v35 }
 0x23f   : >> { %1401 = vst [vmem:[%s2354_s10 + $0x48] sm:$0xff] %v1400_v36 }
 0x240   : >> { %1403 = vst [vmem:[%s2354_s10 + $0x50] sm:$0xff] %v1402_v37 }
 0x241   : >> { %1405 = vst [vmem:[%s2354_s10 + $0x58] sm:$0xff] %v1404_v38 }
 0x242   : >> { %1407 = vst [vmem:[%s2354_s10 + $0x60] sm:$0xff] %v1406_v39 }
 0x243   : >> { %1415 = vst [vmem:[%s2354_s10 + $0x68] sm:$0xff] %v1396_v33 }
 0x244   : >> { %1417 = vst [vmem:[%s2354_s10 + $0x70] sm:$0xff] %v1398_v35 }
 0x245   : >> { %1419 = vst [vmem:[%s2354_s10 + $0x78] sm:$0xff] %v1400_v36 }
 0x246   : >> { %1421 = vst [vmem:[%s2354_s10 + $0x80] sm:$0xff] %v1402_v37 }
 0x247   : >> { %1423 = vst [vmem:[%s2354_s10 + $0x88] sm:$0xff] %v1404_v38 }
 0x248   : >> { %1425 = vst [vmem:[%s2354_s10 + $0x90] sm:$0xff] %v1406_v39 }
 0x249   : >> { %1427 = vst [vmem:[%s2354_s10 + $0x98] sm:$0xff] %v1426_v40 }
 0x24a   : >> { %1429 = vst [vmem:[%s2354_s10 + $0xa0] sm:$0xff] %v1428_v41 }
 0x24b   : >> { %1431 = vst [vmem:[%s2354_s10 + $0xa8] sm:$0xff] %v1430_v42 }
 0x24c   : >> { %1433 = vst [vmem:[%s2354_s10 + $0xb0] sm:$0xff] %v1432_v43 }
 0x24d   : >> { %1435 = vst [vmem:[%s2354_s10 + $0xb8] sm:$0xff] %v1434_v44 }
 0x24e   : >> { %1437 = vst [vmem:[%s2354_s10 + $0xc0] sm:$0xff] %v1436_v45  ;;  %1378 = sbr.rel (!%p1375_p0) target bundleno = 565 (0x235), region = 305 }
 0x24f   : >> { %1439 = vst [vmem:[%s2354_s10 + $0xc8] sm:$0xff] %v1438_v46 }
 0x250   : >> { %1441 = vst [vmem:[%s2354_s10 + $0xd0] sm:$0xff] %v1440_v20 }
 0x251   : >> { %1443 = vst [vmem:[%s2354_s10 + $0xd8] sm:$0xff] %v1442_v47 }
 0x252   : >> { %1445 = vst [vmem:[%s2354_s10 + $0xe0] sm:$0xff] %v1444_v48  ;;  %s3647_s10 = smov %s3531_s15 }
 0x253 PF: > { %s3581_s7 = sand.u32 15, %s1371_s29   ;;  %s1812_s24 = sshll.u32 %s3481_s12, 7 }
 0x254   : > { %s3585_s17 = scalar_lea.vmem %s3292_s20, %s1812_s24 [#allocation3]   ;;  %s1459_s5 = scalar_lea.vmem %s3343_s8, %s1812_s24  }
 0x255   : > { %p1796_p1 = scmp.le.s32.totalorder %s3581_s7, 0 }
 0x256   : > { %s2368_s13 = smov (!%p1796_p1), %s1459_s5   ;;  %s2372_s18 = smov (!%p1796_p1), %s3585_s17  }
 0x257   : > { %1694 = sbr.rel (%p1796_p1) target bundleno = 612 (0x264), region = 310  ;;  %s2376_s27 = smov (!%p1796_p1), 0  }
 0x258   : > { %s2380_s30 = smov (!%p1796_p1), 0  }
 0x25c LB: >> { %v1469_v50 = vld [vmem:[%s2374_s18] sm:$0xff]  ;;  %v1471_v34 = vld [vmem:[%s2374_s18 + $0x38] sm:$0xff]  ;;  %s1473_s29 = sadd.s32 1, %s2378_s27  ;;  %s1463_s30 = sadd.s32 1, %s2382_s30   ;;  %s2382_s30 = sphi %s2380_s30, %s1463_s30   ;;  %s2378_s27 = sphi %s2376_s27, %s2377_s27   ;;  %s2374_s18 = sphi %s2372_s18, %s1478_s18   ;;  %s2370_s13 = sphi %s2368_s13, %s1479_s13  }
 0x25d   : >> { %1470 = vst [vmem:[%s2370_s13] sm:$0xff] %v1469_v50  ;;  %p1474_p2 = scmp.ge.s32.totalorder %s1473_s29, %s3581_s7  ;;  %p1462_p3 = scmp.ge.s32.totalorder %s1463_s30, %s3581_s7 }
 0x25e   : >> { %1472 = vst [vmem:[%s2370_s13 + $0x68] sm:$0xff] %v1471_v34 }
 0x25f   : >> { %s3672_s29 = smov (%p1474_p2, %s1473_s29), 0  ;;  %1465 = sbr.rel (!%p1462_p3) target bundleno = 604 (0x25c), region = 316 }
 0x260   : >> { %s1797_s12 = sshll.u32 %s3672_s29, 3  ;;  %s2377_s27 = smov %s3672_s29  }
 0x261   : >> { %s1478_s18 = scalar_lea.vmem %s3585_s17, %s1797_s12 [#allocation3]   ;;  %s1479_s13 = scalar_lea.vmem %s1459_s5, %s1797_s12  }
 0x264 PF: > { %s2387_s10 = smov 1  }
 0x265   : > { %s1480_s11 = sshll.u32 %s2387_s10, %s3349_s23 }
 0x266   : > { %s1799_s21 = sadd.s32 4294967295, %s1480_s11 }
 0x267   : > { %v1490_v27 = vld [vmem:[%s3474_s25] sm:%s1799_s21]  ;;  %v1492_v52 = vld [vmem:[%s3474_s25 + $0x38] sm:%s1799_s21] }
 0x268   : > { %1491 = vst [vmem:[%s3477_s14] sm:%s1799_s21] %v1490_v27 }
 0x269   : > { %1493 = vst [vmem:[%s3477_s14 + $0x68] sm:%s1799_s21] %v1492_v52 }
 0x26a PF: > { %p1800_p5 = scmp.ge.u32.totalorder %s3345_s6, 8 }
 0x26b   : > { %s2388_s9 = smov (!%p1800_p5), 1  }
 0x26c   : > { %1234 = sbr.rel (%p1800_p5) target bundleno = 628 (0x274), region = 118  ;;  %s1235_s26 = sshll.u32 (!%p1800_p5), %s2388_s9, %s3345_s6 }
 0x26d   : > { %s1801_s28 = sadd.s32 (!%p1800_p5), 4294967295, %s1235_s26 }
 0x271   : > { %v1245_v53 = vld [vmem:[%s3292_s20] sm:%s1801_s28]  ;;  %v1247_v54 = vld [vmem:[%s3292_s20 + $0x38] sm:%s1801_s28] }
 0x272   : > { %1246 = vst [vmem:[%s3343_s8] sm:%s1801_s28] %v1245_v53 }
 0x273   : > { %1248 = vst [vmem:[%s3343_s8 + $0x68] sm:%s1801_s28] %v1247_v54 }
 0x274 PF: > { %p11_p4 = scmp.ge.s32.totalorder %s2433_s19, 4   ;;  %s3650_s15 = smov %s2250_s16 }
 0x275   : > { %s3651_s16 = smov %s2443_s22  ;;  %s3652_s17 = smov %s2433_s19 }
 0x276   :  { %13 = sbr.rel (!%p11_p4) target bundleno = 2 (0x2), region = 327 }

// kernel: densenet_forward.13
= control target key start
LH: loop header
LB: loop body
LE: loop exit
PB: predicated region body
PF: predicated region fallthrough
CT: control target
= control target key end

     0   :  { %vm106_vm0 = vcmask 1040384   ;;  %vm590_vm1 = vcmask 1042434   ;;  %vm592_vm2 = vcmask 1041408   ;;  %vm594_vm3 = vcmask 1044484   ;;  %s1218_s0 = inlined_call_operand.vmem [shape: f32[9,6272], index: 0, kind: input, shape index: {}]   ;;  %s1219_s1 = inlined_call_operand.vmem [shape: f32[1,6272], index: 1, kind: output, shape index: {}]  }
   0x1   :  { %v8_v0 = vld [vmem:[%s1218_s0] sm:$0xff]  ;;  %v9_v1 = vld [vmem:[%s1218_s0 + $0x8] sm:$0xff]  ;;  %v58_v3 = vld [vmem:[%s1218_s0 + $0x190] sm:$0x1]  ;;  %vm596_vm4 = vcmask 1046534   ;;  %vm598_vm5 = vcmask 1045508  }
   0x2   :  { %v57_v2 = vld [vmem:[%s1218_s0 + $0x188] sm:$0x1]  ;;  %v10_v4 = vld [vmem:[%s1218_s0 + $0x10] sm:$0xff]  ;;  %v59_v5 = vld [vmem:[%s1218_s0 + $0x198] sm:$0x1]  ;;  %v115_v13 = vsel %vm106_vm0, %v58_v3, -inf }
   0x3   :  { %v60_v6 = vld [vmem:[%s1218_s0 + $0x1a0] sm:$0x1]  ;;  %v11_v7 = vld [vmem:[%s1218_s0 + $0x18] sm:$0xff]  ;;  %v61_v8 = vld [vmem:[%s1218_s0 + $0x1a8] sm:$0x1]  ;;  %v107_v12 = vsel %vm106_vm0, %v57_v2, -inf  ;;  %v116_v17 = vmax.f32 %v9_v1, %v115_v13 }
   0x4   :  { %v62_v9 = vld [vmem:[%s1218_s0 + $0x1b0] sm:$0x1]  ;;  %v12_v10 = vld [vmem:[%s1218_s0 + $0x20] sm:$0xff]  ;;  %v13_v11 = vld [vmem:[%s1218_s0 + $0x28] sm:$0xff]  ;;  %v108_v16 = vmax.f32 %v8_v0, %v107_v12  ;;  %v123_v18 = vsel %vm106_vm0, %v59_v5, -inf  ;;  %v131_v19 = vsel %vm106_vm0, %v60_v6, -inf }
   0x5   :  { %v63_v14 = vld [vmem:[%s1218_s0 + $0x1b8] sm:$0x1]  ;;  %v64_v15 = vld [vmem:[%s1218_s0 + $0x1c0] sm:$0x1]  ;;  %v124_v20 = vmax.f32 %v10_v4, %v123_v18  ;;  %v132_v21 = vmax.f32 %v11_v7, %v131_v19  ;;  %v139_v22 = vsel %vm106_vm0, %v61_v8, -inf  ;;  %v147_v23 = vsel %vm106_vm0, %v62_v9, -inf }
   0x6   :  { %v14_v24 = vld [vmem:[%s1218_s0 + $0x30] sm:$0xff]  ;;  %v15_v25 = vld [vmem:[%s1218_s0 + $0x38] sm:$0xff]  ;;  %v109_v26 = vrot.slane %v108_v16, 4  ;;  %v117_v27 = vrot.slane %v116_v17, 4  ;;  %v140_v28 = vmax.f32 %v12_v10, %v139_v22  ;;  %v148_v29 = vmax.f32 %v13_v11, %v147_v23  ;;  %v65_v58 = vld [vmem:[%s1218_s0 + $0x1c8] sm:$0x1] }
   0x7   :  { %v125_v30 = vrot.slane %v124_v20, 4  ;;  %v133_v31 = vrot.slane %v132_v21, 4  ;;  %v155_v32 = vsel %vm106_vm0, %v63_v14, -inf  ;;  %v163_v33 = vsel %vm106_vm0, %v64_v15, -inf  ;;  %v66_v63 = vld [vmem:[%s1218_s0 + $0x1d0] sm:$0x1] }
   0x8   :  { %v110_v34 = vmax.f32 %v108_v16, %v109_v26  ;;  %v118_v35 = vmax.f32 %v116_v17, %v117_v27  ;;  %v141_v36 = vrot.slane %v140_v28, 4  ;;  %v149_v37 = vrot.slane %v148_v29, 4  ;;  %v16_v4 = vld [vmem:[%s1218_s0 + $0x40] sm:$0xff]  ;;  %v17_v5 = vld [vmem:[%s1218_s0 + $0x48] sm:$0xff]  ;;  %v67_v6 = vld [vmem:[%s1218_s0 + $0x1d8] sm:$0x1] }
   0x9   :  { %v126_v38 = vmax.f32 %v124_v20, %v125_v30  ;;  %v134_v39 = vmax.f32 %v132_v21, %v133_v31  ;;  %v156_v40 = vmax.f32 %v14_v24, %v155_v32  ;;  %v164_v41 = vmax.f32 %v15_v25, %v163_v33  ;;  %v68_v11 = vld [vmem:[%s1218_s0 + $0x1e0] sm:$0x1]  ;;  %v69_v12 = vld [vmem:[%s1218_s0 + $0x1e8] sm:$0x1]  ;;  %v70_v13 = vld [vmem:[%s1218_s0 + $0x1f0] sm:$0x1] }
   0xa   :  { %v111_v42 = vrot.slane %v110_v34, 2  ;;  %v119_v43 = vrot.slane %v118_v35, 2  ;;  %v142_v44 = vmax.f32 %v140_v28, %v141_v36  ;;  %v150_v45 = vmax.f32 %v148_v29, %v149_v37  ;;  %v18_v18 = vld [vmem:[%s1218_s0 + $0x50] sm:$0xff]  ;;  %v19_v19 = vld [vmem:[%s1218_s0 + $0x58] sm:$0xff]  ;;  %v20_v24 = vld [vmem:[%s1218_s0 + $0x60] sm:$0xff] }
   0xb   :  { %v127_v46 = vrot.slane %v126_v38, 2  ;;  %v135_v47 = vrot.slane %v134_v39, 2  ;;  %v157_v48 = vrot.slane %v156_v40, 4  ;;  %v165_v49 = vrot.slane %v164_v41, 4  ;;  %v21_v25 = vld [vmem:[%s1218_s0 + $0x68] sm:$0xff] }
   0xc   :  { %v112_v50 = vmax.f32 %v110_v34, %v111_v42  ;;  %v120_v51 = vmax.f32 %v118_v35, %v119_v43  ;;  %v143_v52 = vrot.slane %v142_v44, 2  ;;  %v151_v53 = vrot.slane %v150_v45, 2  ;;  %v71_v26 = vld [vmem:[%s1218_s0 + $0x1f8] sm:$0x1]  ;;  %v72_v31 = vld [vmem:[%s1218_s0 + $0x200] sm:$0x1] }
   0xd   :  { %v128_v54 = vmax.f32 %v126_v38, %v127_v46  ;;  %v136_v55 = vmax.f32 %v134_v39, %v135_v47  ;;  %v158_v56 = vmax.f32 %v156_v40, %v157_v48  ;;  %v166_v57 = vmax.f32 %v164_v41, %v165_v49  ;;  %v22_v40 = vld [vmem:[%s1218_s0 + $0x70] sm:$0xff]  ;;  %v23_v41 = vld [vmem:[%s1218_s0 + $0x78] sm:$0xff] }
   0xe   :  { %v113_v59 = vrot.slane %v112_v50, 1  ;;  %v121_v60 = vrot.slane %v120_v51, 1  ;;  %v144_v61 = vmax.f32 %v142_v44, %v143_v52  ;;  %v152_v62 = vmax.f32 %v150_v45, %v151_v53 }
   0xf   :  { %v129_v0 = vrot.slane %v128_v54, 1  ;;  %v137_v1 = vrot.slane %v136_v55, 1  ;;  %v159_v2 = vrot.slane %v158_v56, 2  ;;  %v167_v3 = vrot.slane %v166_v57, 2 }
  0x10   :  { %v739_v7 = vmax.f32 %v112_v50, %v113_v59  ;;  %v741_v8 = vmax.f32 %v120_v51, %v121_v60  ;;  %v145_v9 = vrot.slane %v144_v61, 1  ;;  %v153_v10 = vrot.slane %v152_v62, 1 }
  0x11   :  { %v752_v14 = vmax.f32 %v128_v54, %v129_v0  ;;  %v754_v15 = vmax.f32 %v136_v55, %v137_v1  ;;  %v160_v16 = vmax.f32 %v158_v56, %v159_v2  ;;  %v168_v17 = vmax.f32 %v166_v57, %v167_v3 }
  0x12   :  { %1220 = vst [vmem:[#allocation2_spill] sm:$0xff] %v739_v7  ;;  %v762_v20 = vmax.f32 %v144_v61, %v145_v9  ;;  %v764_v21 = vmax.f32 %v152_v62, %v153_v10  ;;  %v171_v22 = vsel %vm106_vm0, %v65_v58, -inf  ;;  %v179_v23 = vsel %vm106_vm0, %v66_v63, -inf }
  0x13   :  { %v161_v27 = vrot.slane %v160_v16, 1  ;;  %v169_v28 = vrot.slane %v168_v17, 1  ;;  %v172_v29 = vmax.f32 %v16_v4, %v171_v22  ;;  %v180_v30 = vmax.f32 %v17_v5, %v179_v23  ;;  %v24_v22 = vld [vmem:[%s1218_s0 + $0x80] sm:$0xff]  ;;  %v25_v23 = vld [vmem:[%s1218_s0 + $0x88] sm:$0xff] }
  0x14   :  { %v187_v32 = vsel %vm106_vm0, %v67_v6, -inf  ;;  %v195_v33 = vsel %vm106_vm0, %v68_v11, -inf  ;;  %v203_v34 = vsel %vm106_vm0, %v69_v12, -inf  ;;  %v211_v35 = vsel %vm106_vm0, %v70_v13, -inf  ;;  %v73_v12 = vld [vmem:[%s1218_s0 + $0x208] sm:$0x1] }
  0x15   :  { %v784_v36 = vmax.f32 %v160_v16, %v161_v27  ;;  %v786_v37 = vmax.f32 %v168_v17, %v169_v28  ;;  %v173_v38 = vrot.slane %v172_v29, 4  ;;  %v181_v39 = vrot.slane %v180_v30, 4  ;;  %v74_v13 = vld [vmem:[%s1218_s0 + $0x210] sm:$0x1] }
  0x16   :  { %v188_v42 = vmax.f32 %v18_v18, %v187_v32  ;;  %v196_v43 = vmax.f32 %v19_v19, %v195_v33  ;;  %v204_v44 = vmax.f32 %v20_v24, %v203_v34  ;;  %v212_v45 = vmax.f32 %v21_v25, %v211_v35  ;;  %v75_v24 = vld [vmem:[%s1218_s0 + $0x218] sm:$0x1]  ;;  %v77_v34 = vld [vmem:[%s1218_s0 + $0x228] sm:$0x1]  ;;  %v78_v35 = vld [vmem:[%s1218_s0 + $0x230] sm:$0x1] }
  0x17   :  { %v174_v46 = vmax.f32 %v172_v29, %v173_v38  ;;  %v182_v47 = vmax.f32 %v180_v30, %v181_v39  ;;  %v219_v48 = vsel %vm106_vm0, %v71_v26, -inf  ;;  %v227_v49 = vsel %vm106_vm0, %v72_v31, -inf  ;;  %v76_v29 = vld [vmem:[%s1218_s0 + $0x220] sm:$0x1] }
  0x18   :  { %v189_v50 = vrot.slane %v188_v42, 4  ;;  %v197_v51 = vrot.slane %v196_v43, 4  ;;  %v205_v52 = vrot.slane %v204_v44, 4  ;;  %v213_v53 = vrot.slane %v212_v45, 4 }
  0x19   :  { %v175_v54 = vrot.slane %v174_v46, 2  ;;  %v183_v55 = vrot.slane %v182_v47, 2  ;;  %v220_v56 = vmax.f32 %v22_v40, %v219_v48  ;;  %v228_v57 = vmax.f32 %v23_v41, %v227_v49  ;;  %v28_v48 = vld [vmem:[%s1218_s0 + $0xa0] sm:$0xff]  ;;  %v29_v49 = vld [vmem:[%s1218_s0 + $0xa8] sm:$0xff] }
  0x1a   :  { %v190_v58 = vmax.f32 %v188_v42, %v189_v50  ;;  %v198_v59 = vmax.f32 %v196_v43, %v197_v51  ;;  %v206_v60 = vmax.f32 %v204_v44, %v205_v52  ;;  %v214_v61 = vmax.f32 %v212_v45, %v213_v53  ;;  %v26_v42 = vld [vmem:[%s1218_s0 + $0x90] sm:$0xff]  ;;  %v27_v43 = vld [vmem:[%s1218_s0 + $0x98] sm:$0xff] }
  0x1b   :  { %v176_v62 = vmax.f32 %v174_v46, %v175_v54  ;;  %v184_v63 = vmax.f32 %v182_v47, %v183_v55  ;;  %v221_v0 = vrot.slane %v220_v56, 4  ;;  %v229_v1 = vrot.slane %v228_v57, 4  ;;  %v79_v50 = vld [vmem:[%s1218_s0 + $0x238] sm:$0x1]  ;;  %v80_v55 = vld [vmem:[%s1218_s0 + $0x240] sm:$0x1] }
  0x1c   :  { %v191_v2 = vrot.slane %v190_v58, 2  ;;  %v199_v3 = vrot.slane %v198_v59, 2  ;;  %v207_v4 = vrot.slane %v206_v60, 2  ;;  %v215_v5 = vrot.slane %v214_v61, 2 }
  0x1d   :  { %v177_v6 = vrot.slane %v176_v62, 1  ;;  %v185_v9 = vrot.slane %v184_v63, 1  ;;  %v222_v10 = vmax.f32 %v220_v56, %v221_v0  ;;  %v230_v11 = vmax.f32 %v228_v57, %v229_v1  ;;  %v30_v0 = vld [vmem:[%s1218_s0 + $0xb0] sm:$0xff]  ;;  %v31_v1 = vld [vmem:[%s1218_s0 + $0xb8] sm:$0xff] }
  0x1e   :  { %v192_v16 = vmax.f32 %v190_v58, %v191_v2  ;;  %v200_v17 = vmax.f32 %v198_v59, %v199_v3  ;;  %v208_v18 = vmax.f32 %v206_v60, %v207_v4  ;;  %v216_v19 = vmax.f32 %v214_v61, %v215_v5 }
  0x1f   :  { %v811_v25 = vmax.f32 %v176_v62, %v177_v6  ;;  %v813_v26 = vmax.f32 %v184_v63, %v185_v9  ;;  %v223_v27 = vrot.slane %v222_v10, 2  ;;  %v231_v28 = vrot.slane %v230_v11, 2 }
  0x20   :  { %v193_v30 = vrot.slane %v192_v16, 1  ;;  %v201_v31 = vrot.slane %v200_v17, 1  ;;  %v209_v32 = vrot.slane %v208_v18, 1  ;;  %v217_v33 = vrot.slane %v216_v19, 1 }
  0x21   :  { %1221 = vst [vmem:[#allocation3_spill] sm:$0xff] %v811_v25  ;;  %v224_v38 = vmax.f32 %v222_v10, %v223_v27  ;;  %v232_v39 = vmax.f32 %v230_v11, %v231_v28  ;;  %v235_v40 = vsel %vm106_vm0, %v73_v12, -inf  ;;  %v243_v41 = vsel %vm106_vm0, %v74_v13, -inf }
  0x22   :  { %v832_v44 = vmax.f32 %v192_v16, %v193_v30  ;;  %v834_v45 = vmax.f32 %v200_v17, %v201_v31  ;;  %v836_v46 = vmax.f32 %v208_v18, %v209_v32  ;;  %v838_v47 = vmax.f32 %v216_v19, %v217_v33 }
  0x23   :  { %v225_v51 = vrot.slane %v224_v38, 1  ;;  %v233_v52 = vrot.slane %v232_v39, 1  ;;  %v236_v53 = vmax.f32 %v24_v22, %v235_v40  ;;  %v244_v54 = vmax.f32 %v25_v23, %v243_v41 }
  0x24   :  { %v251_v56 = vsel %vm106_vm0, %v75_v24, -inf  ;;  %v259_v57 = vsel %vm106_vm0, %v76_v29, -inf  ;;  %v267_v58 = vsel %vm106_vm0, %v77_v34, -inf  ;;  %v275_v59 = vsel %vm106_vm0, %v78_v35, -inf }
  0x25   :  { %v856_v60 = vmax.f32 %v224_v38, %v225_v51  ;;  %v858_v61 = vmax.f32 %v232_v39, %v233_v52  ;;  %v237_v62 = vrot.slane %v236_v53, 4  ;;  %v245_v63 = vrot.slane %v244_v54, 4 }
  0x26   :  { %v252_v2 = vmax.f32 %v26_v42, %v251_v56  ;;  %v260_v3 = vmax.f32 %v27_v43, %v259_v57  ;;  %v268_v4 = vmax.f32 %v28_v48, %v267_v58  ;;  %v276_v5 = vmax.f32 %v29_v49, %v275_v59  ;;  %v81_v48 = vld [vmem:[%s1218_s0 + $0x248] sm:$0x1]  ;;  %v82_v49 = vld [vmem:[%s1218_s0 + $0x250] sm:$0x1]  ;;  %v83_v56 = vld [vmem:[%s1218_s0 + $0x258] sm:$0x1] }
  0x27   :  { %v238_v6 = vmax.f32 %v236_v53, %v237_v62  ;;  %v246_v9 = vmax.f32 %v244_v54, %v245_v63  ;;  %v283_v10 = vsel %vm106_vm0, %v79_v50, -inf  ;;  %v291_v11 = vsel %vm106_vm0, %v80_v55, -inf  ;;  %v32_v54 = vld [vmem:[%s1218_s0 + $0xc0] sm:$0xff]  ;;  %v33_v55 = vld [vmem:[%s1218_s0 + $0xc8] sm:$0xff] }
  0x28   :  { %v253_v12 = vrot.slane %v252_v2, 4  ;;  %v261_v13 = vrot.slane %v260_v3, 4  ;;  %v269_v16 = vrot.slane %v268_v4, 4  ;;  %v277_v17 = vrot.slane %v276_v5, 4  ;;  %v84_v63 = vld [vmem:[%s1218_s0 + $0x260] sm:$0x1] }
  0x29   :  { %v239_v18 = vrot.slane %v238_v6, 2  ;;  %v247_v19 = vrot.slane %v246_v9, 2  ;;  %v284_v22 = vmax.f32 %v30_v0, %v283_v10  ;;  %v292_v23 = vmax.f32 %v31_v1, %v291_v11 }
  0x2a   :  { %v254_v24 = vmax.f32 %v252_v2, %v253_v12  ;;  %v262_v27 = vmax.f32 %v260_v3, %v261_v13  ;;  %v270_v28 = vmax.f32 %v268_v4, %v269_v16  ;;  %v278_v29 = vmax.f32 %v276_v5, %v277_v17  ;;  %v85_v4 = vld [vmem:[%s1218_s0 + $0x268] sm:$0x1]  ;;  %v86_v5 = vld [vmem:[%s1218_s0 + $0x270] sm:$0x1]  ;;  %v35_v13 = vld [vmem:[%s1218_s0 + $0xd8] sm:$0xff] }
  0x2b   :  { %v240_v30 = vmax.f32 %v238_v6, %v239_v18  ;;  %v248_v31 = vmax.f32 %v246_v9, %v247_v19  ;;  %v285_v32 = vrot.slane %v284_v22, 4  ;;  %v293_v33 = vrot.slane %v292_v23, 4  ;;  %v34_v12 = vld [vmem:[%s1218_s0 + $0xd0] sm:$0xff] }
  0x2c   :  { %v255_v34 = vrot.slane %v254_v24, 2  ;;  %v263_v35 = vrot.slane %v262_v27, 2  ;;  %v271_v38 = vrot.slane %v270_v28, 2  ;;  %v279_v39 = vrot.slane %v278_v29, 2 }
  0x2d   :  { %v241_v40 = vrot.slane %v240_v30, 1  ;;  %v249_v41 = vrot.slane %v248_v31, 1  ;;  %v286_v42 = vmax.f32 %v284_v22, %v285_v32  ;;  %v294_v43 = vmax.f32 %v292_v23, %v293_v33  ;;  %v36_v22 = vld [vmem:[%s1218_s0 + $0xe0] sm:$0xff]  ;;  %v37_v23 = vld [vmem:[%s1218_s0 + $0xe8] sm:$0xff] }
  0x2e   :  { %v256_v50 = vmax.f32 %v254_v24, %v255_v34  ;;  %v264_v51 = vmax.f32 %v262_v27, %v263_v35  ;;  %v272_v52 = vmax.f32 %v270_v28, %v271_v38  ;;  %v280_v53 = vmax.f32 %v278_v29, %v279_v39  ;;  %v87_v24 = vld [vmem:[%s1218_s0 + $0x278] sm:$0x1] }
  0x2f   :  { %v883_v57 = vmax.f32 %v240_v30, %v241_v40  ;;  %v885_v58 = vmax.f32 %v248_v31, %v249_v41  ;;  %v287_v59 = vrot.slane %v286_v42, 2  ;;  %v295_v62 = vrot.slane %v294_v43, 2  ;;  %v88_v31 = vld [vmem:[%s1218_s0 + $0x280] sm:$0x1] }
  0x30   :  { %v257_v0 = vrot.slane %v256_v50, 1  ;;  %v265_v1 = vrot.slane %v264_v51, 1  ;;  %v273_v2 = vrot.slane %v272_v52, 1  ;;  %v281_v3 = vrot.slane %v280_v53, 1 }
  0x31   :  { %1222 = vst [vmem:[#allocation4_spill] sm:$0xff] %v883_v57  ;;  %v288_v6 = vmax.f32 %v286_v42, %v287_v59  ;;  %v296_v9 = vmax.f32 %v294_v43, %v295_v62  ;;  %v299_v10 = vsel %vm106_vm0, %v81_v48, -inf  ;;  %v307_v11 = vsel %vm106_vm0, %v82_v49, -inf  ;;  %v38_v42 = vld [vmem:[%s1218_s0 + $0xf0] sm:$0xff]  ;;  %v39_v43 = vld [vmem:[%s1218_s0 + $0xf8] sm:$0xff] }
  0x32   :  { %v904_v16 = vmax.f32 %v256_v50, %v257_v0  ;;  %v906_v17 = vmax.f32 %v264_v51, %v265_v1  ;;  %v908_v18 = vmax.f32 %v272_v52, %v273_v2  ;;  %v910_v19 = vmax.f32 %v280_v53, %v281_v3 }
  0x33   :  { %v289_v27 = vrot.slane %v288_v6, 1  ;;  %v297_v28 = vrot.slane %v296_v9, 1  ;;  %v300_v29 = vmax.f32 %v32_v54, %v299_v10  ;;  %v308_v30 = vmax.f32 %v33_v55, %v307_v11 }
  0x34   :  { %v315_v32 = vsel %vm106_vm0, %v83_v56, -inf  ;;  %v323_v33 = vsel %vm106_vm0, %v84_v63, -inf  ;;  %v331_v34 = vsel %vm106_vm0, %v85_v4, -inf  ;;  %v339_v35 = vsel %vm106_vm0, %v86_v5, -inf }
  0x35   :  { %v928_v38 = vmax.f32 %v288_v6, %v289_v27  ;;  %v930_v39 = vmax.f32 %v296_v9, %v297_v28  ;;  %v301_v40 = vrot.slane %v300_v29, 4  ;;  %v309_v41 = vrot.slane %v308_v30, 4 }
  0x36   :  { %v316_v48 = vmax.f32 %v34_v12, %v315_v32  ;;  %v324_v49 = vmax.f32 %v35_v13, %v323_v33  ;;  %v332_v50 = vmax.f32 %v36_v22, %v331_v34  ;;  %v340_v51 = vmax.f32 %v37_v23, %v339_v35  ;;  %v89_v32 = vld [vmem:[%s1218_s0 + $0x288] sm:$0x1]  ;;  %v90_v33 = vld [vmem:[%s1218_s0 + $0x290] sm:$0x1] }
  0x37   :  { %v302_v52 = vmax.f32 %v300_v29, %v301_v40  ;;  %v310_v53 = vmax.f32 %v308_v30, %v309_v41  ;;  %v347_v54 = vsel %vm106_vm0, %v87_v24, -inf  ;;  %v355_v55 = vsel %vm106_vm0, %v88_v31, -inf }
  0x38   :  { %v317_v56 = vrot.slane %v316_v48, 4  ;;  %v325_v59 = vrot.slane %v324_v49, 4  ;;  %v333_v62 = vrot.slane %v332_v50, 4  ;;  %v341_v63 = vrot.slane %v340_v51, 4 }
  0x39   :  { %v303_v0 = vrot.slane %v302_v52, 2  ;;  %v311_v1 = vrot.slane %v310_v53, 2  ;;  %v348_v2 = vmax.f32 %v38_v42, %v347_v54  ;;  %v356_v3 = vmax.f32 %v39_v43, %v355_v55  ;;  %v40_v42 = vld [vmem:[%s1218_s0 + $0x100] sm:$0xff]  ;;  %v41_v43 = vld [vmem:[%s1218_s0 + $0x108] sm:$0xff] }
  0x3a   :  { %v318_v4 = vmax.f32 %v316_v48, %v317_v56  ;;  %v326_v5 = vmax.f32 %v324_v49, %v325_v59  ;;  %v334_v6 = vmax.f32 %v332_v50, %v333_v62  ;;  %v342_v9 = vmax.f32 %v340_v51, %v341_v63  ;;  %v91_v48 = vld [vmem:[%s1218_s0 + $0x298] sm:$0x1]  ;;  %v93_v62 = vld [vmem:[%s1218_s0 + $0x2a8] sm:$0x1]  ;;  %v94_v63 = vld [vmem:[%s1218_s0 + $0x2b0] sm:$0x1] }
  0x3b   :  { %v304_v10 = vmax.f32 %v302_v52, %v303_v0  ;;  %v312_v11 = vmax.f32 %v310_v53, %v311_v1  ;;  %v349_v12 = vrot.slane %v348_v2, 4  ;;  %v357_v13 = vrot.slane %v356_v3, 4  ;;  %v92_v53 = vld [vmem:[%s1218_s0 + $0x2a0] sm:$0x1] }
  0x3c   :  { %v319_v22 = vrot.slane %v318_v4, 2  ;;  %v327_v23 = vrot.slane %v326_v5, 2  ;;  %v335_v24 = vrot.slane %v334_v6, 2  ;;  %v343_v27 = vrot.slane %v342_v9, 2 }
  0x3d   :  { %v305_v28 = vrot.slane %v304_v10, 1  ;;  %v313_v29 = vrot.slane %v312_v11, 1  ;;  %v350_v30 = vmax.f32 %v348_v2, %v349_v12  ;;  %v358_v31 = vmax.f32 %v356_v3, %v357_v13  ;;  %v44_v12 = vld [vmem:[%s1218_s0 + $0x120] sm:$0xff]  ;;  %v45_v13 = vld [vmem:[%s1218_s0 + $0x128] sm:$0xff] }
  0x3e   :  { %v320_v34 = vmax.f32 %v318_v4, %v319_v22  ;;  %v328_v35 = vmax.f32 %v326_v5, %v327_v23  ;;  %v336_v40 = vmax.f32 %v334_v6, %v335_v24  ;;  %v344_v41 = vmax.f32 %v342_v9, %v343_v27  ;;  %v42_v4 = vld [vmem:[%s1218_s0 + $0x110] sm:$0xff]  ;;  %v43_v5 = vld [vmem:[%s1218_s0 + $0x118] sm:$0xff] }
  0x3f   :  { %v955_v49 = vmax.f32 %v304_v10, %v305_v28  ;;  %v957_v50 = vmax.f32 %v312_v11, %v313_v29  ;;  %v351_v51 = vrot.slane %v350_v30, 2  ;;  %v359_v52 = vrot.slane %v358_v31, 2  ;;  %v95_v22 = vld [vmem:[%s1218_s0 + $0x2b8] sm:$0x1]  ;;  %v96_v29 = vld [vmem:[%s1218_s0 + $0x2c0] sm:$0x1] }
  0x40   :  { %v321_v54 = vrot.slane %v320_v34, 1  ;;  %v329_v55 = vrot.slane %v328_v35, 1  ;;  %v337_v56 = vrot.slane %v336_v40, 1  ;;  %v345_v59 = vrot.slane %v344_v41, 1 }
  0x41   :  { %1223 = vst [vmem:[#allocation5_spill] sm:$0xff] %v955_v49  ;;  %v352_v0 = vmax.f32 %v350_v30, %v351_v51  ;;  %v360_v1 = vmax.f32 %v358_v31, %v359_v52  ;;  %v363_v2 = vsel %vm106_vm0, %v89_v32, -inf  ;;  %v371_v3 = vsel %vm106_vm0, %v90_v33, -inf }
  0x42   :  { %v976_v6 = vmax.f32 %v320_v34, %v321_v54  ;;  %v978_v9 = vmax.f32 %v328_v35, %v329_v55  ;;  %v980_v10 = vmax.f32 %v336_v40, %v337_v56  ;;  %v982_v11 = vmax.f32 %v344_v41, %v345_v59 }
  0x43   :  { %v353_v23 = vrot.slane %v352_v0, 1  ;;  %v361_v24 = vrot.slane %v360_v1, 1  ;;  %v364_v27 = vmax.f32 %v40_v42, %v363_v2  ;;  %v372_v28 = vmax.f32 %v41_v43, %v371_v3  ;;  %v46_v42 = vld [vmem:[%s1218_s0 + $0x130] sm:$0xff]  ;;  %v47_v43 = vld [vmem:[%s1218_s0 + $0x138] sm:$0xff] }
  0x44   :  { %v379_v30 = vsel %vm106_vm0, %v91_v48, -inf  ;;  %v387_v31 = vsel %vm106_vm0, %v92_v53, -inf  ;;  %v395_v32 = vsel %vm106_vm0, %v93_v62, -inf  ;;  %v403_v33 = vsel %vm106_vm0, %v94_v63, -inf }
  0x45   :  { %v1000_v34 = vmax.f32 %v352_v0, %v353_v23  ;;  %v1002_v35 = vmax.f32 %v360_v1, %v361_v24  ;;  %v365_v40 = vrot.slane %v364_v27, 4  ;;  %v373_v41 = vrot.slane %v372_v28, 4 }
  0x46   :  { %v380_v48 = vmax.f32 %v42_v4, %v379_v30  ;;  %v388_v51 = vmax.f32 %v43_v5, %v387_v31  ;;  %v396_v52 = vmax.f32 %v44_v12, %v395_v32  ;;  %v404_v53 = vmax.f32 %v45_v13, %v403_v33 }
  0x47   :  { %v366_v54 = vmax.f32 %v364_v27, %v365_v40  ;;  %v374_v55 = vmax.f32 %v372_v28, %v373_v41  ;;  %v411_v56 = vsel %vm106_vm0, %v95_v22, -inf  ;;  %v419_v59 = vsel %vm106_vm0, %v96_v29, -inf }
  0x48   :  { %v381_v62 = vrot.slane %v380_v48, 4  ;;  %v389_v63 = vrot.slane %v388_v51, 4  ;;  %v397_v0 = vrot.slane %v396_v52, 4  ;;  %v405_v1 = vrot.slane %v404_v53, 4 }
  0x49   :  { %v367_v2 = vrot.slane %v366_v54, 2  ;;  %v375_v3 = vrot.slane %v374_v55, 2  ;;  %v412_v23 = vmax.f32 %v46_v42, %v411_v56  ;;  %v420_v24 = vmax.f32 %v47_v43, %v419_v59  ;;  %v97_v42 = vld [vmem:[%s1218_s0 + $0x2c8] sm:$0x1]  ;;  %v98_v43 = vld [vmem:[%s1218_s0 + $0x2d0] sm:$0x1] }
  0x4a   :  { %v382_v49 = vmax.f32 %v380_v48, %v381_v62  ;;  %v390_v57 = vmax.f32 %v388_v51, %v389_v63  ;;  %v398_v4 = vmax.f32 %v396_v52, %v397_v0  ;;  %v406_v5 = vmax.f32 %v404_v53, %v405_v1  ;;  %v99_v56 = vld [vmem:[%s1218_s0 + $0x2d8] sm:$0x1]  ;;  %v100_v63 = vld [vmem:[%s1218_s0 + $0x2e0] sm:$0x1] }
  0x4b   :  { %v368_v12 = vmax.f32 %v366_v54, %v367_v2  ;;  %v376_v13 = vmax.f32 %v374_v55, %v375_v3  ;;  %v413_v27 = vrot.slane %v412_v23, 4  ;;  %v421_v28 = vrot.slane %v420_v24, 4  ;;  %v48_v54 = vld [vmem:[%s1218_s0 + $0x140] sm:$0xff]  ;;  %v49_v55 = vld [vmem:[%s1218_s0 + $0x148] sm:$0xff] }
  0x4c   :  { %v383_v30 = vrot.slane %v382_v49, 2  ;;  %v391_v22 = vrot.slane %v390_v57, 2  ;;  %v399_v31 = vrot.slane %v398_v4, 2  ;;  %v407_v29 = vrot.slane %v406_v5, 2 }
  0x4d   :  { %v369_v32 = vrot.slane %v368_v12, 1  ;;  %v377_v33 = vrot.slane %v376_v13, 1  ;;  %v414_v40 = vmax.f32 %v412_v23, %v413_v27  ;;  %v422_v41 = vmax.f32 %v420_v24, %v421_v28  ;;  %v101_v23 = vld [vmem:[%s1218_s0 + $0x2e8] sm:$0x1]  ;;  %v102_v24 = vld [vmem:[%s1218_s0 + $0x2f0] sm:$0x1] }
  0x4e   :  { %v384_v48 = vmax.f32 %v382_v49, %v383_v30  ;;  %v392_v51 = vmax.f32 %v390_v57, %v391_v22  ;;  %v400_v52 = vmax.f32 %v398_v4, %v399_v31  ;;  %v408_v53 = vmax.f32 %v406_v5, %v407_v29  ;;  %v50_v27 = vld [vmem:[%s1218_s0 + $0x150] sm:$0xff]  ;;  %v51_v28 = vld [vmem:[%s1218_s0 + $0x158] sm:$0xff] }
  0x4f   :  { %v1027_v59 = vmax.f32 %v368_v12, %v369_v32  ;;  %v1029_v62 = vmax.f32 %v376_v13, %v377_v33  ;;  %v415_v49 = vrot.slane %v414_v40, 2  ;;  %v423_v57 = vrot.slane %v422_v41, 2  ;;  %v52_v32 = vld [vmem:[%s1218_s0 + $0x160] sm:$0xff]  ;;  %v53_v33 = vld [vmem:[%s1218_s0 + $0x168] sm:$0xff] }
  0x50   :  { %v385_v0 = vrot.slane %v384_v48, 1  ;;  %v393_v1 = vrot.slane %v392_v51, 1  ;;  %v401_v2 = vrot.slane %v400_v52, 1  ;;  %v409_v3 = vrot.slane %v408_v53, 1 }
  0x51   :  { %1224 = vst [vmem:[#allocation6_spill] sm:$0xff] %v1027_v59  ;;  %v416_v4 = vmax.f32 %v414_v40, %v415_v49  ;;  %v424_v5 = vmax.f32 %v422_v41, %v423_v57  ;;  %v427_v12 = vsel %vm106_vm0, %v97_v42, -inf  ;;  %v435_v13 = vsel %vm106_vm0, %v98_v43, -inf  ;;  %v103_v40 = vld [vmem:[%s1218_s0 + $0x2f8] sm:$0x1] }
  0x52   :  { %v1048_v30 = vmax.f32 %v384_v48, %v385_v0  ;;  %v1050_v22 = vmax.f32 %v392_v51, %v393_v1  ;;  %v1052_v31 = vmax.f32 %v400_v52, %v401_v2  ;;  %v1054_v29 = vmax.f32 %v408_v53, %v409_v3  ;;  %v104_v51 = vld [vmem:[%s1218_s0 + $0x300] sm:$0x1] }
  0x53   :  { %v417_v41 = vrot.slane %v416_v4, 1  ;;  %v425_v42 = vrot.slane %v424_v5, 1  ;;  %v428_v43 = vmax.f32 %v48_v54, %v427_v12  ;;  %v436_v48 = vmax.f32 %v49_v55, %v435_v13  ;;  %v54_v54 = vld [vmem:[%s1218_s0 + $0x170] sm:$0xff]  ;;  %v55_v55 = vld [vmem:[%s1218_s0 + $0x178] sm:$0xff] }
  0x54   :  { %1225 = vst [vmem:[#allocation7_spill] sm:$0xff] %v1050_v22  ;;  %v443_v52 = vsel %vm106_vm0, %v99_v56, -inf  ;;  %v451_v53 = vsel %vm106_vm0, %v100_v63, -inf  ;;  %v459_v49 = vsel %vm106_vm0, %v101_v23, -inf  ;;  %v467_v57 = vsel %vm106_vm0, %v102_v24, -inf }
  0x55   :  { %1226 = vst [vmem:[#allocation8_spill] sm:$0xff] %v1052_v31  ;;  %v1072_v0 = vmax.f32 %v416_v4, %v417_v41  ;;  %v1074_v1 = vmax.f32 %v424_v5, %v425_v42  ;;  %v429_v2 = vrot.slane %v428_v43, 4  ;;  %v437_v3 = vrot.slane %v436_v48, 4 }
  0x56   :  { %1227 = vst [vmem:[#allocation9_spill] sm:$0xff] %v1054_v29  ;;  %v444_v56 = vmax.f32 %v50_v27, %v443_v52  ;;  %v452_v63 = vmax.f32 %v51_v28, %v451_v53  ;;  %v460_v12 = vmax.f32 %v52_v32, %v459_v49  ;;  %v468_v23 = vmax.f32 %v53_v33, %v467_v57 }
  0x57   :  { %1228 = vst [vmem:[#allocation10_spill] sm:$0xff] %v1072_v0  ;;  %v430_v13 = vmax.f32 %v428_v43, %v429_v2  ;;  %v438_v24 = vmax.f32 %v436_v48, %v437_v3  ;;  %v475_v4 = vsel %vm106_vm0, %v103_v40, -inf  ;;  %v483_v5 = vsel %vm106_vm0, %v104_v51, -inf }
  0x58   :  { %1229 = vst [vmem:[#allocation11_spill] sm:$0xff] %v1074_v1  ;;  %v445_v41 = vrot.slane %v444_v56, 4  ;;  %v453_v42 = vrot.slane %v452_v63, 4  ;;  %v461_v59 = vrot.slane %v460_v12, 4  ;;  %v469_v25 = vrot.slane %v468_v23, 4 }
  0x59   :  { %v431_v7 = vrot.slane %v430_v13, 2  ;;  %v439_v1 = vrot.slane %v438_v24, 2  ;;  %v476_v0 = vmax.f32 %v54_v54, %v475_v4  ;;  %v484_v29 = vmax.f32 %v55_v55, %v483_v5  ;;  %v105_v54 = vld [vmem:[%s1218_s0 + $0x308] sm:$0x1] }
  0x5a   :  { %v446_v31 = vmax.f32 %v444_v56, %v445_v41  ;;  %v454_v22 = vmax.f32 %v452_v63, %v453_v42  ;;  %v462_v27 = vmax.f32 %v460_v12, %v461_v59  ;;  %v470_v28 = vmax.f32 %v468_v23, %v469_v25  ;;  %v56_v23 = vld [vmem:[%s1218_s0 + $0x180] sm:$0xff] }
  0x5b   :  { %v432_v32 = vmax.f32 %v430_v13, %v431_v7  ;;  %v440_v33 = vmax.f32 %v438_v24, %v439_v1  ;;  %v477_v43 = vrot.slane %v476_v0, 4  ;;  %v485_v48 = vrot.slane %v484_v29, 4 }
  0x5c   :  { %v447_v52 = vrot.slane %v446_v31, 2  ;;  %v455_v40 = vrot.slane %v454_v22, 2  ;;  %v463_v53 = vrot.slane %v462_v27, 2  ;;  %v471_v51 = vrot.slane %v470_v28, 2 }
  0x5d   :  { %v433_v49 = vrot.slane %v432_v32, 1  ;;  %v441_v57 = vrot.slane %v440_v33, 1  ;;  %v478_v2 = vmax.f32 %v476_v0, %v477_v43  ;;  %v486_v3 = vmax.f32 %v484_v29, %v485_v48 }
  0x5e   :  { %v448_v55 = vmax.f32 %v446_v31, %v447_v52  ;;  %v456_v56 = vmax.f32 %v454_v22, %v455_v40  ;;  %v464_v59 = vmax.f32 %v462_v27, %v463_v53  ;;  %v472_v25 = vmax.f32 %v470_v28, %v471_v51 }
  0x5f   :  { %v1087_v7 = vmax.f32 %v432_v32, %v433_v49  ;;  %v1089_v1 = vmax.f32 %v440_v33, %v441_v57  ;;  %v479_v63 = vrot.slane %v478_v2, 2  ;;  %v487_v12 = vrot.slane %v486_v3, 2 }
  0x60   :  { %v449_v0 = vrot.slane %v448_v55, 1  ;;  %v457_v29 = vrot.slane %v456_v56, 1  ;;  %v465_v13 = vrot.slane %v464_v59, 1  ;;  %v473_v24 = vrot.slane %v472_v25, 1 }
  0x61   :  { %v480_v4 = vmax.f32 %v478_v2, %v479_v63  ;;  %v488_v5 = vmax.f32 %v486_v3, %v487_v12  ;;  %v491_v22 = vsel %vm106_vm0, %v105_v54, -inf  ;;  %v547_v31 = vrot.slane %v741_v8, 7 }
  0x62   :  { %v1096_v41 = vmax.f32 %v448_v55, %v449_v0  ;;  %v1098_v42 = vmax.f32 %v456_v56, %v457_v29  ;;  %v1100_v27 = vmax.f32 %v464_v59, %v465_v13  ;;  %v1102_v28 = vmax.f32 %v472_v25, %v473_v24  ;;  %v1232_v0 = vld [vmem:[#allocation9_spill] sm:$0xff]  ;;  %v1233_v29 = vld [vmem:[#allocation10_spill] sm:$0xff]  ;;  %v1234_v13 = vld [vmem:[#allocation11_spill] sm:$0xff] }
  0x63   :  { %v481_v32 = vrot.slane %v480_v4, 1  ;;  %v489_v33 = vrot.slane %v488_v5, 1  ;;  %v492_v43 = vmax.f32 %v56_v23, %v491_v22  ;;  %v548_v48 = vrot.slane %v752_v14, 6 }
  0x64   :  { %v549_v52 = vrot.slane %v754_v15, 5  ;;  %v550_v40 = vrot.slane %v762_v20, 4  ;;  %v551_v53 = vrot.slane %v764_v21, 3  ;;  %v552_v8 = vrot.slane %v784_v36, 2 }
  0x65   :  { %v1109_v51 = vmax.f32 %v480_v4, %v481_v32  ;;  %v1111_v49 = vmax.f32 %v488_v5, %v489_v33  ;;  %v493_v57 = vrot.slane %v492_v43, 4  ;;  %v553_v2 = vrot.slane %v786_v37, 1  ;;  %v1235_v32 = vld [vmem:[#allocation2_spill] sm:$0xff] }
  0x66   :  { %v554_v3 = vrot.slane %v813_v26, 7  ;;  %v555_v54 = vrot.slane %v832_v44, 6  ;;  %v556_v14 = vrot.slane %v834_v45, 5  ;;  %v557_v15 = vrot.slane %v836_v46, 4 }
  0x67   :  { %v494_v20 = vmax.f32 %v492_v43, %v493_v57  ;;  %v558_v21 = vrot.slane %v838_v47, 3  ;;  %v559_v36 = vrot.slane %v856_v60, 2  ;;  %v560_v55 = vrot.slane %v858_v61, 1  ;;  %v1237_v57 = vld [vmem:[#allocation4_spill] sm:$0xff] }
  0x68   :  { %v561_v56 = vrot.slane %v885_v58, 7  ;;  %v562_v59 = vrot.slane %v904_v16, 6  ;;  %v563_v37 = vrot.slane %v906_v17, 5  ;;  %v564_v26 = vrot.slane %v908_v18, 4 }
  0x69   :  { %v495_v44 = vrot.slane %v494_v20, 2  ;;  %v565_v45 = vrot.slane %v910_v19, 3  ;;  %v566_v46 = vrot.slane %v928_v38, 2  ;;  %v567_v25 = vrot.slane %v930_v39, 1  ;;  %v1230_v39 = vld [vmem:[#allocation7_spill] sm:$0xff] }
  0x6a   :  { %v568_v47 = vrot.slane %v957_v50, 7  ;;  %v569_v60 = vrot.slane %v976_v6, 6  ;;  %v570_v61 = vrot.slane %v978_v9, 5  ;;  %v571_v58 = vrot.slane %v980_v10, 4  ;;  %v1231_v50 = vld [vmem:[#allocation8_spill] sm:$0xff] }
  0x6b   :  { %v496_v16 = vmax.f32 %v494_v20, %v495_v44  ;;  %v572_v17 = vrot.slane %v982_v11, 3  ;;  %v573_v18 = vrot.slane %v1000_v34, 2  ;;  %v574_v63 = vrot.slane %v1002_v35, 1 }
  0x6c   :  { %v575_v19 = vrot.slane %v1029_v62, 7  ;;  %v576_v38 = vrot.slane %v1048_v30, 6  ;;  %v577_v12 = vrot.slane %v1230_v39, 5  ;;  %v578_v23 = vrot.slane %v1231_v50, 4 }
  0x6d   :  { %v497_v6 = vrot.slane %v496_v16, 1  ;;  %v579_v9 = vrot.slane %v1232_v0, 3  ;;  %v580_v10 = vrot.slane %v1233_v29, 2  ;;  %v581_v24 = vrot.slane %v1234_v13, 1 }
  0x6e   :  { %v582_v11 = vrot.slane %v1089_v1, 7  ;;  %v583_v34 = vrot.slane %v1096_v41, 6  ;;  %v584_v35 = vrot.slane %v1098_v42, 5  ;;  %v585_v62 = vrot.slane %v1100_v27, 4 }
  0x6f   :  { %v498_v30 = vmax.f32 %v496_v16, %v497_v6  ;;  %v586_v4 = vrot.slane %v1102_v28, 3  ;;  %v587_v5 = vrot.slane %v1109_v51, 2  ;;  %v588_v22 = vrot.slane %v1111_v49, 1  ;;  %v1236_v28 = vld [vmem:[#allocation3_spill] sm:$0xff] }
  0x70   :  { %v589_v33 = vsel %vm106_vm0, %v1235_v32, %v547_v31  ;;  %v591_v1 = vsel %vm590_vm1, %v548_v48, %v549_v52  ;;  %v595_v41 = vsel %vm594_vm3, %v550_v40, %v551_v53  ;;  %v597_v27 = vsel %vm596_vm4, %v552_v8, %v553_v2 }
  0x71   :  { %v593_v42 = vsel %vm592_vm2, %v589_v33, %v591_v1  ;;  %vm600_vm6 = vcmask 1043456   ;;  %v602_v43 = vsel %vm106_vm0, %v1236_v28, %v554_v3  ;;  %v599_v51 = vsel %vm598_vm5, %v595_v41, %v597_v27 }
  0x72   :  { %v603_v31 = vsel %vm590_vm1, %v555_v54, %v556_v14  ;;  %v605_v49 = vsel %vm594_vm3, %v557_v15, %v558_v21  ;;  %v606_v48 = vsel %vm596_vm4, %v559_v36, %v560_v55  ;;  %v601_v52 = vsel %vm600_vm6, %v593_v42, %v599_v51  ;;  %v1238_v21 = vld [vmem:[#allocation5_spill] sm:$0xff] }
  0x73   :  { %v604_v40 = vsel %vm592_vm2, %v602_v43, %v603_v31  ;;  %v607_v53 = vsel %vm598_vm5, %v605_v49, %v606_v48  ;;  %v609_v8 = vsel %vm106_vm0, %v1237_v57, %v561_v56  ;;  %v610_v3 = vsel %vm590_vm1, %v562_v59, %v563_v37  ;;  %643 = vst [vmem:[%s1219_s1] sm:$0xff] %v601_v52 }
  0x74   :  { %v608_v2 = vsel %vm600_vm6, %v604_v40, %v607_v53  ;;  %v612_v20 = vsel %vm594_vm3, %v564_v26, %v565_v45  ;;  %v613_v54 = vsel %vm596_vm4, %v566_v46, %v567_v25  ;;  %v611_v14 = vsel %vm592_vm2, %v609_v8, %v610_v3  ;;  %v1239_v45 = vld [vmem:[#allocation6_spill] sm:$0xff] }
  0x75   :  { %v614_v15 = vsel %vm598_vm5, %v612_v20, %v613_v54  ;;  %v616_v36 = vsel %vm106_vm0, %v1238_v21, %v568_v47  ;;  %v617_v55 = vsel %vm590_vm1, %v569_v60, %v570_v61  ;;  %644 = vst [vmem:[%s1219_s1 + $0x8] sm:$0xff] %v608_v2  ;;  %v619_v37 = vsel %vm594_vm3, %v571_v58, %v572_v17 }
  0x76   :  { %v615_v56 = vsel %vm600_vm6, %v611_v14, %v614_v15  ;;  %v618_v59 = vsel %vm592_vm2, %v616_v36, %v617_v55  ;;  %v620_v26 = vsel %vm596_vm4, %v573_v18, %v574_v63  ;;  %v623_v46 = vsel %vm106_vm0, %v1239_v45, %v575_v19 }
  0x77   :  { %v621_v44 = vsel %vm598_vm5, %v619_v37, %v620_v26  ;;  %v624_v25 = vsel %vm590_vm1, %v576_v38, %v577_v12  ;;  %v626_v47 = vsel %vm594_vm3, %v578_v23, %v579_v9  ;;  %645 = vst [vmem:[%s1219_s1 + $0x10] sm:$0xff] %v615_v56  ;;  %v627_v58 = vsel %vm596_vm4, %v580_v10, %v581_v24 }
  0x78   :  { %v622_v60 = vsel %vm600_vm6, %v618_v59, %v621_v44  ;;  %v625_v61 = vsel %vm592_vm2, %v623_v46, %v624_v25  ;;  %v630_v16 = vsel %vm106_vm0, %v1087_v7, %v582_v11  ;;  %v628_v17 = vsel %vm598_vm5, %v626_v47, %v627_v58 }
  0x79   :  { %v631_v18 = vsel %vm590_vm1, %v583_v34, %v584_v35  ;;  %v633_v63 = vsel %vm594_vm3, %v585_v62, %v586_v4  ;;  %v634_v19 = vsel %vm596_vm4, %v587_v5, %v588_v22  ;;  %646 = vst [vmem:[%s1219_s1 + $0x18] sm:$0xff] %v622_v60  ;;  %v629_v38 = vsel %vm600_vm6, %v625_v61, %v628_v17 }
  0x7a   :  { %v632_v39 = vsel %vm592_vm2, %v630_v16, %v631_v18  ;;  %v635_v12 = vsel %vm598_vm5, %v633_v63, %v634_v19  ;;  %v649_v50 = vlaneseq  ;;  %647 = vst [vmem:[%s1219_s1 + $0x20] sm:$0xff] %v629_v38 }
  0x7b   :  { %v636_v7 = vsel %vm600_vm6, %v632_v39, %v635_v12 }
  0x7c   :  { %648 = vst [vmem:[%s1219_s1 + $0x28] sm:$0xff] %v636_v7  ;;  %vm651_vm7 = vcmp.lt.s32.totalorder %v649_v50, 128 }
  0x7d   :  { %653 = vst.msk [vmem:[%s1219_s1 + $0x30] sm:$0x1] %vm651_vm7, %v498_v30 }

// kernel: densenet_forward.14
= control target key start
LH: loop header
LB: loop body
LE: loop exit
PB: predicated region body
PF: predicated region fallthrough
CT: control target
= control target key end

     0   :  { %v253_v0 = vmov 0   ;;  %vm81_vm0 = vcmask 130048   ;;  %vm231_vm1 = vcmask 64512   ;;  %s369_s3 = inlined_call_operand.vmem [shape: f32[16,1], index: 3, kind: input, shape index: {}]   ;;  %s370_s2 = inlined_call_operand.vmem [shape: f32[16,1], index: 2, kind: input, shape index: {}]   ;;  %s371_s5 = inlined_call_operand.vmem [shape: f32[16,1], index: 5, kind: input, shape index: {}]   ;;  %s372_s4 = inlined_call_operand.vmem [shape: f32[16,1], index: 4, kind: input, shape index: {}]   ;;  %s373_s0 = inlined_call_operand.vmem [shape: f32[16,392], index: 0, kind: input, shape index: {}]   ;;  %s374_s1 = inlined_call_operand.vmem [shape: f32[16,16], index: 1, kind: input, shape index: {}]   ;;  %s375_s6 = inlined_call_operand.vmem [shape: f32[16,392], index: 6, kind: output, shape index: {}]  }
   0x1   :  { %251 = vset.pattern.permute.xlu1 %v253_v0  ;;  %250 = vset.pattern.permute.xlu0 %v253_v0  ;;  %v52_v1 = vld [vmem:[%s369_s3 + $0x8] sm:$0xff]  ;;  %v51_v3 = vld [vmem:[%s369_s3] sm:$0xff]  ;;  %v29_v10 = vld [vmem:[%s373_s0 + $0x30] sm:$0xff] }
   0x2   :  { %v32_v2 = vld [vmem:[%s370_s2 + $0x8] sm:$0xff]  ;;  %60 = vperm.xlu1 %251, %v52_v1   ;;  %252 = vset.pattern.permute.xlu2 %v253_v0  ;;  %v31_v4 = vld [vmem:[%s370_s2] sm:$0xff]  ;;  %v30_v11 = vld [vmem:[%s373_s0 + $0x38] sm:$0xff] }
   0x3   :  { %40 = vperm.xlu0 %250, %v32_v2   ;;  %v201_v5 = vld [vmem:[%s371_s5 + $0x8] sm:$0xff]  ;;  %v200_v6 = vld [vmem:[%s371_s5] sm:$0xff]  ;;  %v25_v29 = vld [vmem:[%s373_s0 + $0x10] sm:$0xff] }
   0x4   :  { %v180_v7 = vld [vmem:[%s372_s4] sm:$0xff]  ;;  %v28_v9 = vld [vmem:[%s373_s0 + $0x28] sm:$0xff]  ;;  %v26_v30 = vld [vmem:[%s373_s0 + $0x18] sm:$0xff] }
   0x5   :  { %184 = vperm.xlu2 %252, %v180_v7   ;;  %v27_v8 = vld [vmem:[%s373_s0 + $0x20] sm:$0xff]  ;;  %v181_v14 = vld [vmem:[%s372_s4 + $0x8] sm:$0xff] }
   0x6   :  { %v23_v27 = vld [vmem:[%s373_s0] sm:$0xff]  ;;  %v24_v28 = vld [vmem:[%s373_s0 + $0x8] sm:$0xff] }
   0x7   :  { %v79_v45 = vld [vmem:[%s374_s1] sm:$0xff]  ;;  %v80_v46 = vld [vmem:[%s374_s1 + $0x8] sm:$0xff] }
   0xa   :  { %55 = vperm.xlu1 %251, %v51_v3  }
   0xb   :  { %35 = vperm.xlu0 %250, %v31_v4  }
   0xd   :  { %189 = vperm.xlu2 %252, %v181_v14  }
  0x12   :  { %209 = vperm.xlu1 %251, %v201_v5  }
  0x13   :  { %204 = vperm.xlu0 %250, %v200_v6  }
  0x5f   :  { %v185_v47 = vpop.permute.xlu2 %184 }
  0x67   :  { %v190_v57 = vpop.permute.xlu2 %189 }
  0x74   :  { %v61_v12 = vpop.permute.xlu1 %60 }
  0x75   :  { %v41_v13 = vpop.permute.xlu0 %40 }
  0x76   :  { %v47_v15 = vmul.f32 %v41_v13, %v27_v8  ;;  %v48_v16 = vmul.f32 %v41_v13, %v28_v9  ;;  %v49_v17 = vmul.f32 %v41_v13, %v29_v10  ;;  %v50_v18 = vmul.f32 %v41_v13, %v30_v11 }
  0x78   :  { %v67_v19 = vadd.f32 %v61_v12, %v47_v15  ;;  %v68_v20 = vadd.f32 %v61_v12, %v48_v16  ;;  %v69_v21 = vadd.f32 %v61_v12, %v49_v17  ;;  %v70_v22 = vadd.f32 %v61_v12, %v50_v18 }
  0x7a   :  { %v75_v23 = vmax.f32 %v67_v19, 0.0  ;;  %v76_v24 = vmax.f32 %v68_v20, 0.0  ;;  %v77_v25 = vmax.f32 %v69_v21, 0.0  ;;  %v78_v26 = vmax.f32 %v70_v22, 0.0 }
  0x7c   :  { %102 = vmatpush.msra.mxu0 %v75_v23  ;;  %125 = vmatpush.msra.mxu1 %v76_v24  ;;  %v56_v36 = vpop.permute.xlu1 %55 }
  0x7d   :  { %148 = vmatpush.msra.mxu2 %v77_v25  ;;  %171 = vmatpush.msra.mxu3 %v78_v26  ;;  %v36_v31 = vpop.permute.xlu0 %35 }
  0x7e   :  { %v43_v32 = vmul.f32 %v36_v31, %v23_v27  ;;  %v44_v33 = vmul.f32 %v36_v31, %v24_v28  ;;  %v45_v34 = vmul.f32 %v36_v31, %v25_v29  ;;  %v46_v35 = vmul.f32 %v36_v31, %v26_v30 }
  0x80   :  { %v63_v37 = vadd.f32 %v56_v36, %v43_v32  ;;  %v64_v38 = vadd.f32 %v56_v36, %v44_v33  ;;  %v65_v39 = vadd.f32 %v56_v36, %v45_v34  ;;  %v66_v40 = vadd.f32 %v56_v36, %v46_v35 }
  0x82   :  { %v71_v41 = vmax.f32 %v63_v37, 0.0  ;;  %v72_v42 = vmax.f32 %v64_v38, 0.0  ;;  %v73_v43 = vmax.f32 %v65_v39, 0.0  ;;  %v74_v44 = vmax.f32 %v66_v40, 0.0 }
  0x84   :  { %103 = vmatpush.msra.mxu0 %v71_v41  ;;  %126 = vmatpush.msra.mxu1 %v72_v42  ;;  %v210_v2 = vpop.permute.xlu1 %209 }
  0x85   :  { %149 = vmatpush.msra.mxu2 %v73_v43  ;;  %172 = vmatpush.msra.mxu3 %v74_v44  ;;  %v205_v52 = vpop.permute.xlu0 %204 }
  0x86   :  { %241 = vmatmul.msk.f32.vlgmr.msra.gmra.mxu0 %vm81_vm0, %v79_v45  ;;  %243 = vmatmul.msk.f32.vlgmr.msra.gmra.mxu1 %vm81_vm0, %v79_v45 }
  0x87   :  { %245 = vmatmul.msk.f32.vlgmr.msra.gmra.mxu2 %vm81_vm0, %v79_v45  ;;  %247 = vmatmul.msk.f32.vlgmr.msra.gmra.mxu3 %vm81_vm0, %v79_v45 }
  0x8e   :  { %242 = vmatmul.msk.f32.gmra.mxu0 %vm81_vm0, %v80_v46  ;;  %244 = vmatmul.msk.f32.gmra.mxu1 %vm81_vm0, %v80_v46 }
  0x8f   :  { %246 = vmatmul.msk.f32.gmra.mxu2 %vm81_vm0, %v80_v46  ;;  %248 = vmatmul.msk.f32.gmra.mxu3 %vm81_vm0, %v80_v46 }
 0x103   :  { %v105_v48 = vpop.f32.mrf.mxu0  ;;  %v128_v49 = vpop.f32.mrf.mxu1 }
 0x104   :  { %v192_v50 = vmul.f32 %v185_v47, %v105_v48  ;;  %v193_v51 = vmul.f32 %v185_v47, %v128_v49 }
 0x106   :  { %v212_v53 = vadd.f32 %v205_v52, %v192_v50  ;;  %v213_v54 = vadd.f32 %v205_v52, %v193_v51 }
 0x108   :  { %v220_v55 = vmax.f32 %v212_v53, 0.0  ;;  %v221_v56 = vmax.f32 %v213_v54, 0.0 }
 0x10a   :  { %228 = vst [vmem:[%s375_s6] sm:$0xff] %v220_v55  ;;  %v151_v58 = vpop.f32.mrf.mxu2  ;;  %v174_v59 = vpop.f32.mrf.mxu3 }
 0x10b   :  { %229 = vst [vmem:[%s375_s6 + $0x8] sm:$0xff] %v221_v56  ;;  %v194_v60 = vmul.f32 %v185_v47, %v151_v58  ;;  %v195_v61 = vmul.f32 %v185_v47, %v174_v59  ;;  %v108_v62 = vpop.f32.mrf.mxu0  ;;  %v131_v63 = vpop.f32.mrf.mxu1 }
 0x10c   :  { %v196_v0 = vmul.f32 %v190_v57, %v108_v62  ;;  %v197_v1 = vmul.f32 %v190_v57, %v131_v63 }
 0x10d   :  { %v214_v3 = vadd.f32 %v205_v52, %v194_v60  ;;  %v215_v4 = vadd.f32 %v205_v52, %v195_v61 }
 0x10e   :  { %v216_v5 = vadd.f32 %v210_v2, %v196_v0  ;;  %v217_v6 = vadd.f32 %v210_v2, %v197_v1 }
 0x10f   :  { %v222_v7 = vmax.f32 %v214_v3, 0.0  ;;  %v223_v8 = vmax.f32 %v215_v4, 0.0 }
 0x110   :  { %v224_v9 = vmax.f32 %v216_v5, 0.0  ;;  %v225_v10 = vmax.f32 %v217_v6, 0.0 }
 0x111   :  { %230 = vst [vmem:[%s375_s6 + $0x10] sm:$0xff] %v222_v7 }
 0x112   :  { %232 = vst.msk [vmem:[%s375_s6 + $0x18] sm:$0xff] %vm231_vm1, %v223_v8  ;;  %v154_v11 = vpop.f32.mrf.mxu2  ;;  %v177_v12 = vpop.f32.mrf.mxu3 }
 0x113   :  { %233 = vst [vmem:[%s375_s6 + $0x20] sm:$0xff] %v224_v9  ;;  %v198_v13 = vmul.f32 %v190_v57, %v154_v11  ;;  %v199_v14 = vmul.f32 %v190_v57, %v177_v12 }
 0x114   :  { %234 = vst [vmem:[%s375_s6 + $0x28] sm:$0xff] %v225_v10 }
 0x115   :  { %v218_v15 = vadd.f32 %v210_v2, %v198_v13  ;;  %v219_v16 = vadd.f32 %v210_v2, %v199_v14 }
 0x117   :  { %v226_v17 = vmax.f32 %v218_v15, 0.0  ;;  %v227_v18 = vmax.f32 %v219_v16, 0.0 }
 0x119   :  { %235 = vst [vmem:[%s375_s6 + $0x30] sm:$0xff] %v226_v17 }
 0x11a   :  { %236 = vst.msk [vmem:[%s375_s6 + $0x38] sm:$0xff] %vm231_vm1, %v227_v18 }

// kernel: densenet_forward.15
= control target key start
LH: loop header
LB: loop body
LE: loop exit
PB: predicated region body
PF: predicated region fallthrough
CT: control target
= control target key end

     0   :  { %vm85_vm0 = vcmask 130048   ;;  %vm252_vm1 = vcmask 64512   ;;  %s515_s0 = inlined_call_operand.vmem [shape: f32[144,392], index: 0, kind: input, shape index: {}]   ;;  %s516_s1 = inlined_call_operand.vmem [shape: f32[8,144], index: 1, kind: input, shape index: {}]   ;;  %s517_s2 = inlined_call_operand.vmem [shape: f32[8,392], index: 2, kind: output, shape index: {}]  }
   0x1   :  { %v72_v0 = vld [vmem:[%s515_s0 + $0x1e8] sm:$0xff]  ;;  %v79_v2 = vld [vmem:[%s515_s0 + $0x220] sm:$0xff]  ;;  %v81_v4 = vld [vmem:[%s515_s0 + $0x230] sm:$0xff] }
   0x2   :  { %v68_v1 = vld [vmem:[%s515_s0 + $0x1c8] sm:$0xff]  ;;  %129 = vmatpush.msra.mxu2 %v72_v0  ;;  %123 = vmatpush.msra.mxu1 %v79_v2  ;;  %v75_v3 = vld [vmem:[%s515_s0 + $0x200] sm:$0xff]  ;;  %v73_v7 = vld [vmem:[%s515_s0 + $0x1f0] sm:$0xff] }
   0x3   :  { %v64_v5 = vld [vmem:[%s515_s0 + $0x1a8] sm:$0xff]  ;;  %203 = vmatpush.msra.mxu3 %v81_v4  ;;  %v71_v6 = vld [vmem:[%s515_s0 + $0x1e0] sm:$0xff]  ;;  %v77_v8 = vld [vmem:[%s515_s0 + $0x210] sm:$0xff] }
   0x4   :  { %130 = vmatpush.msra.mxu2 %v68_v1  ;;  %124 = vmatpush.msra.mxu1 %v75_v3  ;;  %v67_v9 = vld [vmem:[%s515_s0 + $0x1c0] sm:$0xff]  ;;  %v60_v10 = vld [vmem:[%s515_s0 + $0x188] sm:$0xff]  ;;  %v69_v11 = vld [vmem:[%s515_s0 + $0x1d0] sm:$0xff] }
   0x5   :  { %89 = vmatpush.msra.mxu0 %v71_v6  ;;  %v74_v12 = vld [vmem:[%s515_s0 + $0x1f8] sm:$0xff]  ;;  %204 = vmatpush.msra.mxu3 %v77_v8  ;;  %v63_v13 = vld [vmem:[%s515_s0 + $0x1a0] sm:$0xff]  ;;  %v65_v14 = vld [vmem:[%s515_s0 + $0x1b0] sm:$0xff] }
   0x6   :  { %169 = vmatpush.msrb.mxu1 %v73_v7  ;;  %131 = vmatpush.msra.mxu2 %v64_v5  ;;  %v56_v15 = vld [vmem:[%s515_s0 + $0x168] sm:$0xff]  ;;  %v70_v16 = vld [vmem:[%s515_s0 + $0x1d8] sm:$0xff]  ;;  %v59_v17 = vld [vmem:[%s515_s0 + $0x180] sm:$0xff] }
   0x7   :  { %90 = vmatpush.msra.mxu0 %v67_v9  ;;  %209 = vmatpush.msrb.mxu3 %v74_v12  ;;  %v61_v18 = vld [vmem:[%s515_s0 + $0x190] sm:$0xff]  ;;  %v52_v19 = vld [vmem:[%s515_s0 + $0x148] sm:$0xff]  ;;  %v66_v20 = vld [vmem:[%s515_s0 + $0x1b8] sm:$0xff] }
   0x8   :  { %170 = vmatpush.msrb.mxu1 %v69_v11  ;;  %132 = vmatpush.msra.mxu2 %v60_v10  ;;  %v55_v21 = vld [vmem:[%s515_s0 + $0x160] sm:$0xff]  ;;  %v57_v22 = vld [vmem:[%s515_s0 + $0x170] sm:$0xff]  ;;  %v48_v23 = vld [vmem:[%s515_s0 + $0x128] sm:$0xff] }
   0x9   :  { %91 = vmatpush.msra.mxu0 %v63_v13  ;;  %210 = vmatpush.msrb.mxu3 %v70_v16  ;;  %v62_v24 = vld [vmem:[%s515_s0 + $0x198] sm:$0xff]  ;;  %v51_v25 = vld [vmem:[%s515_s0 + $0x140] sm:$0xff]  ;;  %v53_v26 = vld [vmem:[%s515_s0 + $0x150] sm:$0xff] }
   0xa   :  { %171 = vmatpush.msrb.mxu1 %v65_v14  ;;  %133 = vmatpush.msra.mxu2 %v56_v15  ;;  %v44_v27 = vld [vmem:[%s515_s0 + $0x108] sm:$0xff]  ;;  %v58_v28 = vld [vmem:[%s515_s0 + $0x178] sm:$0xff]  ;;  %v47_v29 = vld [vmem:[%s515_s0 + $0x120] sm:$0xff] }
   0xb   :  { %92 = vmatpush.msra.mxu0 %v59_v17  ;;  %211 = vmatpush.msrb.mxu3 %v66_v20  ;;  %v49_v30 = vld [vmem:[%s515_s0 + $0x130] sm:$0xff]  ;;  %v40_v31 = vld [vmem:[%s515_s0 + $0xe8] sm:$0xff]  ;;  %v54_v32 = vld [vmem:[%s515_s0 + $0x158] sm:$0xff] }
   0xc   :  { %172 = vmatpush.msrb.mxu1 %v61_v18  ;;  %134 = vmatpush.msra.mxu2 %v52_v19  ;;  %v43_v33 = vld [vmem:[%s515_s0 + $0x100] sm:$0xff]  ;;  %v45_v34 = vld [vmem:[%s515_s0 + $0x110] sm:$0xff]  ;;  %v36_v35 = vld [vmem:[%s515_s0 + $0xc8] sm:$0xff] }
   0xd   :  { %93 = vmatpush.msra.mxu0 %v55_v21  ;;  %212 = vmatpush.msrb.mxu3 %v62_v24  ;;  %v50_v36 = vld [vmem:[%s515_s0 + $0x138] sm:$0xff]  ;;  %v39_v37 = vld [vmem:[%s515_s0 + $0xe0] sm:$0xff]  ;;  %v41_v38 = vld [vmem:[%s515_s0 + $0xf0] sm:$0xff] }
   0xe   :  { %173 = vmatpush.msrb.mxu1 %v57_v22  ;;  %135 = vmatpush.msra.mxu2 %v48_v23  ;;  %v32_v39 = vld [vmem:[%s515_s0 + $0xa8] sm:$0xff]  ;;  %v46_v40 = vld [vmem:[%s515_s0 + $0x118] sm:$0xff]  ;;  %v35_v41 = vld [vmem:[%s515_s0 + $0xc0] sm:$0xff] }
   0xf   :  { %94 = vmatpush.msra.mxu0 %v51_v25  ;;  %213 = vmatpush.msrb.mxu3 %v58_v28  ;;  %v37_v42 = vld [vmem:[%s515_s0 + $0xd0] sm:$0xff]  ;;  %v28_v43 = vld [vmem:[%s515_s0 + $0x88] sm:$0xff]  ;;  %v42_v44 = vld [vmem:[%s515_s0 + $0xf8] sm:$0xff] }
  0x10   :  { %174 = vmatpush.msrb.mxu1 %v53_v26  ;;  %136 = vmatpush.msra.mxu2 %v44_v27  ;;  %v31_v45 = vld [vmem:[%s515_s0 + $0xa0] sm:$0xff]  ;;  %v33_v46 = vld [vmem:[%s515_s0 + $0xb0] sm:$0xff]  ;;  %v24_v47 = vld [vmem:[%s515_s0 + $0x68] sm:$0xff] }
  0x11   :  { %95 = vmatpush.msra.mxu0 %v47_v29  ;;  %214 = vmatpush.msrb.mxu3 %v54_v32  ;;  %v38_v48 = vld [vmem:[%s515_s0 + $0xd8] sm:$0xff]  ;;  %v27_v49 = vld [vmem:[%s515_s0 + $0x80] sm:$0xff]  ;;  %v29_v50 = vld [vmem:[%s515_s0 + $0x90] sm:$0xff] }
  0x12   :  { %175 = vmatpush.msrb.mxu1 %v49_v30  ;;  %137 = vmatpush.msra.mxu2 %v40_v31  ;;  %v20_v51 = vld [vmem:[%s515_s0 + $0x48] sm:$0xff]  ;;  %v34_v52 = vld [vmem:[%s515_s0 + $0xb8] sm:$0xff]  ;;  %v23_v54 = vld [vmem:[%s515_s0 + $0x60] sm:$0xff] }
  0x13   :  { %96 = vmatpush.msra.mxu0 %v43_v33  ;;  %215 = vmatpush.msrb.mxu3 %v50_v36  ;;  %v84_v53 = vld [vmem:[%s516_s1 + $0x8] sm:$0xff]  ;;  %v25_v56 = vld [vmem:[%s515_s0 + $0x70] sm:$0xff]  ;;  %v30_v57 = vld [vmem:[%s515_s0 + $0x98] sm:$0xff] }
  0x14   :  { %176 = vmatpush.msrb.mxu1 %v45_v34  ;;  %138 = vmatpush.msra.mxu2 %v36_v35  ;;  %v16_v55 = vld [vmem:[%s515_s0 + $0x28] sm:$0xff]  ;;  %v19_v58 = vld [vmem:[%s515_s0 + $0x40] sm:$0xff]  ;;  %v21_v61 = vld [vmem:[%s515_s0 + $0x50] sm:$0xff] }
  0x15   :  { %97 = vmatpush.msra.mxu0 %v39_v37  ;;  %216 = vmatpush.msrb.mxu3 %v46_v40  ;;  %v12_v59 = vld [vmem:[%s515_s0 + $0x8] sm:$0xff]  ;;  %v83_v60 = vld [vmem:[%s516_s1] sm:$0xff]  ;;  %v26_v63 = vld [vmem:[%s515_s0 + $0x78] sm:$0xff] }
  0x16   :  { %177 = vmatpush.msrb.mxu1 %v41_v38  ;;  %139 = vmatpush.msra.mxu2 %v32_v39  ;;  %v80_v62 = vld [vmem:[%s515_s0 + $0x228] sm:$0xff]  ;;  %v15_v0 = vld [vmem:[%s515_s0 + $0x20] sm:$0xff]  ;;  %v17_v1 = vld [vmem:[%s515_s0 + $0x30] sm:$0xff] }
  0x17   :  { %98 = vmatpush.msra.mxu0 %v35_v41  ;;  %217 = vmatpush.msrb.mxu3 %v42_v44  ;;  %v22_v2 = vld [vmem:[%s515_s0 + $0x58] sm:$0xff]  ;;  %v76_v3 = vld [vmem:[%s515_s0 + $0x208] sm:$0xff]  ;;  %v11_v4 = vld [vmem:[%s515_s0] sm:$0xff] }
  0x18   :  { %178 = vmatpush.msrb.mxu1 %v37_v42  ;;  %140 = vmatpush.msra.mxu2 %v28_v43  ;;  %v13_v5 = vld [vmem:[%s515_s0 + $0x10] sm:$0xff]  ;;  %v18_v6 = vld [vmem:[%s515_s0 + $0x38] sm:$0xff] }
  0x19   :  { %99 = vmatpush.msra.mxu0 %v31_v45  ;;  %218 = vmatpush.msrb.mxu3 %v38_v48  ;;  %v82_v7 = vld [vmem:[%s515_s0 + $0x238] sm:$0xff] }
  0x1a   :  { %179 = vmatpush.msrb.mxu1 %v33_v46  ;;  %141 = vmatpush.msra.mxu2 %v24_v47  ;;  %v14_v8 = vld [vmem:[%s515_s0 + $0x18] sm:$0xff] }
  0x1b   :  { %100 = vmatpush.msra.mxu0 %v27_v49  ;;  %219 = vmatpush.msrb.mxu3 %v34_v52  ;;  %v78_v9 = vld [vmem:[%s515_s0 + $0x218] sm:$0xff] }
  0x1c   :  { %180 = vmatpush.msrb.mxu1 %v29_v50  ;;  %142 = vmatpush.msra.mxu2 %v20_v51 }
  0x1d   :  { %258 = vmatmul.msk.f32.vlgmr.msra.gmra.mxu1 %vm85_vm0, %v84_v53  ;;  %101 = vmatpush.msra.mxu0 %v23_v54 }
  0x1e   :  { %143 = vmatpush.msra.mxu2 %v16_v55  ;;  %181 = vmatpush.msrb.mxu1 %v25_v56 }
  0x1f   :  { %220 = vmatpush.msrb.mxu3 %v30_v57  ;;  %102 = vmatpush.msra.mxu0 %v19_v58 }
  0x20   :  { %144 = vmatpush.msra.mxu2 %v12_v59  ;;  %260 = vmatmul.msk.f32.vlgmr.msra.gmra.mxu3 %vm85_vm0, %v84_v53 }
  0x21   :  { %145 = vmatmul.f32.vlgmr.msra.gmra.mxu2 %v83_v60  ;;  %182 = vmatpush.msrb.mxu1 %v21_v61 }
  0x22   :  { %163 = vmatpush.msrb.mxu2 %v80_v62  ;;  %221 = vmatpush.msrb.mxu3 %v26_v63 }
  0x23   :  { %103 = vmatpush.msra.mxu0 %v15_v0  ;;  %183 = vmatpush.msrb.mxu1 %v17_v1 }
  0x24   :  { %222 = vmatpush.msrb.mxu3 %v22_v2  ;;  %164 = vmatpush.msrb.mxu2 %v76_v3 }
  0x25   :  { %104 = vmatpush.msra.mxu0 %v11_v4  ;;  %184 = vmatpush.msrb.mxu1 %v13_v5 }
  0x26   :  { %223 = vmatpush.msrb.mxu3 %v18_v6  ;;  %105 = vmatmul.f32.vlgmr.msra.gmra.mxu0 %v83_v60 }
  0x27   :  { %185 = vmatmul.f32.vlgmr.msrb.gmra.mxu1 %v83_v60  ;;  %243 = vmatpush.msrb.mxu0 %v82_v7 }
  0x28   :  { %224 = vmatpush.msrb.mxu3 %v14_v8 }
  0x29   :  { %259 = vmatmul.msk.f32.vlgmr.msrb.gmra.mxu2 %vm85_vm0, %v84_v53  ;;  %225 = vmatmul.f32.vlgmr.msrb.gmra.mxu3 %v83_v60 }
  0x2a   :  { %244 = vmatpush.msrb.mxu0 %v78_v9 }
  0x2e   :  { %261 = vmatmul.msk.f32.vlgmr.msrb.gmra.mxu0 %vm85_vm0, %v84_v53 }
  0x9a   :  { %v126_v10 = vpop.f32.mrf.mxu1 }
  0xa3   :  { %v106_v11 = vpop.f32.mrf.mxu0  ;;  %v206_v12 = vpop.f32.mrf.mxu3 }
  0xa4   :  { %v127_v13 = vadd.f32 %v126_v10, %v106_v11  ;;  %v146_v14 = vpop.f32.mrf.mxu2  ;;  %v186_v15 = vpop.f32.mrf.mxu1 }
  0xa5   :  { %v207_v16 = vadd.f32 %v206_v12, %v186_v15 }
  0xa6   :  { %249 = vst [vmem:[%s517_s2] sm:$0xff] %v127_v13 }
  0xa7   :  { %251 = vst [vmem:[%s517_s2 + $0x10] sm:$0xff] %v207_v16 }
  0xab   :  { %v246_v17 = vpop.f32.mrf.mxu0 }
  0xac   :  { %v166_v18 = vpop.f32.mrf.mxu2  ;;  %v226_v19 = vpop.f32.mrf.mxu3 }
  0xad   :  { %v167_v20 = vadd.f32 %v166_v18, %v146_v14  ;;  %v247_v21 = vadd.f32 %v246_v17, %v226_v19 }
  0xaf   :  { %250 = vst [vmem:[%s517_s2 + $0x8] sm:$0xff] %v167_v20 }
  0xb0   :  { %253 = vst.msk [vmem:[%s517_s2 + $0x18] sm:$0xff] %vm252_vm1, %v247_v21 }

// kernel: densenet_forward.16
= control target key start
LH: loop header
LB: loop body
LE: loop exit
PB: predicated region body
PF: predicated region fallthrough
CT: control target
= control target key end

     0   :  { %v401_v0 = vmov 0   ;;  %vm123_vm0 = vcmask 64512   ;;  %vm222_vm1 = vcmask 130048   ;;  %s569_s6 = inlined_call_operand.vmem [shape: f32[8,1], index: 6, kind: input, shape index: {}]   ;;  %s570_s4 = inlined_call_operand.vmem [shape: f32[16,1], index: 4, kind: input, shape index: {}]   ;;  %s571_s5 = inlined_call_operand.vmem [shape: f32[16,1], index: 5, kind: input, shape index: {}]   ;;  %s572_s7 = inlined_call_operand.vmem [shape: f32[8,1], index: 7, kind: input, shape index: {}]   ;;  %s573_s8 = inlined_call_operand.vmem [shape: f32[16,1], index: 8, kind: input, shape index: {}]   ;;  %s574_s9 = inlined_call_operand.vmem [shape: f32[16,1], index: 9, kind: input, shape index: {}]   ;;  %s575_s0 = inlined_call_operand.vmem [shape: f32[16,392], index: 0, kind: input, shape index: {}]   ;;  %s576_s1 = inlined_call_operand.vmem [shape: f32[8,392], index: 1, kind: input, shape index: {}]   ;;  %s577_s3 = inlined_call_operand.vmem [shape: f32[16,8], index: 3, kind: input, shape index: {}]   ;;  %s578_s2 = inlined_call_operand.vmem [shape: f32[16,16], index: 2, kind: input, shape index: {}]   ;;  %s579_s10 = inlined_call_operand.vmem [shape: f32[16,392], index: 10, kind: output, shape index: {}]  }
   0x1   :  { %399 = vset.pattern.permute.xlu1 %v401_v0  ;;  %398 = vset.pattern.permute.xlu0 %v401_v0  ;;  %v97_v1 = vld [vmem:[%s569_s6] sm:$0xff]  ;;  %v44_v2 = vld [vmem:[%s570_s4 + $0x8] sm:$0xff]  ;;  %v41_v16 = vld [vmem:[%s575_s0 + $0x30] sm:$0xff] }
   0x2   :  { %100 = vperm.xlu0 %398, %v97_v1   ;;  %52 = vperm.xlu1 %399, %v44_v2   ;;  %v64_v3 = vld [vmem:[%s571_s5 + $0x8] sm:$0xff]  ;;  %v107_v4 = vld [vmem:[%s572_s7] sm:$0xff]  ;;  %v42_v17 = vld [vmem:[%s575_s0 + $0x38] sm:$0xff] }
   0x3   :  { %400 = vset.pattern.permute.xlu2 %v401_v0  ;;  %v43_v5 = vld [vmem:[%s570_s4] sm:$0xff]  ;;  %v322_v8 = vld [vmem:[%s573_s8 + $0x8] sm:$0xff]  ;;  %v95_v20 = vld [vmem:[%s576_s1 + $0x10] sm:$0xff] }
   0x4   :  { %72 = vperm.xlu2 %400, %v64_v3   ;;  %v63_v6 = vld [vmem:[%s571_s5] sm:$0xff]  ;;  %v342_v10 = vld [vmem:[%s574_s9 + $0x8] sm:$0xff]  ;;  %v96_v21 = vld [vmem:[%s576_s1 + $0x18] sm:$0xff] }
   0x5   :  { %v321_v7 = vld [vmem:[%s573_s8] sm:$0xff]  ;;  %v40_v15 = vld [vmem:[%s575_s0 + $0x28] sm:$0xff]  ;;  %v37_v32 = vld [vmem:[%s575_s0 + $0x10] sm:$0xff] }
   0x6   :  { %v341_v9 = vld [vmem:[%s574_s9] sm:$0xff]  ;;  %v94_v19 = vld [vmem:[%s576_s1 + $0x8] sm:$0xff]  ;;  %v38_v33 = vld [vmem:[%s575_s0 + $0x18] sm:$0xff] }
   0x7   :  { %v39_v13 = vld [vmem:[%s575_s0 + $0x20] sm:$0xff]  ;;  %v36_v31 = vld [vmem:[%s575_s0 + $0x8] sm:$0xff] }
   0x8   :  { %v93_v18 = vld [vmem:[%s576_s1] sm:$0xff]  ;;  %v122_v2 = vld [vmem:[%s577_s3 + $0x8] sm:$0xff] }
   0x9   :  { %v35_v26 = vld [vmem:[%s575_s0] sm:$0xff] }
   0xa   :  { %110 = vperm.xlu0 %398, %v107_v4   ;;  %47 = vperm.xlu1 %399, %v43_v5   ;;  %v121_v53 = vld [vmem:[%s577_s3] sm:$0xff]  ;;  %v92_v4 = vld [vmem:[%s578_s2 + $0x8] sm:$0xff] }
   0xb   :  { %v91_v3 = vld [vmem:[%s578_s2] sm:$0xff] }
   0xc   :  { %67 = vperm.xlu2 %400, %v63_v6  }
  0x12   :  { %325 = vperm.xlu0 %398, %v321_v7   ;;  %330 = vperm.xlu1 %399, %v322_v8  }
  0x14   :  { %345 = vperm.xlu2 %400, %v341_v9  }
  0x1a   :  { %350 = vperm.xlu0 %398, %v342_v10  }
  0x5e   :  { %v73_v14 = vpop.permute.xlu2 %72 }
  0x66   :  { %v68_v48 = vpop.permute.xlu2 %67 }
  0x74   :  { %v101_v11 = vpop.permute.xlu0 %100  ;;  %v53_v12 = vpop.permute.xlu1 %52 }
  0x75   :  { %v59_v22 = vmul.f32 %v53_v12, %v39_v13  ;;  %v60_v23 = vmul.f32 %v53_v12, %v40_v15  ;;  %v61_v24 = vmul.f32 %v53_v12, %v41_v16  ;;  %v62_v25 = vmul.f32 %v53_v12, %v42_v17 }
  0x76   :  { %v103_v27 = vmul.f32 %v101_v11, %v93_v18  ;;  %v104_v28 = vmul.f32 %v101_v11, %v94_v19  ;;  %v105_v29 = vmul.f32 %v101_v11, %v95_v20  ;;  %v106_v30 = vmul.f32 %v101_v11, %v96_v21  ;;  %v346_v20 = vpop.permute.xlu2 %345 }
  0x77   :  { %v79_v35 = vadd.f32 %v73_v14, %v59_v22  ;;  %v80_v36 = vadd.f32 %v73_v14, %v60_v23  ;;  %v81_v37 = vadd.f32 %v73_v14, %v61_v24  ;;  %v82_v38 = vadd.f32 %v73_v14, %v62_v25 }
  0x79   :  { %v87_v58 = vmax.f32 %v79_v35, 0.0  ;;  %v88_v59 = vmax.f32 %v80_v36, 0.0  ;;  %v89_v60 = vmax.f32 %v81_v37, 0.0  ;;  %v90_v61 = vmax.f32 %v82_v38, 0.0 }
  0x7c   :  { %v111_v34 = vpop.permute.xlu0 %110  ;;  %v48_v39 = vpop.permute.xlu1 %47 }
  0x7d   :  { %v113_v40 = vadd.f32 %v111_v34, %v103_v27  ;;  %v114_v41 = vadd.f32 %v111_v34, %v104_v28  ;;  %v115_v42 = vadd.f32 %v111_v34, %v105_v29  ;;  %v116_v43 = vadd.f32 %v111_v34, %v106_v30 }
  0x7e   :  { %v55_v44 = vmul.f32 %v48_v39, %v35_v26  ;;  %v56_v45 = vmul.f32 %v48_v39, %v36_v31  ;;  %v57_v46 = vmul.f32 %v48_v39, %v37_v32  ;;  %v58_v47 = vmul.f32 %v48_v39, %v38_v33 }
  0x7f   :  { %v117_v49 = vmax.f32 %v113_v40, 0.0  ;;  %v118_v50 = vmax.f32 %v114_v41, 0.0  ;;  %v119_v51 = vmax.f32 %v115_v42, 0.0  ;;  %v120_v52 = vmax.f32 %v116_v43, 0.0 }
  0x80   :  { %v75_v54 = vadd.f32 %v68_v48, %v55_v44  ;;  %v76_v55 = vadd.f32 %v68_v48, %v56_v45  ;;  %v77_v56 = vadd.f32 %v68_v48, %v57_v46  ;;  %v78_v57 = vadd.f32 %v68_v48, %v58_v47 }
  0x81   :  { %145 = vmatpush.msra.mxu0 %v117_v49  ;;  %168 = vmatpush.msra.mxu1 %v118_v50 }
  0x82   :  { %191 = vmatpush.msra.mxu2 %v119_v51  ;;  %214 = vmatpush.msra.mxu3 %v120_v52  ;;  %v83_v62 = vmax.f32 %v75_v54, 0.0  ;;  %v84_v63 = vmax.f32 %v76_v55, 0.0  ;;  %v85_v0 = vmax.f32 %v77_v56, 0.0  ;;  %v86_v1 = vmax.f32 %v78_v57, 0.0 }
  0x83   :  { %381 = vmatmul.msk.f32.vlgmr.msra.gmra.mxu0 %vm123_vm0, %v121_v53  ;;  %383 = vmatmul.msk.f32.vlgmr.msra.gmra.mxu1 %vm123_vm0, %v121_v53 }
  0x84   :  { %385 = vmatmul.msk.f32.vlgmr.msra.gmra.mxu2 %vm123_vm0, %v121_v53  ;;  %387 = vmatmul.msk.f32.vlgmr.msra.gmra.mxu3 %vm123_vm0, %v121_v53  ;;  %v326_v17 = vpop.permute.xlu0 %325  ;;  %v331_v33 = vpop.permute.xlu1 %330 }
  0x85   :  { %243 = vmatpush.msrb.mxu0 %v87_v58  ;;  %266 = vmatpush.msrb.mxu1 %v88_v59 }
  0x86   :  { %289 = vmatpush.msrb.mxu2 %v89_v60  ;;  %312 = vmatpush.msrb.mxu3 %v90_v61 }
  0x87   :  { %244 = vmatpush.msrb.mxu0 %v83_v62  ;;  %267 = vmatpush.msrb.mxu1 %v84_v63 }
  0x88   :  { %290 = vmatpush.msrb.mxu2 %v85_v0  ;;  %313 = vmatpush.msrb.mxu3 %v86_v1 }
  0x8b   :  { %382 = vmatmul.msk.f32.gmra.mxu0 %vm123_vm0, %v122_v2  ;;  %384 = vmatmul.msk.f32.gmra.mxu1 %vm123_vm0, %v122_v2 }
  0x8c   :  { %386 = vmatmul.msk.f32.gmra.mxu2 %vm123_vm0, %v122_v2  ;;  %388 = vmatmul.msk.f32.gmra.mxu3 %vm123_vm0, %v122_v2  ;;  %v351_v38 = vpop.permute.xlu0 %350 }
  0x93   :  { %389 = vmatmul.msk.f32.vlgmr.msrb.gmra.mxu0 %vm222_vm1, %v91_v3  ;;  %391 = vmatmul.msk.f32.vlgmr.msrb.gmra.mxu1 %vm222_vm1, %v91_v3 }
  0x94   :  { %393 = vmatmul.msk.f32.vlgmr.msrb.gmra.mxu2 %vm222_vm1, %v91_v3  ;;  %395 = vmatmul.msk.f32.vlgmr.msrb.gmra.mxu3 %vm222_vm1, %v91_v3 }
  0x9b   :  { %390 = vmatmul.msk.f32.gmra.mxu0 %vm222_vm1, %v92_v4  ;;  %392 = vmatmul.msk.f32.gmra.mxu1 %vm222_vm1, %v92_v4 }
  0x9c   :  { %394 = vmatmul.msk.f32.gmra.mxu2 %vm222_vm1, %v92_v4  ;;  %396 = vmatmul.msk.f32.gmra.mxu3 %vm222_vm1, %v92_v4 }
 0x100   :  { %v147_v5 = vpop.f32.mrf.mxu0  ;;  %v170_v6 = vpop.f32.mrf.mxu1 }
 0x107   :  { %v193_v7 = vpop.f32.mrf.mxu2  ;;  %v216_v8 = vpop.f32.mrf.mxu3 }
 0x108   :  { %v150_v9 = vpop.f32.mrf.mxu0  ;;  %v173_v10 = vpop.f32.mrf.mxu1 }
 0x10f   :  { %v196_v11 = vpop.f32.mrf.mxu2  ;;  %v219_v12 = vpop.f32.mrf.mxu3 }
 0x110   :  { %v246_v13 = vpop.f32.mrf.mxu0  ;;  %v269_v14 = vpop.f32.mrf.mxu1 }
 0x111   :  { %v247_v15 = vadd.f32 %v246_v13, %v147_v5  ;;  %v270_v16 = vadd.f32 %v269_v14, %v170_v6 }
 0x113   :  { %v333_v18 = vmul.f32 %v326_v17, %v247_v15  ;;  %v334_v19 = vmul.f32 %v326_v17, %v270_v16 }
 0x115   :  { %v353_v21 = vadd.f32 %v346_v20, %v333_v18  ;;  %v354_v22 = vadd.f32 %v346_v20, %v334_v19 }
 0x117   :  { %v361_v23 = vmax.f32 %v353_v21, 0.0  ;;  %v362_v24 = vmax.f32 %v354_v22, 0.0  ;;  %v292_v25 = vpop.f32.mrf.mxu2  ;;  %v315_v26 = vpop.f32.mrf.mxu3 }
 0x118   :  { %v293_v27 = vadd.f32 %v292_v25, %v193_v7  ;;  %v316_v28 = vadd.f32 %v315_v26, %v216_v8  ;;  %v249_v29 = vpop.f32.mrf.mxu0  ;;  %v272_v30 = vpop.f32.mrf.mxu1 }
 0x119   :  { %369 = vst [vmem:[%s579_s10] sm:$0xff] %v361_v23  ;;  %v250_v31 = vadd.f32 %v249_v29, %v150_v9  ;;  %v273_v32 = vadd.f32 %v272_v30, %v173_v10 }
 0x11a   :  { %370 = vst [vmem:[%s579_s10 + $0x8] sm:$0xff] %v362_v24  ;;  %v335_v34 = vmul.f32 %v326_v17, %v293_v27  ;;  %v336_v35 = vmul.f32 %v326_v17, %v316_v28 }
 0x11b   :  { %v337_v36 = vmul.f32 %v331_v33, %v250_v31  ;;  %v338_v37 = vmul.f32 %v331_v33, %v273_v32 }
 0x11c   :  { %v355_v39 = vadd.f32 %v346_v20, %v335_v34  ;;  %v356_v40 = vadd.f32 %v346_v20, %v336_v35 }
 0x11d   :  { %v357_v41 = vadd.f32 %v351_v38, %v337_v36  ;;  %v358_v42 = vadd.f32 %v351_v38, %v338_v37 }
 0x11e   :  { %v363_v43 = vmax.f32 %v355_v39, 0.0  ;;  %v364_v44 = vmax.f32 %v356_v40, 0.0 }
 0x11f   :  { %v365_v45 = vmax.f32 %v357_v41, 0.0  ;;  %v366_v46 = vmax.f32 %v358_v42, 0.0  ;;  %v295_v47 = vpop.f32.mrf.mxu2  ;;  %v318_v48 = vpop.f32.mrf.mxu3 }
 0x120   :  { %371 = vst [vmem:[%s579_s10 + $0x10] sm:$0xff] %v363_v43  ;;  %v296_v49 = vadd.f32 %v295_v47, %v196_v11  ;;  %v319_v50 = vadd.f32 %v318_v48, %v219_v12 }
 0x121   :  { %372 = vst.msk [vmem:[%s579_s10 + $0x18] sm:$0xff] %vm123_vm0, %v364_v44 }
 0x122   :  { %373 = vst [vmem:[%s579_s10 + $0x20] sm:$0xff] %v365_v45  ;;  %v339_v51 = vmul.f32 %v331_v33, %v296_v49  ;;  %v340_v52 = vmul.f32 %v331_v33, %v319_v50 }
 0x123   :  { %374 = vst [vmem:[%s579_s10 + $0x28] sm:$0xff] %v366_v46 }
 0x124   :  { %v359_v53 = vadd.f32 %v351_v38, %v339_v51  ;;  %v360_v54 = vadd.f32 %v351_v38, %v340_v52 }
 0x126   :  { %v367_v55 = vmax.f32 %v359_v53, 0.0  ;;  %v368_v56 = vmax.f32 %v360_v54, 0.0 }
 0x128   :  { %375 = vst [vmem:[%s579_s10 + $0x30] sm:$0xff] %v367_v55 }
 0x129   :  { %376 = vst.msk [vmem:[%s579_s10 + $0x38] sm:$0xff] %vm123_vm0, %v368_v56 }

// kernel: densenet_forward.19
= control target key start
LH: loop header
LB: loop body
LE: loop exit
PB: predicated region body
PF: predicated region fallthrough
CT: control target
= control target key end

     0   :  { %v132_v0 = vmov 0   ;;  %vm57_vm0 = vcmask 130048   ;;  %vm117_vm1 = vcmask 801792   ;;  %s210_s3 = inlined_call_operand.vmem [shape: f32[16,1], index: 3, kind: input, shape index: {}]   ;;  %s211_s2 = inlined_call_operand.vmem [shape: f32[16,1], index: 2, kind: input, shape index: {}]   ;;  %s212_s5 = inlined_call_operand.vmem [shape: f32[16,1], index: 5, kind: input, shape index: {}]   ;;  %s213_s4 = inlined_call_operand.vmem [shape: f32[16,1], index: 4, kind: input, shape index: {}]   ;;  %s214_s0 = inlined_call_operand.vmem [shape: f32[16,98], index: 0, kind: input, shape index: {}]   ;;  %s215_s1 = inlined_call_operand.vmem [shape: f32[16,16], index: 1, kind: input, shape index: {}]   ;;  %s216_s6 = inlined_call_operand.vmem [shape: f32[16,98], index: 6, kind: output, shape index: {}]  }
   0x1   :  { %130 = vset.pattern.permute.xlu1 %v132_v0  ;;  %129 = vset.pattern.permute.xlu0 %v132_v0  ;;  %v40_v1 = vld [vmem:[%s210_s3 + $0x8] sm:$0xff]  ;;  %v39_v3 = vld [vmem:[%s210_s3] sm:$0xff] }
   0x2   :  { %v26_v2 = vld [vmem:[%s211_s2 + $0x8] sm:$0xff]  ;;  %48 = vperm.xlu1 %130, %v40_v1   ;;  %131 = vset.pattern.permute.xlu2 %v132_v0  ;;  %v25_v4 = vld [vmem:[%s211_s2] sm:$0xff] }
   0x3   :  { %34 = vperm.xlu0 %129, %v26_v2   ;;  %v102_v5 = vld [vmem:[%s212_s5 + $0x8] sm:$0xff]  ;;  %v101_v6 = vld [vmem:[%s212_s5] sm:$0xff] }
   0x4   :  { %v87_v7 = vld [vmem:[%s213_s4] sm:$0xff]  ;;  %v88_v8 = vld [vmem:[%s213_s4 + $0x8] sm:$0xff] }
   0x5   :  { %91 = vperm.xlu2 %131, %v87_v7   ;;  %v24_v9 = vld [vmem:[%s214_s0 + $0x8] sm:$0xff]  ;;  %v23_v15 = vld [vmem:[%s214_s0] sm:$0xff] }
   0x6   :  { %v55_v21 = vld [vmem:[%s215_s1] sm:$0xff]  ;;  %v56_v22 = vld [vmem:[%s215_s1 + $0x8] sm:$0xff] }
   0xa   :  { %43 = vperm.xlu1 %130, %v39_v3  }
   0xb   :  { %29 = vperm.xlu0 %129, %v25_v4  }
   0xd   :  { %96 = vperm.xlu2 %131, %v88_v8  }
  0x12   :  { %110 = vperm.xlu1 %130, %v102_v5  }
  0x13   :  { %105 = vperm.xlu0 %129, %v101_v6  }
  0x5f   :  { %v92_v23 = vpop.permute.xlu2 %91 }
  0x67   :  { %v97_v24 = vpop.permute.xlu2 %96 }
  0x74   :  { %v49_v10 = vpop.permute.xlu1 %48 }
  0x75   :  { %v35_v11 = vpop.permute.xlu0 %34 }
  0x76   :  { %v38_v12 = vmul.f32 %v35_v11, %v24_v9 }
  0x78   :  { %v52_v13 = vadd.f32 %v49_v10, %v38_v12 }
  0x7a   :  { %v54_v14 = vmax.f32 %v52_v13, 0.0 }
  0x7c   :  { %78 = vmatpush.msra.mxu0 %v54_v14  ;;  %126 = vmatpush.msra.mxu1 %v54_v14  ;;  %v44_v18 = vpop.permute.xlu1 %43 }
  0x7d   :  { %v30_v16 = vpop.permute.xlu0 %29 }
  0x7e   :  { %v37_v17 = vmul.f32 %v30_v16, %v23_v15 }
  0x80   :  { %v51_v19 = vadd.f32 %v44_v18, %v37_v17 }
  0x82   :  { %v53_v20 = vmax.f32 %v51_v19, 0.0 }
  0x84   :  { %79 = vmatpush.msra.mxu0 %v53_v20  ;;  %127 = vmatpush.msra.mxu1 %v53_v20  ;;  %v111_v29 = vpop.permute.xlu1 %110 }
  0x85   :  { %124 = vmatmul.msk.f32.vlgmr.msra.gmra.mxu0 %vm57_vm0, %v55_v21  ;;  %125 = vmatmul.msk.f32.vlgmr.msra.gmra.mxu1 %vm57_vm0, %v56_v22  ;;  %v106_v30 = vpop.permute.xlu0 %105 }
 0x102   :  { %v81_v25 = vpop.f32.mrf.mxu0  ;;  %v84_v26 = vpop.f32.mrf.mxu1 }
 0x103   :  { %v99_v27 = vmul.f32 %v92_v23, %v81_v25  ;;  %v100_v28 = vmul.f32 %v97_v24, %v84_v26 }
 0x105   :  { %v113_v31 = vadd.f32 %v106_v30, %v99_v27  ;;  %v114_v32 = vadd.f32 %v111_v29, %v100_v28 }
 0x107   :  { %v115_v33 = vmax.f32 %v113_v31, 0.0  ;;  %v116_v34 = vmax.f32 %v114_v32, 0.0 }
 0x109   :  { %118 = vst.msk [vmem:[%s216_s6] sm:$0xff] %vm117_vm1, %v115_v33 }
 0x10a   :  { %119 = vst.msk [vmem:[%s216_s6 + $0x8] sm:$0xff] %vm117_vm1, %v116_v34 }

// kernel: densenet_forward.18
= control target key start
LH: loop header
LB: loop body
LE: loop exit
PB: predicated region body
PF: predicated region fallthrough
CT: control target
= control target key end

     0   :  { %v312_v0 = vmov 0   ;;  %vm168_vm0 = vcmask 64512   ;;  %vm198_vm1 = vcmask 130048   ;;  %vm293_vm2 = vcmask 801792   ;;  %s529_s19 = inlined_call_operand.vmem [shape: f32[8,1], index: 19, kind: input, shape index: {}]   ;;  %s530_s15 = inlined_call_operand.vmem [shape: f32[16,1], index: 15, kind: input, shape index: {}]   ;;  %s531_s20 = inlined_call_operand.vmem [shape: f32[8,1], index: 20, kind: input, shape index: {}]   ;;  %s532_s17 = inlined_call_operand.vmem [shape: f32[8,1], index: 17, kind: input, shape index: {}]   ;;  %s533_s16 = inlined_call_operand.vmem [shape: f32[16,1], index: 16, kind: input, shape index: {}]   ;;  %s534_s18 = inlined_call_operand.vmem [shape: f32[8,1], index: 18, kind: input, shape index: {}]   ;;  %s535_s0 = inlined_call_operand.vmem [shape: f32[16,98], index: 0, kind: input, shape index: {}]   ;;  %s536_s1 = inlined_call_operand.vmem [shape: f32[16,98], index: 1, kind: input, shape index: {}]   ;;  %s537_s2 = inlined_call_operand.vmem [shape: f32[16,98], index: 2, kind: input, shape index: {}]   ;;  %s538_s3 = inlined_call_operand.vmem [shape: f32[16,98], index: 3, kind: input, shape index: {}]   ;;  %s539_s8 = inlined_call_operand.vmem [shape: f32[8,98], index: 8, kind: input, shape index: {}]   ;;  %s540_s9 = inlined_call_operand.vmem [shape: f32[8,98], index: 9, kind: input, shape index: {}]   ;;  %s541_s10 = inlined_call_operand.vmem [shape: f32[8,98], index: 10, kind: input, shape index: {}]   ;;  %s542_s11 = inlined_call_operand.vmem [shape: f32[8,98], index: 11, kind: input, shape index: {}]   ;;  %s543_s4 = inlined_call_operand.vmem [shape: f32[8,98], index: 4, kind: input, shape index: {}]   ;;  %s544_s5 = inlined_call_operand.vmem [shape: f32[8,98], index: 5, kind: input, shape index: {}]   ;;  %s545_s6 = inlined_call_operand.vmem [shape: f32[8,98], index: 6, kind: input, shape index: {}]   ;;  %s546_s7 = inlined_call_operand.vmem [shape: f32[8,98], index: 7, kind: input, shape index: {}]   ;;  %s547_s14 = inlined_call_operand.vmem [shape: f32[16,8], index: 14, kind: input, shape index: {}]   ;;  %s548_s13 = inlined_call_operand.vmem [shape: f32[16,8], index: 13, kind: input, shape index: {}]   ;;  %s549_s12 = inlined_call_operand.vmem [shape: f32[16,16], index: 12, kind: input, shape index: {}]   ;;  %s550_s21 = inlined_call_operand.vmem [shape: f32[16,98], index: 21, kind: output, shape index: {}]  }
   0x1   :  { %553 = sst [smem:[#allocation2_spill]] %s529_s19  ;;  %310 = vset.pattern.permute.xlu1 %v312_v0  ;;  %309 = vset.pattern.permute.xlu0 %v312_v0  ;;  %v69_v10 = vld [vmem:[%s535_s0 + $0x8] sm:$0xff]  ;;  %v228_v22 = vld [vmem:[%s539_s8] sm:$0xff] }
   0x2   :  { %554 = sst [smem:[#allocation3_spill]] %s530_s15  ;;  %311 = vset.pattern.permute.xlu2 %v312_v0  ;;  %v101_v12 = vld [vmem:[%s536_s1 + $0x8] sm:$0xff]  ;;  %v244_v23 = vld [vmem:[%s540_s9] sm:$0xff] }
   0x3   :  { %555 = sst [smem:[#allocation4_spill]] %s531_s20  ;;  %v111_v13 = vld [vmem:[%s537_s2 + $0x8] sm:$0xff]  ;;  %v249_v26 = vld [vmem:[%s541_s10] sm:$0xff] }
   0x4   :  { %556 = sst [smem:[#allocation5_spill]] %s532_s17  ;;  %v121_v14 = vld [vmem:[%s538_s3 + $0x8] sm:$0xff]  ;;  %v254_v33 = vld [vmem:[%s542_s11] sm:$0xff] }
   0x5   :  { %557 = sst [smem:[#allocation6_spill]] %s533_s16  ;;  %v68_v46 = vld [vmem:[%s535_s0] sm:$0xff] }
   0x6   :  { %558 = sst [smem:[#allocation7_spill]] %s534_s18  ;;  %v134_v48 = vld [vmem:[%s543_s4] sm:$0xff] }
   0x7   :  { %s559_s26 = sld [smem:[#allocation2_spill]]  ;;  %v150_v49 = vld [vmem:[%s544_s5] sm:$0xff] }
   0x8   :  { %s560_s28 = sld [smem:[#allocation3_spill]]  ;;  %v155_v50 = vld [vmem:[%s545_s6] sm:$0xff] }
   0x9   :  { %s561_s18 = sld [smem:[#allocation4_spill]]  ;;  %v100_v52 = vld [vmem:[%s536_s1] sm:$0xff] }
   0xa   :  { %s562_s15 = sld [smem:[#allocation5_spill]]  ;;  %v110_v53 = vld [vmem:[%s537_s2] sm:$0xff] }
   0xb   :  { %s563_s25 = sld [smem:[#allocation6_spill]]  ;;  %v120_v54 = vld [vmem:[%s538_s3] sm:$0xff] }
   0xc   :  { %s564_s17 = sld [smem:[#allocation7_spill]]  ;;  %v160_v63 = vld [vmem:[%s546_s7] sm:$0xff] }
   0xd   :  { %v229_v1 = vld [vmem:[%s559_s26] sm:$0xff] }
   0xe   :  { %v71_v2 = vld [vmem:[%s560_s28 + $0x8] sm:$0xff]  ;;  %232 = vperm.xlu0 %309, %v229_v1   ;;  %v70_v3 = vld [vmem:[%s560_s28] sm:$0xff] }
   0xf   :  { %79 = vperm.xlu1 %310, %v71_v2   ;;  %74 = vperm.xlu2 %311, %v70_v3   ;;  %v236_v4 = vld [vmem:[%s561_s18] sm:$0xff] }
  0x10   :  { %v135_v5 = vld [vmem:[%s562_s15] sm:$0xff] }
  0x11   :  { %v85_v6 = vld [vmem:[%s563_s25 + $0x8] sm:$0xff]  ;;  %v84_v8 = vld [vmem:[%s563_s25] sm:$0xff] }
  0x12   :  { %v142_v7 = vld [vmem:[%s564_s17] sm:$0xff] }
  0x16   :  { %239 = vperm.xlu0 %309, %v236_v4  }
  0x17   :  { %138 = vperm.xlu1 %310, %v135_v5   ;;  %93 = vperm.xlu2 %311, %v85_v6  }
  0x1e   :  { %145 = vperm.xlu0 %309, %v142_v7  }
  0x1f   :  { %88 = vperm.xlu1 %310, %v84_v8  }
  0x69   :  { %v447_v9 = vpop.permute.xlu2 %74 }
  0x6a   :  { %v82_v58 = vmul.f32 %v447_v9, %v68_v46  ;;  %v102_v2 = vmul.f32 %v100_v52, %v447_v9  ;;  %v112_v3 = vmul.f32 %v110_v53, %v447_v9  ;;  %v122_v4 = vmul.f32 %v120_v54, %v447_v9  ;;  %v260_v9 = vld [vmem:[%s547_s14] sm:$0xff] }
  0x71   :  { %v94_v11 = vpop.permute.xlu2 %93 }
  0x80   :  { %v233_v15 = vpop.permute.xlu0 %232 }
  0x81   :  { %v80_v16 = vpop.permute.xlu1 %79  ;;  %v235_v31 = vmul.f32 %v233_v15, %v228_v22  ;;  %v245_v32 = vmul.f32 %v244_v23, %v233_v15  ;;  %v250_v34 = vmul.f32 %v249_v26, %v233_v15  ;;  %v255_v43 = vmul.f32 %v254_v33, %v233_v15 }
  0x82   :  { %v83_v17 = vmul.f32 %v80_v16, %v69_v10  ;;  %v103_v18 = vmul.f32 %v101_v12, %v80_v16  ;;  %v113_v19 = vmul.f32 %v111_v13, %v80_v16  ;;  %v123_v20 = vmul.f32 %v121_v14, %v80_v16 }
  0x84   :  { %v97_v21 = vadd.f32 %v94_v11, %v83_v17  ;;  %v105_v24 = vadd.f32 %v103_v18, %v94_v11  ;;  %v115_v25 = vadd.f32 %v113_v19, %v94_v11  ;;  %v125_v30 = vadd.f32 %v123_v20, %v94_v11 }
  0x86   :  { %v99_v27 = vmax.f32 %v97_v21, 0.0  ;;  %v107_v28 = vmax.f32 %v105_v24, 0.0  ;;  %v117_v29 = vmax.f32 %v115_v25, 0.0  ;;  %v127_v41 = vmax.f32 %v125_v30, 0.0 }
  0x88   :  { %v240_v35 = vpop.permute.xlu0 %239  ;;  %v109_v37 = vadd.f32 %v107_v28, %v99_v27 }
  0x89   :  { %v139_v36 = vpop.permute.xlu1 %138  ;;  %v242_v38 = vadd.f32 %v240_v35, %v235_v31  ;;  %v246_v39 = vadd.f32 %v245_v32, %v240_v35  ;;  %v251_v42 = vadd.f32 %v250_v34, %v240_v35  ;;  %v256_v51 = vadd.f32 %v255_v43, %v240_v35  ;;  %v166_v34 = vld [vmem:[%s548_s13] sm:$0xff] }
  0x8a   :  { %v119_v40 = vadd.f32 %v117_v29, %v109_v37  ;;  %v141_v59 = vmul.f32 %v139_v36, %v134_v48  ;;  %v151_v60 = vmul.f32 %v150_v49, %v139_v36  ;;  %v156_v61 = vmul.f32 %v155_v50, %v139_v36  ;;  %v132_v35 = vld [vmem:[%s549_s12] sm:$0xff]  ;;  %v261_v37 = vld [vmem:[%s547_s14 + $0x8] sm:$0xff] }
  0x8b   :  { %v243_v44 = vmax.f32 %v242_v38, 0.0  ;;  %v247_v45 = vmax.f32 %v246_v39, 0.0  ;;  %v252_v56 = vmax.f32 %v251_v42, 0.0  ;;  %v257_v5 = vmax.f32 %v256_v51, 0.0  ;;  %v167_v38 = vld [vmem:[%s548_s13 + $0x8] sm:$0xff] }
  0x8c   :  { %v129_v47 = vadd.f32 %v127_v41, %v119_v40  ;;  %v161_v14 = vmul.f32 %v160_v63, %v139_v36  ;;  %v133_v36 = vld [vmem:[%s549_s12 + $0x8] sm:$0xff] }
  0x8d   :  { %v248_v55 = vadd.f32 %v247_v45, %v243_v44 }
  0x8e   :  { %v131_v57 = vmul.f32 0.25, %v129_v47 }
  0x8f   :  { %v253_v62 = vadd.f32 %v252_v56, %v248_v55 }
  0x90   :  { %219 = vmatpush.msra.mxu1 %v131_v57  ;;  %306 = vmatpush.msra.mxu3 %v131_v57  ;;  %v146_v0 = vpop.permute.xlu0 %145 }
  0x91   :  { %v89_v1 = vpop.permute.xlu1 %88  ;;  %v148_v6 = vadd.f32 %v146_v0, %v141_v59  ;;  %v152_v7 = vadd.f32 %v151_v60, %v146_v0  ;;  %v157_v8 = vadd.f32 %v156_v61, %v146_v0  ;;  %v258_v13 = vadd.f32 %v257_v5, %v253_v62 }
  0x92   :  { %v96_v10 = vadd.f32 %v89_v1, %v82_v58  ;;  %v104_v11 = vadd.f32 %v102_v2, %v89_v1  ;;  %v114_v12 = vadd.f32 %v112_v3, %v89_v1  ;;  %v124_v19 = vadd.f32 %v122_v4, %v89_v1 }
  0x93   :  { %v149_v15 = vmax.f32 %v148_v6, 0.0  ;;  %v153_v16 = vmax.f32 %v152_v7, 0.0  ;;  %v259_v20 = vmul.f32 0.25, %v258_v13  ;;  %v162_v21 = vadd.f32 %v161_v14, %v146_v0 }
  0x94   :  { %v98_v17 = vmax.f32 %v96_v10, 0.0  ;;  %v106_v18 = vmax.f32 %v104_v11, 0.0  ;;  %v158_v22 = vmax.f32 %v157_v8, 0.0  ;;  %v116_v24 = vmax.f32 %v114_v12, 0.0 }
  0x95   :  { %v154_v23 = vadd.f32 %v153_v16, %v149_v15  ;;  %283 = vmatpush.msra.mxu2 %v259_v20  ;;  %v163_v27 = vmax.f32 %v162_v21, 0.0  ;;  %v126_v29 = vmax.f32 %v124_v19, 0.0 }
  0x96   :  { %v108_v25 = vadd.f32 %v106_v18, %v98_v17  ;;  %304 = vmatmul.msk.f32.vlgmr.msra.gmra.mxu2 %vm168_vm0, %v260_v9 }
  0x97   :  { %v159_v26 = vadd.f32 %v158_v22, %v154_v23 }
  0x98   :  { %v118_v28 = vadd.f32 %v116_v24, %v108_v25 }
  0x99   :  { %v164_v30 = vadd.f32 %v163_v27, %v159_v26 }
  0x9a   :  { %v128_v31 = vadd.f32 %v126_v29, %v118_v28 }
  0x9b   :  { %v165_v32 = vmul.f32 0.25, %v164_v30 }
  0x9c   :  { %v130_v33 = vmul.f32 0.25, %v128_v31 }
  0x9d   :  { %190 = vmatpush.msra.mxu0 %v165_v32 }
  0x9e   :  { %220 = vmatpush.msra.mxu1 %v130_v33  ;;  %307 = vmatpush.msra.mxu3 %v130_v33 }
  0x9f   :  { %300 = vmatmul.msk.f32.vlgmr.msra.gmra.mxu0 %vm168_vm0, %v166_v34  ;;  %302 = vmatmul.msk.f32.vlgmr.msra.gmra.mxu1 %vm198_vm1, %v132_v35 }
  0xa0   :  { %303 = vmatmul.msk.f32.vlgmr.msra.gmra.mxu3 %vm198_vm1, %v133_v36  ;;  %305 = vmatmul.msk.f32.gmra.mxu2 %vm168_vm0, %v261_v37 }
  0xa7   :  { %301 = vmatmul.msk.f32.gmra.mxu0 %vm168_vm0, %v167_v38 }
 0x119   :  { %v285_v39 = vpop.f32.mrf.mxu2 }
 0x11c   :  { %v192_v40 = vpop.f32.mrf.mxu0  ;;  %v222_v41 = vpop.f32.mrf.mxu1 }
 0x11d   :  { %v223_v42 = vadd.f32 %v222_v41, %v192_v40 }
 0x11f   :  { %v291_v43 = vadd.f32 %v285_v39, %v223_v42 }
 0x121   :  { %294 = vst.msk [vmem:[%s550_s21] sm:$0xff] %vm293_vm2, %v291_v43 }
 0x123   :  { %v225_v44 = vpop.f32.mrf.mxu3  ;;  %v288_v46 = vpop.f32.mrf.mxu2 }
 0x124   :  { %v195_v45 = vpop.f32.mrf.mxu0 }
 0x125   :  { %v226_v47 = vadd.f32 %v225_v44, %v195_v45 }
 0x127   :  { %v292_v48 = vadd.f32 %v288_v46, %v226_v47 }
 0x129   :  { %295 = vst.msk [vmem:[%s550_s21 + $0x8] sm:$0xff] %vm293_vm2, %v292_v48 }

// kernel: densenet_forward.20
= control target key start
LH: loop header
LB: loop body
LE: loop exit
PB: predicated region body
PF: predicated region fallthrough
CT: control target
= control target key end

     0   :  { %vm31_vm0 = vcmask 130048   ;;  %vm75_vm1 = vcmask 801792   ;;  %s160_s0 = inlined_call_operand.vmem [shape: f32[144,98], index: 0, kind: input, shape index: {}]   ;;  %s161_s1 = inlined_call_operand.vmem [shape: f32[8,144], index: 1, kind: input, shape index: {}]   ;;  %s162_s2 = inlined_call_operand.vmem [shape: f32[8,98], index: 2, kind: output, shape index: {}]  }
   0x1   :  { %v26_v0 = vld [vmem:[%s160_s0 + $0x78] sm:$0xff]  ;;  %v25_v1 = vld [vmem:[%s160_s0 + $0x70] sm:$0xff]  ;;  %v24_v2 = vld [vmem:[%s160_s0 + $0x68] sm:$0xff] }
   0x2   :  { %35 = vmatpush.msra.mxu0 %v26_v0  ;;  %v23_v3 = vld [vmem:[%s160_s0 + $0x60] sm:$0xff]  ;;  %v28_v4 = vld [vmem:[%s160_s0 + $0x88] sm:$0xff]  ;;  %v22_v6 = vld [vmem:[%s160_s0 + $0x58] sm:$0xff] }
   0x3   :  { %v27_v5 = vld [vmem:[%s160_s0 + $0x80] sm:$0xff]  ;;  %69 = vmatpush.msra.mxu1 %v28_v4  ;;  %v30_v7 = vld [vmem:[%s161_s1 + $0x8] sm:$0xff]  ;;  %v21_v8 = vld [vmem:[%s160_s0 + $0x50] sm:$0xff] }
   0x4   :  { %36 = vmatpush.msra.mxu0 %v25_v1  ;;  %v20_v9 = vld [vmem:[%s160_s0 + $0x48] sm:$0xff]  ;;  %v19_v10 = vld [vmem:[%s160_s0 + $0x40] sm:$0xff]  ;;  %v18_v11 = vld [vmem:[%s160_s0 + $0x38] sm:$0xff] }
   0x5   :  { %70 = vmatpush.msra.mxu1 %v27_v5  ;;  %v17_v12 = vld [vmem:[%s160_s0 + $0x30] sm:$0xff]  ;;  %v16_v13 = vld [vmem:[%s160_s0 + $0x28] sm:$0xff]  ;;  %v15_v14 = vld [vmem:[%s160_s0 + $0x20] sm:$0xff] }
   0x6   :  { %37 = vmatpush.msra.mxu0 %v24_v2  ;;  %81 = vmatmul.msk.f32.vlgmr.msra.gmra.mxu1 %vm31_vm0, %v30_v7  ;;  %v14_v15 = vld [vmem:[%s160_s0 + $0x18] sm:$0xff]  ;;  %v13_v16 = vld [vmem:[%s160_s0 + $0x10] sm:$0xff]  ;;  %v12_v17 = vld [vmem:[%s160_s0 + $0x8] sm:$0xff] }
   0x7   :  { %v11_v18 = vld [vmem:[%s160_s0] sm:$0xff] }
   0x8   :  { %38 = vmatpush.msra.mxu0 %v23_v3  ;;  %v29_v19 = vld [vmem:[%s161_s1] sm:$0xff] }
   0xa   :  { %39 = vmatpush.msra.mxu0 %v22_v6 }
   0xc   :  { %40 = vmatpush.msra.mxu0 %v21_v8 }
   0xe   :  { %41 = vmatpush.msra.mxu0 %v20_v9 }
  0x10   :  { %42 = vmatpush.msra.mxu0 %v19_v10 }
  0x12   :  { %43 = vmatpush.msra.mxu0 %v18_v11 }
  0x14   :  { %44 = vmatpush.msra.mxu0 %v17_v12 }
  0x16   :  { %45 = vmatpush.msra.mxu0 %v16_v13 }
  0x18   :  { %46 = vmatpush.msra.mxu0 %v15_v14 }
  0x1a   :  { %47 = vmatpush.msra.mxu0 %v14_v15 }
  0x1c   :  { %48 = vmatpush.msra.mxu0 %v13_v16 }
  0x1e   :  { %49 = vmatpush.msra.mxu0 %v12_v17 }
  0x20   :  { %50 = vmatpush.msra.mxu0 %v11_v18 }
  0x21   :  { %51 = vmatmul.f32.vlgmr.msra.gmra.mxu0 %v29_v19 }
  0x83   :  { %v72_v20 = vpop.f32.mrf.mxu1 }
  0x9e   :  { %v52_v21 = vpop.f32.mrf.mxu0 }
  0x9f   :  { %v73_v22 = vadd.f32 %v72_v20, %v52_v21 }
  0xa1   :  { %76 = vst.msk [vmem:[%s162_s2] sm:$0xff] %vm75_vm1, %v73_v22 }

// kernel: densenet_forward.21
= control target key start
LH: loop header
LB: loop body
LE: loop exit
PB: predicated region body
PF: predicated region fallthrough
CT: control target
= control target key end

     0   :  { %v195_v0 = vmov 0   ;;  %vm87_vm0 = vcmask 64512   ;;  %vm117_vm1 = vcmask 130048   ;;  %vm177_vm2 = vcmask 801792   ;;  %s308_s5 = inlined_call_operand.vmem [shape: f32[16,1], index: 5, kind: input, shape index: {}]   ;;  %s309_s4 = inlined_call_operand.vmem [shape: f32[16,1], index: 4, kind: input, shape index: {}]   ;;  %s310_s6 = inlined_call_operand.vmem [shape: f32[8,1], index: 6, kind: input, shape index: {}]   ;;  %s311_s7 = inlined_call_operand.vmem [shape: f32[8,1], index: 7, kind: input, shape index: {}]   ;;  %s312_s8 = inlined_call_operand.vmem [shape: f32[16,1], index: 8, kind: input, shape index: {}]   ;;  %s313_s9 = inlined_call_operand.vmem [shape: f32[16,1], index: 9, kind: input, shape index: {}]   ;;  %s314_s0 = inlined_call_operand.vmem [shape: f32[16,98], index: 0, kind: input, shape index: {}]   ;;  %s315_s1 = inlined_call_operand.vmem [shape: f32[8,98], index: 1, kind: input, shape index: {}]   ;;  %s316_s3 = inlined_call_operand.vmem [shape: f32[16,8], index: 3, kind: input, shape index: {}]   ;;  %s317_s2 = inlined_call_operand.vmem [shape: f32[16,16], index: 2, kind: input, shape index: {}]   ;;  %s318_s10 = inlined_call_operand.vmem [shape: f32[16,98], index: 10, kind: output, shape index: {}]  }
   0x1   :  { %193 = vset.pattern.permute.xlu1 %v195_v0  ;;  %192 = vset.pattern.permute.xlu0 %v195_v0  ;;  %v52_v1 = vld [vmem:[%s308_s5 + $0x8] sm:$0xff]  ;;  %v51_v3 = vld [vmem:[%s308_s5] sm:$0xff] }
   0x2   :  { %v38_v2 = vld [vmem:[%s309_s4 + $0x8] sm:$0xff]  ;;  %60 = vperm.xlu1 %193, %v52_v1   ;;  %194 = vset.pattern.permute.xlu2 %v195_v0  ;;  %v70_v4 = vld [vmem:[%s310_s6] sm:$0xff] }
   0x3   :  { %46 = vperm.xlu0 %192, %v38_v2   ;;  %55 = vperm.xlu2 %194, %v51_v3   ;;  %v37_v5 = vld [vmem:[%s309_s4] sm:$0xff]  ;;  %v148_v7 = vld [vmem:[%s312_s8 + $0x8] sm:$0xff] }
   0x4   :  { %v77_v6 = vld [vmem:[%s311_s7] sm:$0xff]  ;;  %v162_v10 = vld [vmem:[%s313_s9 + $0x8] sm:$0xff] }
   0x5   :  { %v147_v8 = vld [vmem:[%s312_s8] sm:$0xff]  ;;  %v36_v11 = vld [vmem:[%s314_s0 + $0x8] sm:$0xff] }
   0x6   :  { %v161_v9 = vld [vmem:[%s313_s9] sm:$0xff]  ;;  %v86_v30 = vld [vmem:[%s316_s3 + $0x8] sm:$0xff] }
   0x7   :  { %v69_v18 = vld [vmem:[%s315_s1] sm:$0xff]  ;;  %v68_v32 = vld [vmem:[%s317_s2 + $0x8] sm:$0xff] }
   0x8   :  { %v35_v19 = vld [vmem:[%s314_s0] sm:$0xff] }
   0x9   :  { %v85_v29 = vld [vmem:[%s316_s3] sm:$0xff] }
   0xa   :  { %73 = vperm.xlu1 %193, %v70_v4   ;;  %v67_v31 = vld [vmem:[%s317_s2] sm:$0xff] }
   0xb   :  { %41 = vperm.xlu0 %192, %v37_v5   ;;  %80 = vperm.xlu2 %194, %v77_v6  }
  0x12   :  { %156 = vperm.xlu1 %193, %v148_v7  }
  0x13   :  { %151 = vperm.xlu0 %192, %v147_v8   ;;  %165 = vperm.xlu2 %194, %v161_v9  }
  0x1b   :  { %170 = vperm.xlu0 %192, %v162_v10  }
  0x5d   :  { %v56_v12 = vpop.permute.xlu2 %55 }
  0x65   :  { %v81_v24 = vpop.permute.xlu2 %80 }
  0x6d   :  { %v166_v38 = vpop.permute.xlu2 %165 }
  0x74   :  { %v61_v13 = vpop.permute.xlu1 %60 }
  0x75   :  { %v47_v14 = vpop.permute.xlu0 %46 }
  0x76   :  { %v50_v15 = vmul.f32 %v47_v14, %v36_v11 }
  0x78   :  { %v64_v16 = vadd.f32 %v61_v13, %v50_v15 }
  0x7a   :  { %v66_v17 = vmax.f32 %v64_v16, 0.0 }
  0x7c   :  { %138 = vmatpush.msra.mxu1 %v66_v17  ;;  %189 = vmatpush.msra.mxu2 %v66_v17  ;;  %v74_v20 = vpop.permute.xlu1 %73 }
  0x7d   :  { %v42_v21 = vpop.permute.xlu0 %41  ;;  %v76_v22 = vmul.f32 %v74_v20, %v69_v18 }
  0x7e   :  { %v49_v23 = vmul.f32 %v42_v21, %v35_v19 }
  0x7f   :  { %v83_v25 = vadd.f32 %v81_v24, %v76_v22 }
  0x80   :  { %v63_v26 = vadd.f32 %v56_v12, %v49_v23 }
  0x81   :  { %v84_v27 = vmax.f32 %v83_v25, 0.0 }
  0x82   :  { %v65_v28 = vmax.f32 %v63_v26, 0.0 }
  0x83   :  { %109 = vmatpush.msra.mxu0 %v84_v27  ;;  %188 = vmatpush.msra.mxu3 %v84_v27 }
  0x84   :  { %139 = vmatpush.msra.mxu1 %v65_v28  ;;  %190 = vmatpush.msra.mxu2 %v65_v28  ;;  %v157_v44 = vpop.permute.xlu1 %156 }
  0x85   :  { %184 = vmatmul.msk.f32.vlgmr.msra.gmra.mxu0 %vm87_vm0, %v85_v29  ;;  %185 = vmatmul.msk.f32.vlgmr.msra.gmra.mxu3 %vm87_vm0, %v86_v30  ;;  %v152_v34 = vpop.permute.xlu0 %151 }
  0x86   :  { %186 = vmatmul.msk.f32.vlgmr.msra.gmra.mxu1 %vm117_vm1, %v67_v31  ;;  %187 = vmatmul.msk.f32.vlgmr.msra.gmra.mxu2 %vm117_vm1, %v68_v32 }
  0x8d   :  { %v171_v46 = vpop.permute.xlu0 %170 }
 0x102   :  { %v111_v33 = vpop.f32.mrf.mxu0 }
 0x103   :  { %v141_v35 = vpop.f32.mrf.mxu1 }
 0x104   :  { %v142_v36 = vadd.f32 %v141_v35, %v111_v33 }
 0x106   :  { %v159_v37 = vmul.f32 %v152_v34, %v142_v36 }
 0x108   :  { %v173_v39 = vadd.f32 %v166_v38, %v159_v37  ;;  %v114_v40 = vpop.f32.mrf.mxu3 }
 0x109   :  { %v144_v41 = vpop.f32.mrf.mxu2 }
 0x10a   :  { %v175_v42 = vmax.f32 %v173_v39, 0.0  ;;  %v145_v43 = vadd.f32 %v144_v41, %v114_v40 }
 0x10c   :  { %178 = vst.msk [vmem:[%s318_s10] sm:$0xff] %vm177_vm2, %v175_v42  ;;  %v160_v45 = vmul.f32 %v157_v44, %v145_v43 }
 0x10e   :  { %v174_v47 = vadd.f32 %v171_v46, %v160_v45 }
 0x110   :  { %v176_v48 = vmax.f32 %v174_v47, 0.0 }
 0x112   :  { %179 = vst.msk [vmem:[%s318_s10 + $0x8] sm:$0xff] %vm177_vm2, %v176_v48 }

// kernel: densenet_forward.23
= control target key start
LH: loop header
LB: loop body
LE: loop exit
PB: predicated region body
PF: predicated region fallthrough
CT: control target
= control target key end

     0   :  { %v1059_v0 = vmov 0   ;;  %vm332_vm0 = vcmask 394240   ;;  %vm602_vm2 = vcmask 1041409   ;;  %vm604_vm3 = vcmask 1042434   ;;  %s1623_s3 = inlined_call_operand.vmem [shape: f32[16,1,1], index: 3, kind: input, shape index: {}]   ;;  %s1624_s4 = inlined_call_operand.vmem [shape: f32[16,1,1], index: 4, kind: input, shape index: {}]   ;;  %s1625_s5 = inlined_call_operand.vmem [shape: f32[8,1,1], index: 5, kind: input, shape index: {}]   ;;  %s1626_s7 = inlined_call_operand.vmem [shape: f32[8,1,1], index: 7, kind: input, shape index: {}]   ;;  %s1627_s8 = inlined_call_operand.vmem [shape: f32[8,1,1], index: 8, kind: input, shape index: {}]   ;;  %s1628_s0 = inlined_call_operand.vmem [shape: f32[16,2,49], index: 0, kind: input, shape index: {}]   ;;  %s1629_s6 = inlined_call_operand.vmem [shape: f32[8,1,1], index: 6, kind: input, shape index: {}]   ;;  %s1630_s2 = inlined_call_operand.vmem [shape: f32[8,2,49], index: 2, kind: input, shape index: {}]   ;;  %s1631_s1 = inlined_call_operand.vmem [shape: f32[8,2,49], index: 1, kind: input, shape index: {}]   ;;  %s1632_s12 = inlined_call_operand.vmem [shape: f32[10,1], index: 12, kind: input, shape index: {}]   ;;  %s1633_s9 = inlined_call_operand.vmem [shape: f32[10,16], index: 9, kind: input, shape index: {}]   ;;  %s1634_s11 = inlined_call_operand.vmem [shape: f32[10,8], index: 11, kind: input, shape index: {}]   ;;  %s1635_s10 = inlined_call_operand.vmem [shape: f32[10,8], index: 10, kind: input, shape index: {}]   ;;  %s1636_s13 = inlined_call_operand.vmem [shape: f32[10,2], index: 13, kind: output, shape index: {}]  }
   0x1   :  { %992 = vset.pattern.permute.xlu2 %v1059_v0  ;;  %991 = vset.pattern.permute.xlu1 %v1059_v0  ;;  %v993_v1 = vld [vmem:[%s1623_s3 + $0x4] ss:$0 sm:$0xff]  ;;  %v994_v2 = vld [vmem:[%s1623_s3 + $0x2] ss:$0 sm:$0xff]  ;;  %v995_v3 = vld [vmem:[%s1623_s3] ss:$0 sm:$0xff] }
   0x2   :  { %990 = vset.pattern.permute.xlu0 %v1059_v0  ;;  %125 = vperm.xlu2 %992, %v993_v1   ;;  %v996_v4 = vld [vmem:[%s1623_s3 + $0x5] ss:$0 sm:$0xff]  ;;  %v997_v5 = vld [vmem:[%s1623_s3 + $0x3] ss:$0 sm:$0xff]  ;;  %v998_v6 = vld [vmem:[%s1623_s3 + $0x1] ss:$0 sm:$0xff] }
   0x3   :  { %117 = vperm.xlu1 %991, %v994_v2   ;;  %109 = vperm.xlu0 %990, %v995_v3   ;;  %v999_v7 = vld [vmem:[%s1623_s3 + $0x8] ss:$0 sm:$0xff]  ;;  %v1000_v8 = vld [vmem:[%s1623_s3 + $0x7] ss:$0 sm:$0xff]  ;;  %v1001_v9 = vld [vmem:[%s1623_s3 + $0x6] ss:$0 sm:$0xff] }
   0x4   :  { %v1002_v10 = vld [vmem:[%s1623_s3 + $0xb] ss:$0 sm:$0xff]  ;;  %v1003_v11 = vld [vmem:[%s1623_s3 + $0xa] ss:$0 sm:$0xff]  ;;  %v1004_v12 = vld [vmem:[%s1623_s3 + $0x9] ss:$0 sm:$0xff] }
   0x5   :  { %v1005_v13 = vld [vmem:[%s1623_s3 + $0xe] ss:$0 sm:$0xff]  ;;  %v1006_v14 = vld [vmem:[%s1623_s3 + $0xd] ss:$0 sm:$0xff]  ;;  %v1007_v15 = vld [vmem:[%s1623_s3 + $0xc] ss:$0 sm:$0xff] }
   0x6   :  { %v1008_v16 = vld [vmem:[%s1624_s4 + $0x1] ss:$0 sm:$0xff]  ;;  %v1009_v17 = vld [vmem:[%s1624_s4] ss:$0 sm:$0xff]  ;;  %v1010_v18 = vld [vmem:[%s1623_s3 + $0xf] ss:$0 sm:$0xff] }
   0x7   :  { %v1011_v19 = vld [vmem:[%s1624_s4 + $0x4] ss:$0 sm:$0xff]  ;;  %v1012_v20 = vld [vmem:[%s1624_s4 + $0x3] ss:$0 sm:$0xff]  ;;  %v1013_v21 = vld [vmem:[%s1624_s4 + $0x2] ss:$0 sm:$0xff] }
   0x8   :  { %v1014_v22 = vld [vmem:[%s1624_s4 + $0x7] ss:$0 sm:$0xff]  ;;  %v1015_v23 = vld [vmem:[%s1624_s4 + $0x6] ss:$0 sm:$0xff]  ;;  %v1016_v24 = vld [vmem:[%s1624_s4 + $0x5] ss:$0 sm:$0xff] }
   0x9   :  { %v1017_v25 = vld [vmem:[%s1624_s4 + $0xa] ss:$0 sm:$0xff]  ;;  %v1018_v26 = vld [vmem:[%s1624_s4 + $0x9] ss:$0 sm:$0xff]  ;;  %v1019_v27 = vld [vmem:[%s1624_s4 + $0x8] ss:$0 sm:$0xff] }
   0xa   :  { %129 = vperm.xlu2 %992, %v996_v4   ;;  %v1020_v28 = vld [vmem:[%s1624_s4 + $0xd] ss:$0 sm:$0xff]  ;;  %v1021_v29 = vld [vmem:[%s1624_s4 + $0xc] ss:$0 sm:$0xff]  ;;  %v1022_v30 = vld [vmem:[%s1624_s4 + $0xb] ss:$0 sm:$0xff] }
   0xb   :  { %121 = vperm.xlu1 %991, %v997_v5   ;;  %113 = vperm.xlu0 %990, %v998_v6   ;;  %v1023_v31 = vld [vmem:[%s1624_s4 + $0xf] ss:$0 sm:$0xff]  ;;  %v1024_v32 = vld [vmem:[%s1624_s4 + $0xe] ss:$0 sm:$0xff]  ;;  %v45_v42 = vld [vmem:[%s1628_s0 + $0x2] sm:$0x3] }
   0xc   :  { %v44_v54 = vld [vmem:[%s1628_s0] sm:$0x3]  ;;  %v46_v60 = vld [vmem:[%s1628_s0 + $0x4] sm:$0x3]  ;;  %v47_v61 = vld [vmem:[%s1628_s0 + $0x6] sm:$0x3] }
   0xd   :  { %v48_v4 = vld [vmem:[%s1628_s0 + $0x8] sm:$0x3]  ;;  %vm606_vm4 = vcmask 1043459   ;;  %vm608_vm5 = vcmask 1044484   ;;  %vm610_vm6 = vcmask 1045509   ;;  %vm612_vm7 = vcmask 1046534  }
   0xe   :  { %vm614_vm8 = vcmask 1047559   ;;  %vm695_vm9 = vcmask 130048   ;;  %vm617_vm10 = vcmask 64512   ;;  %vm972_vm11 = vcmask 15360  }
   0xf   :  { %vm974_vm12 = vcmask 9216  }
  0x12   :  { %141 = vperm.xlu2 %992, %v999_v7  }
  0x13   :  { %137 = vperm.xlu1 %991, %v1000_v8   ;;  %133 = vperm.xlu0 %990, %v1001_v9  }
  0x1a   :  { %153 = vperm.xlu2 %992, %v1002_v10   ;;  %v49_v10 = vld [vmem:[%s1628_s0 + $0xa] sm:$0x3] }
  0x1b   :  { %149 = vperm.xlu1 %991, %v1003_v11   ;;  %145 = vperm.xlu0 %990, %v1004_v12   ;;  %v50_v11 = vld [vmem:[%s1628_s0 + $0xc] sm:$0x3] }
  0x22   :  { %165 = vperm.xlu2 %992, %v1005_v13  }
  0x23   :  { %161 = vperm.xlu1 %991, %v1006_v14   ;;  %157 = vperm.xlu0 %990, %v1007_v15  }
  0x2a   :  { %241 = vperm.xlu2 %992, %v1008_v16  }
  0x2b   :  { %237 = vperm.xlu1 %991, %v1009_v17   ;;  %169 = vperm.xlu0 %990, %v1010_v18  }
  0x32   :  { %253 = vperm.xlu2 %992, %v1011_v19  }
  0x33   :  { %249 = vperm.xlu1 %991, %v1012_v20   ;;  %245 = vperm.xlu0 %990, %v1013_v21   ;;  %v51_v20 = vld [vmem:[%s1628_s0 + $0xe] sm:$0x3] }
  0x3a   :  { %265 = vperm.xlu2 %992, %v1014_v22  }
  0x3b   :  { %261 = vperm.xlu1 %991, %v1015_v23   ;;  %257 = vperm.xlu0 %990, %v1016_v24  }
  0x42   :  { %277 = vperm.xlu2 %992, %v1017_v25  }
  0x43   :  { %273 = vperm.xlu1 %991, %v1018_v26   ;;  %269 = vperm.xlu0 %990, %v1019_v27   ;;  %v52_v26 = vld [vmem:[%s1628_s0 + $0x10] sm:$0x3] }
  0x4a   :  { %289 = vperm.xlu2 %992, %v1020_v28   ;;  %v53_v28 = vld [vmem:[%s1628_s0 + $0x12] sm:$0x3] }
  0x4b   :  { %285 = vperm.xlu1 %991, %v1021_v29   ;;  %281 = vperm.xlu0 %990, %v1022_v30  }
  0x53   :  { %297 = vperm.xlu1 %991, %v1023_v31   ;;  %293 = vperm.xlu0 %990, %v1024_v32  }
  0x5c   :  { %v126_v33 = vpop.permute.xlu2 %125 }
  0x5d   :  { %v176_v9 = vmul.f32 %v126_v33, %v48_v4 }
  0x64   :  { %v130_v34 = vpop.permute.xlu2 %129 }
  0x65   :  { %v177_v15 = vmul.f32 %v130_v34, %v49_v10 }
  0x6c   :  { %v1227_v35 = vpop.permute.xlu2 %141 }
  0x6d   :  { %v180_v33 = vmul.f32 %v1227_v35, %v52_v26  ;;  %v1034_v26 = vld [vmem:[%s1626_s7 + $0x1] ss:$0 sm:$0xff] }
  0x74   :  { %v1229_v36 = vpop.permute.xlu2 %153 }
  0x75   :  { %v118_v37 = vpop.permute.xlu1 %117  ;;  %v110_v38 = vpop.permute.xlu0 %109 }
  0x76   :  { %v172_v55 = vmul.f32 %v110_v38, %v44_v54  ;;  %v174_v0 = vmul.f32 %v118_v37, %v46_v60  ;;  %v57_v60 = vld [vmem:[%s1628_s0 + $0x1a] sm:$0x3] }
  0x7c   :  { %v1231_v39 = vpop.permute.xlu2 %165 }
  0x7d   :  { %v122_v40 = vpop.permute.xlu1 %121  ;;  %v114_v41 = vpop.permute.xlu0 %113 }
  0x7e   :  { %v173_v43 = vmul.f32 %v114_v41, %v45_v42  ;;  %v175_v1 = vmul.f32 %v122_v40, %v47_v61  ;;  %v54_v40 = vld [vmem:[%s1628_s0 + $0x14] sm:$0x3] }
  0x84   :  { %v242_v44 = vpop.permute.xlu2 %241 }
  0x85   :  { %v301_v45 = vadd.f32 %v242_v44, %v173_v43  ;;  %v138_v46 = vpop.permute.xlu1 %137  ;;  %v134_v47 = vpop.permute.xlu0 %133 }
  0x86   :  { %v178_v16 = vmul.f32 %v134_v47, %v50_v11  ;;  %v179_v27 = vmul.f32 %v138_v46, %v51_v20  ;;  %v55_v47 = vld [vmem:[%s1628_s0 + $0x16] sm:$0x3]  ;;  %v1028_v20 = vld [vmem:[%s1625_s5 + $0x3] ss:$0 sm:$0xff] }
  0x87   :  { %v317_v48 = vmax.f32 %v301_v45, 0.0 }
  0x89   :  { %v336_v49 = vsel %vm332_vm0, %v317_v48, 0.0  ;;  %v56_v48 = vld [vmem:[%s1628_s0 + $0x18] sm:$0x3] }
  0x8a   :  { %337 = vadd.xlane.f32.xlu0 %v336_v49 }
  0x8c   :  { %v254_v62 = vpop.permute.xlu2 %253 }
  0x8d   :  { %v1237_v50 = vpop.permute.xlu1 %149  ;;  %v146_v51 = vpop.permute.xlu0 %145  ;;  %v304_v14 = vadd.f32 %v254_v62, %v176_v9 }
  0x8e   :  { %v181_v34 = vmul.f32 %v146_v51, %v53_v28  ;;  %v182_v35 = vmul.f32 %v1237_v50, %v54_v40  ;;  %v1036_v28 = vld [vmem:[%s1626_s7 + $0x3] ss:$0 sm:$0xff]  ;;  %v1045_v40 = vld [vmem:[%s1629_s6] ss:$0 sm:$0xff] }
  0x8f   :  { %v320_v23 = vmax.f32 %v304_v14, 0.0 }
  0x91   :  { %v345_v32 = vsel %vm332_vm0, %v320_v23, 0.0  ;;  %v1031_v23 = vld [vmem:[%s1625_s5 + $0x6] ss:$0 sm:$0xff] }
  0x94   :  { %v266_v17 = vpop.permute.xlu2 %265 }
  0x95   :  { %v1239_v52 = vpop.permute.xlu1 %161  ;;  %v1241_v53 = vpop.permute.xlu0 %157  ;;  %v307_v31 = vadd.f32 %v266_v17, %v179_v27  ;;  %v1035_v27 = vld [vmem:[%s1626_s7 + $0x2] ss:$0 sm:$0xff] }
  0x97   :  { %v323_v44 = vmax.f32 %v307_v31, 0.0  ;;  %v1039_v31 = vld [vmem:[%s1626_s7 + $0x4] ss:$0 sm:$0xff] }
  0x9c   :  { %v278_v41 = vpop.permute.xlu2 %277 }
  0x9d   :  { %v238_v56 = vpop.permute.xlu1 %237  ;;  %v1246_v57 = vpop.permute.xlu0 %169  ;;  %v310_v54 = vadd.f32 %v278_v41, %v182_v35  ;;  %v1046_v41 = vld [vmem:[%s1629_s6 + $0x1] ss:$0 sm:$0xff] }
  0x9e   :  { %v300_v58 = vadd.f32 %v238_v56, %v172_v55  ;;  %v354_v55 = vsel %vm332_vm0, %v323_v44, 0.0  ;;  %v183_v56 = vmul.f32 %v1229_v36, %v55_v47  ;;  %v185_v36 = vmul.f32 %v1239_v52, %v57_v60  ;;  %v1048_v44 = vld [vmem:[%s1627_s8 + $0x5] ss:$0 sm:$0xff] }
  0xa0   :  { %v316_v59 = vmax.f32 %v300_v58, 0.0  ;;  %v184_v58 = vmul.f32 %v1241_v53, %v56_v48  ;;  %v59_v53 = vld [vmem:[%s1628_s0 + $0x1e] sm:$0x3] }
  0xa1   :  { %v187_v9 = vmul.f32 %v1246_v57, %v59_v53  ;;  %v1026_v57 = vld [vmem:[%s1625_s5] ss:$0 sm:$0xff]  ;;  %v1056_v53 = vld [vmem:[%s1629_s6 + $0x7] ss:$0 sm:$0xff] }
  0xa2   :  { %v333_v63 = vsel %vm332_vm0, %v316_v59, 0.0 }
  0xa3   :  { %334 = vadd.xlane.f32.xlu2 %v333_v63  ;;  %v326_v63 = vmax.f32 %v310_v54, 0.0  ;;  %v1051_v54 = vld [vmem:[%s1629_s6 + $0x3] ss:$0 sm:$0xff] }
  0xa5   :  { %v250_v2 = vpop.permute.xlu1 %249  ;;  %v246_v3 = vpop.permute.xlu0 %245 }
  0xa6   :  { %v303_v5 = vadd.f32 %v250_v2, %v175_v1  ;;  %v302_v6 = vadd.f32 %v246_v3, %v174_v0  ;;  %v290_v0 = vpop.permute.xlu2 %289  ;;  %v58_v3 = vld [vmem:[%s1628_s0 + $0x1c] sm:$0x3] }
  0xa8   :  { %v319_v7 = vmax.f32 %v303_v5, 0.0  ;;  %v318_v8 = vmax.f32 %v302_v6, 0.0  ;;  %v313_v6 = vadd.f32 %v290_v0, %v185_v36  ;;  %v1055_v0 = vld [vmem:[%s1629_s6 + $0x6] ss:$0 sm:$0xff] }
  0xaa   :  { %v339_v12 = vsel %vm332_vm0, %v318_v8, 0.0  ;;  %v342_v13 = vsel %vm332_vm0, %v319_v7, 0.0  ;;  %v363_v7 = vsel %vm332_vm0, %v326_v63, 0.0  ;;  %v186_v8 = vmul.f32 %v1231_v39, %v58_v3  ;;  %v1025_v39 = vld [vmem:[%s1625_s5 + $0x1] ss:$0 sm:$0xff] }
  0xab   :  { %340 = vadd.xlane.f32.xlu1 %v339_v12  ;;  %343 = vadd.xlane.f32.xlu2 %v342_v13  ;;  %v329_v13 = vmax.f32 %v313_v6, 0.0 }
  0xad   :  { %v262_v18 = vpop.permute.xlu1 %261  ;;  %v258_v19 = vpop.permute.xlu0 %257 }
  0xae   :  { %v306_v21 = vadd.f32 %v262_v18, %v178_v16  ;;  %v305_v22 = vadd.f32 %v258_v19, %v177_v15  ;;  %v372_v18 = vsel %vm332_vm0, %v329_v13, 0.0  ;;  %v1027_v19 = vld [vmem:[%s1625_s5 + $0x2] ss:$0 sm:$0xff] }
  0xb0   :  { %v322_v24 = vmax.f32 %v306_v21, 0.0  ;;  %v321_v25 = vmax.f32 %v305_v22, 0.0  ;;  %v1029_v21 = vld [vmem:[%s1625_s5 + $0x4] ss:$0 sm:$0xff]  ;;  %v1030_v22 = vld [vmem:[%s1625_s5 + $0x5] ss:$0 sm:$0xff] }
  0xb2   :  { %v351_v29 = vsel %vm332_vm0, %v322_v24, 0.0  ;;  %v348_v30 = vsel %vm332_vm0, %v321_v25, 0.0  ;;  %v1032_v24 = vld [vmem:[%s1625_s5 + $0x7] ss:$0 sm:$0xff]  ;;  %v1033_v25 = vld [vmem:[%s1626_s7] ss:$0 sm:$0xff] }
  0xb3   :  { %352 = vadd.xlane.f32.xlu1 %v351_v29  ;;  %349 = vadd.xlane.f32.xlu0 %v348_v30  ;;  %v1037_v29 = vld [vmem:[%s1627_s8] ss:$0 sm:$0xff]  ;;  %v1038_v30 = vld [vmem:[%s1627_s8 + $0x1] ss:$0 sm:$0xff] }
  0xb4   :  { %346 = vadd.xlane.f32.xlu2 %v345_v32  ;;  %v1040_v32 = vld [vmem:[%s1627_s8 + $0x2] ss:$0 sm:$0xff] }
  0xb5   :  { %v274_v37 = vpop.permute.xlu1 %273  ;;  %v270_v38 = vpop.permute.xlu0 %269 }
  0xb6   :  { %v309_v42 = vadd.f32 %v274_v37, %v181_v34  ;;  %v308_v43 = vadd.f32 %v270_v38, %v180_v33  ;;  %v1041_v33 = vld [vmem:[%s1626_s7 + $0x5] ss:$0 sm:$0xff]  ;;  %v1042_v34 = vld [vmem:[%s1627_s8 + $0x3] ss:$0 sm:$0xff]  ;;  %v1043_v37 = vld [vmem:[%s1626_s7 + $0x6] ss:$0 sm:$0xff] }
  0xb7   :  { %v1044_v38 = vld [vmem:[%s1627_s8 + $0x4] ss:$0 sm:$0xff] }
  0xb8   :  { %v325_v45 = vmax.f32 %v309_v42, 0.0  ;;  %v324_v46 = vmax.f32 %v308_v43, 0.0  ;;  %v1047_v43 = vld [vmem:[%s1626_s7 + $0x7] ss:$0 sm:$0xff] }
  0xba   :  { %v360_v49 = vsel %vm332_vm0, %v325_v45, 0.0  ;;  %v357_v51 = vsel %vm332_vm0, %v324_v46, 0.0  ;;  %v1060_v45 = vmov 49.0   ;;  %v1049_v46 = vld [vmem:[%s1629_s6 + $0x2] ss:$0 sm:$0xff] }
  0xbb   :  { %361 = vadd.xlane.f32.xlu1 %v360_v49  ;;  %358 = vadd.xlane.f32.xlu0 %v357_v51  ;;  %1057 = vrcp.f32 %v1060_v45  ;;  %v1050_v51 = vld [vmem:[%s1627_s8 + $0x6] ss:$0 sm:$0xff] }
  0xbc   :  { %355 = vadd.xlane.f32.xlu2 %v354_v55 }
  0xbd   :  { %v286_v59 = vpop.permute.xlu1 %285  ;;  %v282_v50 = vpop.permute.xlu0 %281 }
  0xbe   :  { %v312_v61 = vadd.f32 %v286_v59, %v184_v58  ;;  %v311_v62 = vadd.f32 %v282_v50, %v183_v56  ;;  %v1052_v56 = vld [vmem:[%s1627_s8 + $0x7] ss:$0 sm:$0xff] }
  0xc0   :  { %v328_v1 = vmax.f32 %v312_v61, 0.0  ;;  %v327_v2 = vmax.f32 %v311_v62, 0.0  ;;  %v1053_v61 = vld [vmem:[%s1629_s6 + $0x4] ss:$0 sm:$0xff]  ;;  %v1054_v62 = vld [vmem:[%s1629_s6 + $0x5] ss:$0 sm:$0xff] }
  0xc1   :  { %v1058_v49 = vpop.eup %1057 }
  0xc2   :  { %v369_v4 = vsel %vm332_vm0, %v328_v1, 0.0  ;;  %v366_v5 = vsel %vm332_vm0, %v327_v2, 0.0  ;;  %v382_v55 = vmul.f32 49.0, %v1058_v49  ;;  %vm386_vm1 = vweird.f32 %v1058_v49 }
  0xc3   :  { %370 = vadd.xlane.f32.xlu1 %v369_v4  ;;  %367 = vadd.xlane.f32.xlu0 %v366_v5  ;;  %v592_v4 = vlaneseq }
  0xc4   :  { %364 = vadd.xlane.f32.xlu2 %v363_v7  ;;  %v383_v58 = vsub.f32 1.0, %v382_v55 }
  0xc5   :  { %v298_v10 = vpop.permute.xlu1 %297  ;;  %v294_v52 = vpop.permute.xlu0 %293 }
  0xc6   :  { %v315_v11 = vadd.f32 %v298_v10, %v187_v9  ;;  %v314_v12 = vadd.f32 %v294_v52, %v186_v8  ;;  %v384_v63 = vmul.f32 %v1058_v49, %v383_v58  ;;  %v1416_v10 = vand.u32 127, %v592_v4 }
  0xc8   :  { %v331_v14 = vmax.f32 %v315_v11, 0.0  ;;  %v330_v15 = vmax.f32 %v314_v12, 0.0  ;;  %v385_v1 = vadd.f32 %v1058_v49, %v384_v63 }
  0xca   :  { %v378_v16 = vsel %vm332_vm0, %v331_v14, 0.0  ;;  %v375_v17 = vsel %vm332_vm0, %v330_v15, 0.0  ;;  %v1410_v5 = vsel %vm386_vm1, %v1058_v49, %v385_v1 }
  0xcb   :  { %379 = vadd.xlane.f32.xlu1 %v378_v16  ;;  %376 = vadd.xlane.f32.xlu0 %v375_v17 }
  0xcc   :  { %373 = vadd.xlane.f32.xlu2 %v372_v18 }
  0xdf   :  { %443 = vperm.xlu0 %990, %v1025_v39  }
  0xe4   :  { %439 = vperm.xlu2 %992, %v1026_v57   ;;  %447 = vperm.xlu1 %991, %v1027_v19  }
  0xe7   :  { %451 = vperm.xlu0 %990, %v1028_v20  }
  0xec   :  { %455 = vperm.xlu2 %992, %v1029_v21   ;;  %459 = vperm.xlu1 %991, %v1030_v22  }
  0xef   :  { %463 = vperm.xlu0 %990, %v1031_v23  }
  0xf4   :  { %467 = vperm.xlu2 %992, %v1032_v24   ;;  %758 = vperm.xlu1 %991, %v1033_v25  }
  0xf7   :  { %762 = vperm.xlu0 %990, %v1034_v26  }
  0xfc   :  { %766 = vperm.xlu2 %992, %v1035_v27   ;;  %770 = vperm.xlu1 %991, %v1036_v28  }
  0xfd   :  { %v338_v47 = vpop.xlane.xlu0 %337 }
  0xfe   :  { %v389_v52 = vmul.f32 %v1410_v5, %v338_v47 }
  0xff   :  { %822 = vperm.xlu0 %990, %v1037_v29  }
 0x100   :  { %v664_v19 = vperm.slane %v389_v52, %v1416_v10 }
 0x104   :  { %826 = vperm.xlu2 %992, %v1038_v30   ;;  %774 = vperm.xlu1 %991, %v1039_v31  }
 0x107   :  { %830 = vperm.xlu0 %990, %v1040_v32  }
 0x10c   :  { %778 = vperm.xlu2 %992, %v1041_v33   ;;  %834 = vperm.xlu1 %991, %v1042_v34  }
 0x10f   :  { %782 = vperm.xlu0 %990, %v1043_v37  }
 0x114   :  { %838 = vperm.xlu2 %992, %v1044_v38   ;;  %503 = vperm.xlu1 %991, %v1045_v40  }
 0x116   :  { %v335_v42 = vpop.xlane.xlu2 %334 }
 0x117   :  { %507 = vperm.xlu0 %990, %v1046_v41   ;;  %v388_v6 = vmul.f32 %v1410_v5, %v335_v42 }
 0x119   :  { %v663_v13 = vperm.slane %v388_v6, %v1416_v10 }
 0x11b   :  { %v679_v22 = vsel %vm602_vm2, %v664_v19, %v663_v13  ;;  %v727_v19 = vld [vmem:[%s1630_s2 + $0x4] sm:$0x3] }
 0x11c   :  { %786 = vperm.xlu2 %992, %v1047_v43   ;;  %842 = vperm.xlu1 %991, %v1048_v44  }
 0x11e   :  { %v341_v35 = vpop.xlane.xlu1 %340  ;;  %v344_v48 = vpop.xlane.xlu2 %343 }
 0x11f   :  { %511 = vperm.xlu0 %990, %v1049_v46   ;;  %v390_v7 = vmul.f32 %v1410_v5, %v341_v35  ;;  %v391_v15 = vmul.f32 %v1410_v5, %v344_v48 }
 0x121   :  { %v665_v14 = vperm.slane %v390_v7, %v1416_v10  ;;  %v666_v23 = vperm.slane %v391_v15, %v1416_v10  ;;  %v726_v7 = vld [vmem:[%s1630_s2 + $0x2] sm:$0x3] }
 0x123   :  { %v680_v25 = vsel %vm604_vm3, %v665_v14, %v679_v22 }
 0x124   :  { %846 = vperm.xlu2 %992, %v1050_v51   ;;  %515 = vperm.xlu1 %991, %v1051_v54   ;;  %v681_v33 = vsel %vm606_vm4, %v666_v23, %v680_v25 }
 0x126   :  { %v1396_v59 = vpop.xlane.xlu1 %352  ;;  %v350_v50 = vpop.xlane.xlu0 %349 }
 0x127   :  { %v347_v60 = vpop.xlane.xlu2 %346  ;;  %850 = vperm.xlu0 %990, %v1052_v56   ;;  %v393_v24 = vmul.f32 %v1410_v5, %v350_v50  ;;  %v394_v44 = vmul.f32 %v1410_v5, %v1396_v59 }
 0x128   :  { %v392_v20 = vmul.f32 %v1410_v5, %v347_v60 }
 0x129   :  { %v668_v34 = vperm.slane %v393_v24, %v1416_v10  ;;  %v669_v56 = vperm.slane %v394_v44, %v1416_v10 }
 0x12a   :  { %v667_v28 = vperm.slane %v392_v20, %v1416_v10 }
 0x12c   :  { %519 = vperm.xlu2 %992, %v1053_v61   ;;  %523 = vperm.xlu1 %991, %v1054_v62   ;;  %v682_v45 = vsel %vm608_vm5, %v667_v28, %v681_v33 }
 0x12d   :  { %v683_v55 = vsel %vm610_vm6, %v668_v34, %v682_v45  ;;  %v407_v45 = vld [vmem:[%s1631_s1 + $0x2] sm:$0x3] }
 0x12e   :  { %v362_v2 = vpop.xlane.xlu1 %361  ;;  %v359_v3 = vpop.xlane.xlu0 %358  ;;  %v684_v60 = vsel %vm612_vm7, %v669_v56, %v683_v55  ;;  %v730_v55 = vld [vmem:[%s1630_s2 + $0xa] sm:$0x3] }
 0x12f   :  { %v356_v36 = vpop.xlane.xlu2 %355  ;;  %527 = vperm.xlu0 %990, %v1055_v0   ;;  %v397_v8 = vmul.f32 %v1410_v5, %v362_v2  ;;  %v396_v9 = vmul.f32 %v1410_v5, %v359_v3 }
 0x130   :  { %v395_v40 = vmul.f32 %v1410_v5, %v356_v36 }
 0x131   :  { %v672_v17 = vperm.slane %v397_v8, %v1416_v10  ;;  %v671_v18 = vperm.slane %v396_v9, %v1416_v10 }
 0x132   :  { %v670_v49 = vperm.slane %v395_v40, %v1416_v10 }
 0x133   :  { %v686_v26 = vsel %vm602_vm2, %v672_v17, %v671_v18 }
 0x134   :  { %531 = vperm.xlu2 %992, %v1056_v53   ;;  %v685_v61 = vsel %vm614_vm8, %v670_v49, %v684_v60  ;;  %v731_v49 = vld [vmem:[%s1630_s2 + $0xc] sm:$0x3]  ;;  %v408_v60 = vld [vmem:[%s1631_s1 + $0x4] sm:$0x3] }
 0x136   :  { %v371_v11 = vpop.xlane.xlu1 %370  ;;  %v368_v12 = vpop.xlane.xlu0 %367 }
 0x137   :  { %v365_v16 = vpop.xlane.xlu2 %364  ;;  %v399_v39 = vmul.f32 %v1410_v5, %v368_v12  ;;  %v400_v29 = vmul.f32 %v1410_v5, %v371_v11  ;;  %v725_v11 = vld [vmem:[%s1630_s2] sm:$0x3] }
 0x138   :  { %v398_v57 = vmul.f32 %v1410_v5, %v365_v16 }
 0x139   :  { %v674_v27 = vperm.slane %v399_v39, %v1416_v10  ;;  %v675_v46 = vperm.slane %v400_v29, %v1416_v10 }
 0x13a   :  { %v673_v21 = vperm.slane %v398_v57, %v1416_v10  ;;  %v729_v57 = vld [vmem:[%s1630_s2 + $0x8] sm:$0x3] }
 0x13c   :  { %v687_v30 = vsel %vm604_vm3, %v673_v21, %v686_v26 }
 0x13d   :  { %v688_v41 = vsel %vm606_vm4, %v674_v27, %v687_v30  ;;  %v728_v27 = vld [vmem:[%s1630_s2 + $0x6] sm:$0x3] }
 0x13e   :  { %v380_v31 = vpop.xlane.xlu1 %379  ;;  %v377_v32 = vpop.xlane.xlu0 %376  ;;  %v689_v48 = vsel %vm608_vm5, %v675_v46, %v688_v41 }
 0x13f   :  { %v402_v37 = vmul.f32 %v1410_v5, %v377_v32  ;;  %v374_v38 = vpop.xlane.xlu2 %373  ;;  %v403_v42 = vmul.f32 %v1410_v5, %v380_v31 }
 0x140   :  { %v401_v43 = vmul.f32 %v1410_v5, %v374_v38 }
 0x141   :  { %v677_v47 = vperm.slane %v402_v37, %v1416_v10  ;;  %v678_v51 = vperm.slane %v403_v42, %v1416_v10  ;;  %v406_v42 = vld [vmem:[%s1631_s1] sm:$0x3] }
 0x142   :  { %v676_v35 = vperm.slane %v401_v43, %v1416_v10 }
 0x144   :  { %v690_v54 = vsel %vm610_vm6, %v676_v35, %v689_v48 }
 0x145   :  { %v691_v58 = vsel %vm612_vm7, %v677_v47, %v690_v54 }
 0x146   :  { %v692_v59 = vsel %vm614_vm8, %v678_v51, %v691_v58 }
 0x147   :  { %716 = vmatpush.msra.mxu1 %v692_v59  ;;  %986 = vmatpush.msra.mxu3 %v692_v59  ;;  %v440_v50 = vpop.permute.xlu2 %439 }
 0x148   :  { %v470_v44 = vmul.f32 %v440_v50, %v406_v42 }
 0x149   :  { %717 = vmatpush.msra.mxu1 %v685_v61  ;;  %987 = vmatpush.msra.mxu3 %v685_v61 }
 0x14f   :  { %v1461_v62 = vpop.permute.xlu2 %455 }
 0x151   :  { %v444_v63 = vpop.permute.xlu0 %443 }
 0x152   :  { %v471_v48 = vmul.f32 %v444_v63, %v407_v45 }
 0x156   :  { %v1463_v0 = vpop.permute.xlu1 %447 }
 0x157   :  { %v1465_v1 = vpop.permute.xlu2 %467 }
 0x159   :  { %v1467_v2 = vpop.permute.xlu0 %451 }
 0x15e   :  { %v1469_v3 = vpop.permute.xlu1 %459 }
 0x15f   :  { %v767_v36 = vpop.permute.xlu2 %766 }
 0x160   :  { %v791_v24 = vmul.f32 %v767_v36, %v727_v19 }
 0x161   :  { %v1471_v53 = vpop.permute.xlu0 %463 }
 0x166   :  { %v759_v4 = vpop.permute.xlu1 %758 }
 0x167   :  { %v827_v6 = vpop.permute.xlu2 %826  ;;  %v789_v15 = vmul.f32 %v759_v4, %v725_v11 }
 0x169   :  { %v763_v8 = vpop.permute.xlu0 %762 }
 0x16a   :  { %v790_v9 = vmul.f32 %v763_v8, %v726_v7  ;;  %v472_v7 = vmul.f32 %v1463_v0, %v408_v60  ;;  %v410_v8 = vld [vmem:[%s1631_s1 + $0x8] sm:$0x3] }
 0x16c   :  { %v854_v52 = vadd.f32 %v827_v6, %v790_v9 }
 0x16e   :  { %v771_v12 = vpop.permute.xlu1 %770  ;;  %v862_v13 = vmax.f32 %v854_v52, 0.0 }
 0x16f   :  { %v779_v14 = vpop.permute.xlu2 %778  ;;  %v792_v31 = vmul.f32 %v771_v12, %v728_v27  ;;  %v409_v12 = vld [vmem:[%s1631_s1 + $0x6] sm:$0x3] }
 0x170   :  { %v872_v16 = vsel %vm332_vm0, %v862_v13, 0.0  ;;  %v794_v61 = vmul.f32 %v779_v14, %v730_v55  ;;  %v473_v0 = vmul.f32 %v1467_v2, %v409_v12 }
 0x171   :  { %v823_v17 = vpop.permute.xlu0 %822  ;;  %873 = vadd.xlane.f32.xlu0 %v872_v16  ;;  %v474_v16 = vmul.f32 %v1461_v62, %v410_v8  ;;  %v413_v62 = vld [vmem:[%s1631_s1 + $0xe] sm:$0x3] }
 0x172   :  { %v853_v18 = vadd.f32 %v823_v17, %v789_v15 }
 0x174   :  { %v861_v39 = vmax.f32 %v853_v18, 0.0  ;;  %v732_v18 = vld [vmem:[%s1630_s2 + $0xe] sm:$0x3] }
 0x176   :  { %v775_v20 = vpop.permute.xlu1 %774  ;;  %v869_v21 = vsel %vm332_vm0, %v861_v39, 0.0 }
 0x177   :  { %v793_v22 = vmul.f32 %v775_v20, %v729_v57  ;;  %v839_v23 = vpop.permute.xlu2 %838  ;;  %870 = vadd.xlane.f32.xlu1 %v869_v21 }
 0x179   :  { %v857_v25 = vadd.f32 %v839_v23, %v793_v22  ;;  %v831_v26 = vpop.permute.xlu0 %830 }
 0x17a   :  { %v855_v28 = vadd.f32 %v831_v26, %v791_v24  ;;  %v411_v24 = vld [vmem:[%s1631_s1 + $0xa] sm:$0x3] }
 0x17b   :  { %v865_v29 = vmax.f32 %v857_v25, 0.0 }
 0x17c   :  { %v863_v30 = vmax.f32 %v855_v28, 0.0 }
 0x17d   :  { %v881_v32 = vsel %vm332_vm0, %v865_v29, 0.0  ;;  %v477_v29 = vmul.f32 %v1465_v1, %v413_v62 }
 0x17e   :  { %v835_v33 = vpop.permute.xlu1 %834  ;;  %882 = vadd.xlane.f32.xlu0 %v881_v32  ;;  %v875_v34 = vsel %vm332_vm0, %v863_v30, 0.0  ;;  %v412_v32 = vld [vmem:[%s1631_s1 + $0xc] sm:$0x3] }
 0x17f   :  { %v856_v37 = vadd.f32 %v835_v33, %v792_v31  ;;  %v787_v38 = vpop.permute.xlu2 %786  ;;  %876 = vadd.xlane.f32.xlu2 %v875_v34  ;;  %v475_v31 = vmul.f32 %v1469_v3, %v411_v24 }
 0x180   :  { %v796_v22 = vmul.f32 %v787_v38, %v732_v18 }
 0x181   :  { %v864_v40 = vmax.f32 %v856_v37, 0.0  ;;  %v783_v41 = vpop.permute.xlu0 %782 }
 0x182   :  { %v795_v59 = vmul.f32 %v783_v41, %v731_v49  ;;  %v476_v41 = vmul.f32 %v1471_v53, %v412_v32  ;;  %v959_v53 = vld [vmem:[%s1632_s12 + $0x8] sm:$0x3] }
 0x183   :  { %v878_v43 = vsel %vm332_vm0, %v864_v40, 0.0 }
 0x184   :  { %879 = vadd.xlane.f32.xlu1 %v878_v43 }
 0x186   :  { %v504_v46 = vpop.permute.xlu1 %503 }
 0x187   :  { %v534_v47 = vadd.f32 %v504_v46, %v470_v44  ;;  %v847_v35 = vpop.permute.xlu2 %846 }
 0x188   :  { %v859_v63 = vadd.f32 %v847_v35, %v795_v59  ;;  %v958_v35 = vld [vmem:[%s1632_s12] sm:$0xff] }
 0x189   :  { %v542_v51 = vmax.f32 %v534_v47, 0.0  ;;  %v508_v54 = vpop.permute.xlu0 %507  ;;  %v404_v59 = vld [vmem:[%s1633_s9] sm:$0xff] }
 0x18a   :  { %v535_v56 = vadd.f32 %v508_v54, %v471_v48  ;;  %v867_v13 = vmax.f32 %v859_v63, 0.0  ;;  %982 = vmatmul.msk.f32.vlgmr.msra.gmra.mxu1 %vm695_vm9, %v404_v59 }
 0x18b   :  { %v550_v58 = vsel %vm332_vm0, %v542_v51, 0.0 }
 0x18c   :  { %v543_v50 = vmax.f32 %v535_v56, 0.0  ;;  %551 = vadd.xlane.f32.xlu2 %v550_v58  ;;  %v887_v20 = vsel %vm332_vm0, %v867_v13, 0.0 }
 0x18e   :  { %v843_v36 = vpop.permute.xlu1 %842  ;;  %v553_v4 = vsel %vm332_vm0, %v543_v50, 0.0  ;;  %v405_v50 = vld [vmem:[%s1633_s9 + $0x8] sm:$0x3] }
 0x18f   :  { %v858_v6 = vadd.f32 %v843_v36, %v794_v61  ;;  %554 = vadd.xlane.f32.xlu1 %v553_v4  ;;  %v520_v52 = vpop.permute.xlu2 %519  ;;  %983 = vmatmul.msk.f32.vlgmr.msra.gmra.mxu3 %vm695_vm9, %v405_v50 }
 0x190   :  { %v538_v39 = vadd.f32 %v520_v52, %v474_v16 }
 0x191   :  { %v866_v9 = vmax.f32 %v858_v6, 0.0  ;;  %v512_v11 = vpop.permute.xlu0 %511 }
 0x192   :  { %v536_v14 = vadd.f32 %v512_v11, %v472_v7  ;;  %v546_v25 = vmax.f32 %v538_v39, 0.0 }
 0x193   :  { %v884_v15 = vsel %vm332_vm0, %v866_v9, 0.0 }
 0x194   :  { %v544_v17 = vmax.f32 %v536_v14, 0.0  ;;  %885 = vadd.xlane.f32.xlu0 %v884_v15  ;;  %v562_v38 = vsel %vm332_vm0, %v546_v25, 0.0 }
 0x196   :  { %v516_v57 = vpop.permute.xlu1 %515  ;;  %v556_v19 = vsel %vm332_vm0, %v544_v17, 0.0 }
 0x197   :  { %v537_v21 = vadd.f32 %v516_v57, %v473_v0  ;;  %557 = vadd.xlane.f32.xlu2 %v556_v19  ;;  %888 = vadd.xlane.f32.xlu1 %v887_v20  ;;  %v532_v27 = vpop.permute.xlu2 %531 }
 0x198   :  { %v541_v33 = vadd.f32 %v532_v27, %v477_v29 }
 0x199   :  { %v545_v23 = vmax.f32 %v537_v21, 0.0  ;;  %v851_v2 = vpop.permute.xlu0 %850 }
 0x19a   :  { %v860_v26 = vadd.f32 %v851_v2, %v796_v22  ;;  %v549_v43 = vmax.f32 %v541_v33, 0.0 }
 0x19b   :  { %v559_v28 = vsel %vm332_vm0, %v545_v23, 0.0 }
 0x19c   :  { %v868_v30 = vmax.f32 %v860_v26, 0.0  ;;  %560 = vadd.xlane.f32.xlu0 %v559_v28  ;;  %v571_v47 = vsel %vm332_vm0, %v549_v43, 0.0 }
 0x19e   :  { %v524_v34 = vpop.permute.xlu1 %523  ;;  %v890_v37 = vsel %vm332_vm0, %v868_v30, 0.0  ;;  %v901_v30 = vld [vmem:[%s1634_s11] sm:$0xff] }
 0x19f   :  { %v539_v40 = vadd.f32 %v524_v34, %v475_v31  ;;  %891 = vadd.xlane.f32.xlu2 %v890_v37  ;;  %563 = vadd.xlane.f32.xlu1 %v562_v38 }
 0x1a1   :  { %v547_v1 = vmax.f32 %v539_v40, 0.0  ;;  %v528_v42 = vpop.permute.xlu0 %527 }
 0x1a2   :  { %v540_v44 = vadd.f32 %v528_v42, %v476_v41 }
 0x1a3   :  { %v565_v3 = vsel %vm332_vm0, %v547_v1, 0.0 }
 0x1a4   :  { %v548_v45 = vmax.f32 %v540_v44, 0.0  ;;  %566 = vadd.xlane.f32.xlu0 %v565_v3 }
 0x1a6   :  { %v568_v46 = vsel %vm332_vm0, %v548_v45, 0.0 }
 0x1a7   :  { %569 = vadd.xlane.f32.xlu2 %v568_v46  ;;  %572 = vadd.xlane.f32.xlu1 %v571_v47 }
 0x1b8   :  { %962 = vperm.xlu0 %990, %v958_v35  }
 0x1bf   :  { %967 = vperm.xlu2 %992, %v959_v53  }
 0x1e4   :  { %v874_v49 = vpop.xlane.xlu0 %873 }
 0x1e5   :  { %v894_v36 = vmul.f32 %v874_v49, %v1410_v5  ;;  %v902_v49 = vld [vmem:[%s1634_s11 + $0x8] sm:$0x3] }
 0x1e7   :  { %v912_v52 = vperm.slane %v894_v36, %v1416_v10 }
 0x1ea   :  { %v871_v48 = vpop.xlane.xlu1 %870 }
 0x1eb   :  { %v893_v60 = vmul.f32 %v871_v48, %v1410_v5 }
 0x1ed   :  { %v911_v8 = vperm.slane %v893_v60, %v1416_v10 }
 0x1ef   :  { %v919_v15 = vsel %vm602_vm2, %v912_v52, %v911_v8 }
 0x1f1   :  { %v883_v55 = vpop.xlane.xlu0 %882 }
 0x1f2   :  { %v877_v51 = vpop.xlane.xlu2 %876  ;;  %v897_v13 = vmul.f32 %v883_v55, %v1410_v5 }
 0x1f3   :  { %v895_v63 = vmul.f32 %v877_v51, %v1410_v5 }
 0x1f4   :  { %v915_v39 = vperm.slane %v897_v13, %v1416_v10 }
 0x1f5   :  { %v913_v9 = vperm.slane %v895_v63, %v1416_v10 }
 0x1f7   :  { %v880_v54 = vpop.xlane.xlu1 %879  ;;  %v920_v17 = vsel %vm604_vm3, %v913_v9, %v919_v15 }
 0x1f8   :  { %v896_v4 = vmul.f32 %v880_v54, %v1410_v5 }
 0x1fa   :  { %v914_v11 = vperm.slane %v896_v4, %v1416_v10 }
 0x1fc   :  { %v921_v0 = vsel %vm606_vm4, %v914_v11, %v920_v17 }
 0x1fd   :  { %v922_v24 = vsel %vm608_vm5, %v915_v39, %v921_v0 }
 0x1ff   :  { %v552_v56 = vpop.xlane.xlu2 %551 }
 0x200   :  { %v574_v23 = vmul.f32 %v552_v56, %v1410_v5 }
 0x202   :  { %v555_v58 = vpop.xlane.xlu1 %554  ;;  %v594_v34 = vperm.slane %v574_v23, %v1416_v10 }
 0x203   :  { %v575_v57 = vmul.f32 %v555_v58, %v1410_v5 }
 0x205   :  { %v595_v28 = vperm.slane %v575_v57, %v1416_v10 }
 0x207   :  { %v886_v61 = vpop.xlane.xlu0 %885  ;;  %v603_v41 = vsel %vm602_vm2, %v595_v28, %v594_v34  ;;  %v719_v55 = vpop.f32.mrf.mxu1 }
 0x208   :  { %v898_v12 = vmul.f32 %v886_v61, %v1410_v5 }
 0x20a   :  { %v889_v6 = vpop.xlane.xlu1 %888  ;;  %v558_v7 = vpop.xlane.xlu2 %557  ;;  %v916_v18 = vperm.slane %v898_v12, %v1416_v10 }
 0x20b   :  { %v899_v14 = vmul.f32 %v889_v6, %v1410_v5  ;;  %v576_v22 = vmul.f32 %v558_v7, %v1410_v5 }
 0x20c   :  { %v923_v27 = vsel %vm610_vm6, %v916_v18, %v922_v24 }
 0x20d   :  { %v917_v19 = vperm.slane %v899_v14, %v1416_v10  ;;  %v596_v31 = vperm.slane %v576_v22, %v1416_v10 }
 0x20f   :  { %v561_v16 = vpop.xlane.xlu0 %560  ;;  %v924_v29 = vsel %vm612_vm7, %v917_v19, %v923_v27  ;;  %v605_v44 = vsel %vm604_vm3, %v596_v31, %v603_v41 }
 0x210   :  { %v577_v2 = vmul.f32 %v561_v16, %v1410_v5 }
 0x212   :  { %v564_v20 = vpop.xlane.xlu1 %563  ;;  %v892_v21 = vpop.xlane.xlu2 %891  ;;  %v597_v37 = vperm.slane %v577_v2, %v1416_v10 }
 0x213   :  { %v900_v62 = vmul.f32 %v892_v21, %v1410_v5  ;;  %v578_v25 = vmul.f32 %v564_v20, %v1410_v5  ;;  %v722_v63 = vpop.f32.mrf.mxu3 }
 0x214   :  { %v607_v46 = vsel %vm606_vm4, %v597_v37, %v605_v44 }
 0x215   :  { %v918_v26 = vperm.slane %v900_v62, %v1416_v10  ;;  %v598_v40 = vperm.slane %v578_v25, %v1416_v10 }
 0x217   :  { %v567_v32 = vpop.xlane.xlu0 %566  ;;  %v925_v33 = vsel %vm614_vm8, %v918_v26, %v924_v29  ;;  %v609_v53 = vsel %vm608_vm5, %v598_v40, %v607_v46 }
 0x218   :  { %v579_v38 = vmul.f32 %v567_v32, %v1410_v5  ;;  %948 = vmatpush.msra.mxu2 %v925_v33 }
 0x219   :  { %984 = vmatmul.msk.f32.vlgmr.msra.gmra.mxu2 %vm617_vm10, %v901_v30 }
 0x21a   :  { %v599_v1 = vperm.slane %v579_v38, %v1416_v10  ;;  %v573_v42 = vpop.xlane.xlu1 %572  ;;  %v570_v43 = vpop.xlane.xlu2 %569 }
 0x21b   :  { %v581_v3 = vmul.f32 %v573_v42, %v1410_v5  ;;  %v580_v45 = vmul.f32 %v570_v43, %v1410_v5  ;;  %v582_v5 = vld [vmem:[%s1635_s10] sm:$0xff] }
 0x21c   :  { %v611_v48 = vsel %vm610_vm6, %v599_v1, %v609_v53 }
 0x21d   :  { %v601_v47 = vperm.slane %v581_v3, %v1416_v10  ;;  %v600_v35 = vperm.slane %v580_v45, %v1416_v10  ;;  %v583_v10 = vld [vmem:[%s1635_s10 + $0x8] sm:$0x3] }
 0x21f   :  { %v613_v51 = vsel %vm612_vm7, %v600_v35, %v611_v48 }
 0x220   :  { %v615_v54 = vsel %vm614_vm8, %v601_v47, %v613_v51 }
 0x221   :  { %639 = vmatpush.msra.mxu0 %v615_v54  ;;  %985 = vmatmul.msk.f32.gmra.mxu2 %vm617_vm10, %v902_v49 }
 0x222   :  { %980 = vmatmul.msk.f32.vlgmr.msra.gmra.mxu0 %vm617_vm10, %v582_v5  ;;  %v968_v8 = vpop.permute.xlu2 %967 }
 0x22a   :  { %981 = vmatmul.msk.f32.gmra.mxu0 %vm617_vm10, %v583_v10  ;;  %v963_v60 = vpop.permute.xlu0 %962 }
 0x29c   :  { %v950_v56 = vpop.f32.mrf.mxu2 }
 0x29f   :  { %v641_v58 = vpop.f32.mrf.mxu0 }
 0x2a0   :  { %v720_v59 = vadd.f32 %v719_v55, %v641_v58 }
 0x2a2   :  { %v956_v50 = vadd.f32 %v950_v56, %v720_v59 }
 0x2a4   :  { %v970_v61 = vadd.f32 %v963_v60, %v956_v50  ;;  %v953_v4 = vpop.f32.mrf.mxu2 }
 0x2a6   :  { %973 = vst.msk [vmem:[%s1636_s13] sm:$0xff] %vm972_vm11, %v970_v61 }
 0x2a7   :  { %v644_v36 = vpop.f32.mrf.mxu0 }
 0x2a8   :  { %v723_v6 = vadd.f32 %v722_v63, %v644_v36 }
 0x2aa   :  { %v957_v7 = vadd.f32 %v953_v4, %v723_v6 }
 0x2ac   :  { %v971_v9 = vadd.f32 %v968_v8, %v957_v7 }
 0x2ae   :  { %975 = vst.msk [vmem:[%s1636_s13 + $0x8] sm:$0x3] %vm974_vm12, %v971_v9 }

</bundles_post_ra>
